<compile_context>
chip_gen: v6e
topology: v6e:2x2x1
jax: 0.10.0
libtpu: 0.0.40
codegen_flags: <defaults>
</compile_context>

<pallas_src>
import functools

import numpy as np
import jax
import jax.numpy as jnp
from jax.experimental import pallas as pl
from jax.experimental.pallas import tpu as pltpu

TM_MAX = 4096  # max row tile for the fused MLP head (sweep 2048-8192 if desired)


def _round_up(x, m):
    return ((x + m - 1) // m) * m


def _pick_tm(n, tm_max=TM_MAX):
    # Big tiles amortize the per-grid-step overhead; keep the grid >= 2 tiles
    # (when N allows) so v7x's two TensorCores both get a share of the
    # "parallel" grid axis.  v5e/v6e are single-TC, unaffected by the clamp.
    half = -(-n // 2)                       # ceil(n / 2)
    tm = _round_up(max(half, 8), 256)
    return int(max(256, min(tm_max, tm)))


# ----------------------------------------------------------------------------
# Pallas kernel: fused color_net + quantization + specular_net
# ----------------------------------------------------------------------------
def _sigmoid(x):
    # exp lands on the EUP; approx reciprocal also on the EUP -> avoids the
    # multi-op VPU f32 divide.  Accuracy is ample (geo is 8-bit quantized).
    return pl.reciprocal(1.0 + jnp.exp(-x), approx=True)


def _head_kernel(n_rest, hidden, hd_ref, wf_ref, *refs):
    color_rest = refs[:n_rest]              # color_net layers 1..L-1
    s0b_ref, s1_ref = refs[n_rest:n_rest + 2]
    out_ref = refs[n_rest + 2]

    hd = hd_ref[...]                        # bf16 [TM, d_feat + 3]

    # Fused first layer: one MXU pass over hd produces both the color-net
    # layer-0 pre-activation (lanes :hidden) and the view-direction part of
    # the specular-net layer-0 pre-activation (lanes hidden:).
    x0 = jnp.dot(hd, wf_ref[...], preferred_element_type=jnp.float32)
    x = x0[:, :hidden]                      # [TM, hidden]  f32
    s_d = x0[:, hidden:]                    # [TM, spec_hidden] f32

    # Remaining color_net layers (bias-free): ReLU between layers.
    for w_ref in color_rest:
        x = jnp.maximum(x, 0.0)
        x = jnp.dot(x.astype(w_ref.dtype), w_ref[...],
                    preferred_element_type=jnp.float32)

    geo = _sigmoid(x)                       # [TM, 3 + specular_dim]
    # Straight-through 8-bit quantization: forward value == floor(geo*255)/255
    # (geo >= 0, so floor == trunc, matching torch's .int()).
    # TODO(synk): no custom_vjp -> the STE gradient path is not reproduced
    # (forward-only kernel).
    geo = jnp.floor(geo * 255.0) * (1.0 / 255.0)

    diffuse = geo[:, :3]

    # specular_net layer 0 = dot(d, W0[:3]) + dot(geo[:,3:], W0[3:]); the d
    # part already came out of the fused first dot, geo part uses a padded
    # weight (zero rows for the diffuse lanes) -> no in-kernel concatenate.
    s = s_d + jnp.dot(geo.astype(s0b_ref.dtype), s0b_ref[...],
                      preferred_element_type=jnp.float32)
    s = jnp.maximum(s, 0.0)
    s = jnp.dot(s.astype(s1_ref.dtype), s1_ref[...],
                preferred_element_type=jnp.float32)
    specular = _sigmoid(s)

    # Single small bf16 output block [TM, 6] = [diffuse | specular], written
    # as lane-slice stores (no cross-lane concat).
    out_ref[:, 0:3] = diffuse.astype(out_ref.dtype)
    out_ref[:, 3:6] = specular.astype(out_ref.dtype)


# ----------------------------------------------------------------------------
# One-time weight preparation (hoisted out of the per-call hot path)
# ----------------------------------------------------------------------------
def prepare_head_params(color_ws, spec_ws, dtype=jnp.bfloat16):
    """Pad/fuse/cast the MLP weights once, so the forward pass is just the
    pallas_call.  Layout (d_all = enc_dim + 3, hd = [features | d]):
      w_first : [d_all, hidden + spec_hidden]  (color W0 ++ padded specular W0[d])
      color_rest : color_net layers 1..L-1 (bf16)
      s0b : [geo_dim, spec_hidden]  (specular W0 rows for geo[:,3:], zero-padded)
      s1  : [spec_hidden, 3]
    """
    w0 = color_ws[0]                                   # (d_feat, hidden)
    d_feat, hidden = int(w0.shape[0]), int(w0.shape[1])
    s0, s1 = spec_ws                                   # (3+spec, sh), (sh, 3)
    sh = int(s0.shape[1])
    geo_dim = int(color_ws[-1].shape[1])               # 3 + specular_dim

    w0_pad = jnp.concatenate([w0, jnp.zeros((3, hidden), w0.dtype)], axis=0)
    s0a_pad = jnp.concatenate([jnp.zeros((d_feat, sh), s0.dtype), s0[:3]],
                              axis=0)
    w_first = jnp.concatenate([w0_pad, s0a_pad], axis=1).astype(dtype)

    color_rest = tuple(w.astype(dtype) for w in color_ws[1:])
    s0b = jnp.concatenate([jnp.zeros((3, sh), s0.dtype), s0[3:]],
                          axis=0).astype(dtype)
    s1 = s1.astype(dtype)

    return dict(w_first=w_first, color_rest=color_rest, s0b=s0b, s1=s1,
                hidden=hidden, geo_dim=geo_dim)


# ----------------------------------------------------------------------------
# Pallas wrapper for the fused head
# ----------------------------------------------------------------------------
def mlp_head_pallas(hd, head):
    """hd: [N, enc_dim + 3] bf16 encoded features with view dirs appended."""
    N, d_all = hd.shape
    hd = hd.astype(jnp.bfloat16)

    tm = _pick_tm(N)
    n_pad = _round_up(N, tm)
    if n_pad != N:
        hd = jnp.pad(hd, ((0, n_pad - N), (0, 0)))

    weights = (head["w_first"],) + tuple(head["color_rest"]) \
        + (head["s0b"], head["s1"])
    hidden = head["hidden"]

    def full_spec(w):
        # Constant index_map: weights stay resident in VMEM across the grid.
        return pl.BlockSpec(w.shape, lambda i: (0, 0))

    kernel = functools.partial(_head_kernel, len(head["color_rest"]), hidden)

    flops_row = sum(2 * int(w.shape[0]) * int(w.shape[1]) for w in weights)
    bytes_accessed = (hd.size * hd.dtype.itemsize
                      + n_pad * 6 * 2
                      + sum(int(w.size) * w.dtype.itemsize for w in weights))

    out = pl.pallas_call(
        kernel,
        out_shape=jax.ShapeDtypeStruct((n_pad, 6), jnp.bfloat16),
        grid=(n_pad // tm,),
        in_specs=[pl.BlockSpec((tm, d_all), lambda i: (i, 0))]
                 + [full_spec(w) for w in weights],
        out_specs=pl.BlockSpec((tm, 6), lambda i: (i, 0)),
        compiler_params=pltpu.CompilerParams(
            dimension_semantics=("parallel",)),
        cost_estimate=pl.CostEstimate(
            flops=flops_row * n_pad,
            transcendentals=(head["geo_dim"] + 3) * n_pad,
            bytes_accessed=bytes_accessed),
    )(hd, *weights)

    out = out[:N].astype(jnp.float32)
    diffuse = out[:, 0:3]
    specular = out[:, 3:6]
    return diffuse, specular, diffuse + specular


# ----------------------------------------------------------------------------
# Plain-JAX glue: AABB contraction + multi-resolution hash-grid encoding
# ----------------------------------------------------------------------------
# TODO(synk): hash-table gather is data-dependent; no clean Pallas TPU gather,
# so the encoding lookup stays in plain JAX (one vectorized gather per level).
def hash_encode(x, tables, n_min, b_scale, out_dtype=jnp.bfloat16):
    """x: [N,3] in [0,1]; tables: [L, T, F] -> [N, L*F] (out_dtype)."""
    L, T, F = tables.shape
    primes = np.array([1, 2654435761, 805459861], dtype=np.uint32)
    corners = np.array([[(c >> k) & 1 for k in range(3)] for c in range(8)],
                       dtype=np.uint32)                       # [8, 3]
    corners_b = corners.astype(bool)[None]                     # [1, 8, 3]
    feats = []
    for l in range(L):
        scale = n_min * (b_scale ** l) - 1.0
        res = int(np.ceil(scale)) + 1
        pos = x * scale + 0.5
        pos_f = jnp.floor(pos)
        frac = pos - pos_f                                      # [N, 3]
        pos_i = pos_f.astype(jnp.uint32)                        # [N, 3]
        idx = pos_i[:, None, :] + corners[None]                 # [N, 8, 3]
        if res ** 3 <= T:
            index = (idx[..., 0]
                     + idx[..., 1] * np.uint32(res)
                     + idx[..., 2] * np.uint32(res * res))
        else:
            index = ((idx[..., 0] * primes[0])
                     ^ (idx[..., 1] * primes[1])
                     ^ (idx[..., 2] * primes[2]))
        index = (index % np.uint32(T)).astype(jnp.int32)        # [N, 8]
        w = jnp.prod(jnp.where(corners_b, frac[:, None, :],
                               1.0 - frac[:, None, :]), axis=-1)  # [N, 8]
        vals = tables[l][index]                                 # [N, 8, F]
        feats.append(jnp.sum(w[..., None] * vals, axis=1).astype(out_dtype))
    return jnp.concatenate(feats, axis=-1)


def contract_aabb(x, aabb):
    # nerfacc AABB contraction: map roi -> [0, 1]
    return (x - aabb[0]) / (aabb[1] - aabb[0])


def tcngp_forward(x, d, c, params, shading="full", make_contract=True):
    if make_contract:
        x = contract_aabb(x, params["aabb"])
    h = hash_encode(x, params["tables"], params["n_min"], params["b"],
                    out_dtype=jnp.bfloat16)
    pieces = [h]
    if c is not None:
        c = jnp.broadcast_to(c, (x.shape[0], c.shape[-1])) \
            if c.shape[0] == 1 else c
        pieces.append(c.astype(jnp.bfloat16))
    pieces.append(d.astype(jnp.bfloat16))   # fuse view dirs into the MLP input
    hd = jnp.concatenate(pieces, axis=-1)

    diffuse, specular, color = mlp_head_pallas(hd, params["head"])

    if shading == "diffuse" or params["specular_dim"] == 0:
        return diffuse, None
    if shading == "specular":
        return specular, specular
    return color, specular


# ----------------------------------------------------------------------------
# Deterministic synthetic parameter init (shapes follow TCNGP.__init__)
# ----------------------------------------------------------------------------
def init_params(key, *, L, F, log2_T, per_level_scale, dim_hidden, num_layers,
                specular_dim, specular_dim_mlp, scale):
    T = 2 ** log2_T
    n_min = 16
    b = float(np.exp(np.log(2048 * per_level_scale / n_min) / (L - 1)))

    n_keys = 1 + num_layers + 2
    keys = jax.random.split(key, n_keys)

    tables = jax.random.uniform(keys[0], (L, T, F),
                                minval=-1e-4, maxval=1e-4, dtype=jnp.float32)

    enc_dim = L * F
    dims = [enc_dim] + [dim_hidden] * (num_layers - 1) + [3 + specular_dim]
    color_ws = []
    for l in range(num_layers):
        bound = 1.0 / np.sqrt(dims[l])
        color_ws.append(jax.random.uniform(
            keys[1 + l], (dims[l], dims[l + 1]),
            minval=-bound, maxval=bound, dtype=jnp.float32))

    sdims = [3 + specular_dim, specular_dim_mlp, 3]
    spec_ws = []
    for l in range(2):
        bound = 1.0 / np.sqrt(sdims[l])
        spec_ws.append(jax.random.uniform(
            keys[1 + num_layers + l], (sdims[l], sdims[l + 1]),
            minval=-bound, maxval=bound, dtype=jnp.float32))

    aabb = jnp.stack([-jnp.ones((3,), jnp.float32) * scale,
                      jnp.ones((3,), jnp.float32) * scale], axis=0)

    # One-time weight padding / fusion / bf16 cast for the Pallas head.
    head = prepare_head_params(color_ws, spec_ws)

    return dict(tables=tables, head=head, aabb=aabb,
                n_min=n_min, b=b, specular_dim=specular_dim)


# ----------------------------------------------------------------------------
if __name__ == "__main__":
    key = jax.random.PRNGKey(0)
    kp, kx, kd = jax.random.split(key, 3)

    params = init_params(
        kp, L=4, F=2, log2_T=12, per_level_scale=16,
        dim_hidden=64, num_layers=3, specular_dim=3,
        specular_dim_mlp=64, scale=1.0)

    N = 1024  # -> TM=512, 2 tiles: both TensorCores used on v7x
    x = jax.random.uniform(kx, (N, 3), minval=-1.0, maxval=1.0,
                           dtype=jnp.float32)
    d = jax.random.normal(kd, (N, 3), dtype=jnp.float32)
    d = d / jnp.linalg.norm(d, axis=-1, keepdims=True)
    c = None  # module's color_net.dim_in only matches c=None

    color, specular = tcngp_forward(x, d, c, params,
                                    shading="full", make_contract=True)
    jax.block_until_ready((color, specular))

    assert color.shape == (N, 3) and specular.shape == (N, 3)
    assert bool(jnp.all(jnp.isfinite(color)))
    assert bool(jnp.all(jnp.isfinite(specular)))
    print("KERNEL_OK")
</pallas_src>

<mosaic_0001>
module attributes {stable_mosaic.version = 11 : i64} {
  func.func @_head_kernel(%arg0: i32, %arg1: memref<512x11xbf16, #tpu.memory_space<vmem>>, %arg2: memref<11x128xbf16, #tpu.memory_space<vmem>>, %arg3: memref<64x64xbf16, #tpu.memory_space<vmem>>, %arg4: memref<64x6xbf16, #tpu.memory_space<vmem>>, %arg5: memref<6x64xbf16, #tpu.memory_space<vmem>>, %arg6: memref<64x3xbf16, #tpu.memory_space<vmem>>, %arg7: memref<512x6xbf16, #tpu.memory_space<vmem>>) attributes {dimension_semantics = [#tpu.dimension_semantics<parallel>], iteration_bounds = array<i64: 2>, scalar_prefetch = 0 : i64, scratch_operands = 0 : i64, tpu.core_type = #tpu.core_type<tc>, window_params = [{transform_indices = @transform_0, window_bounds = array<i64: 512, 11>}, {pipeline_mode = #tpu.pipeline_mode<synchronous>, transform_indices = @transform_1, window_bounds = array<i64: 11, 128>}, {pipeline_mode = #tpu.pipeline_mode<synchronous>, transform_indices = @transform_2, window_bounds = array<i64: 64, 64>}, {pipeline_mode = #tpu.pipeline_mode<synchronous>, transform_indices = @transform_3, window_bounds = array<i64: 64, 6>}, {pipeline_mode = #tpu.pipeline_mode<synchronous>, transform_indices = @transform_4, window_bounds = array<i64: 6, 64>}, {pipeline_mode = #tpu.pipeline_mode<synchronous>, transform_indices = @transform_5, window_bounds = array<i64: 64, 3>}, {transform_indices = @transform_6, window_bounds = array<i64: 512, 6>}]} {
    %c0 = arith.constant 0 : index
    %c0_0 = arith.constant 0 : index
    %0 = vector.load %arg1[%c0, %c0_0] : memref<512x11xbf16, #tpu.memory_space<vmem>>, vector<512x11xbf16>
    %c0_1 = arith.constant 0 : index
    %c0_2 = arith.constant 0 : index
    %1 = vector.load %arg2[%c0_1, %c0_2] : memref<11x128xbf16, #tpu.memory_space<vmem>>, vector<11x128xbf16>
    %cst = arith.constant dense<0.000000e+00> : vector<512x128xf32>
    %2 = tpu.matmul %0, %1, %cst {dimension_numbers = #tpu.dot_dimension_numbers<[1], [0], [0], [1], [0, 0, 1, 1], [], []>} : vector<512x11xbf16>, vector<11x128xbf16>, vector<512x128xf32> -> vector<512x128xf32>
    %3 = vector.extract_strided_slice %2 {offsets = [0, 0], sizes = [512, 64], strides = [1, 1]} : vector<512x128xf32> to vector<512x64xf32>
    %4 = vector.extract_strided_slice %2 {offsets = [0, 64], sizes = [512, 64], strides = [1, 1]} : vector<512x128xf32> to vector<512x64xf32>
    %cst_3 = arith.constant 0.000000e+00 : f32
    %5 = vector.broadcast %cst_3 : f32 to vector<512x64xf32>
    %6 = arith.maximumf %3, %5 : vector<512x64xf32>
    %7 = arith.truncf %6 : vector<512x64xf32> to vector<512x64xbf16>
    %c0_4 = arith.constant 0 : index
    %c0_5 = arith.constant 0 : index
    %8 = vector.load %arg3[%c0_4, %c0_5] : memref<64x64xbf16, #tpu.memory_space<vmem>>, vector<64x64xbf16>
    %cst_6 = arith.constant dense<0.000000e+00> : vector<512x64xf32>
    %9 = tpu.matmul %7, %8, %cst_6 {dimension_numbers = #tpu.dot_dimension_numbers<[1], [0], [0], [1], [0, 0, 1, 1], [], []>} : vector<512x64xbf16>, vector<64x64xbf16>, vector<512x64xf32> -> vector<512x64xf32>
    %cst_7 = arith.constant 0.000000e+00 : f32
    %10 = vector.broadcast %cst_7 : f32 to vector<512x64xf32>
    %11 = arith.maximumf %9, %10 : vector<512x64xf32>
    %12 = arith.truncf %11 : vector<512x64xf32> to vector<512x64xbf16>
    %c0_8 = arith.constant 0 : index
    %c0_9 = arith.constant 0 : index
    %13 = vector.load %arg4[%c0_8, %c0_9] : memref<64x6xbf16, #tpu.memory_space<vmem>>, vector<64x6xbf16>
    %cst_10 = arith.constant dense<0.000000e+00> : vector<512x6xf32>
    %14 = tpu.matmul %12, %13, %cst_10 {dimension_numbers = #tpu.dot_dimension_numbers<[1], [0], [0], [1], [0, 0, 1, 1], [], []>} : vector<512x64xbf16>, vector<64x6xbf16>, vector<512x6xf32> -> vector<512x6xf32>
    %cst_11 = arith.constant 0.000000e+00 : f32
    %15 = vector.broadcast %cst_11 : f32 to vector<512x6xf32>
    %16 = arith.subf %15, %14 : vector<512x6xf32>
    %17 = math.exp %16 : vector<512x6xf32>
    %cst_12 = arith.constant 1.000000e+00 : f32
    %18 = vector.broadcast %cst_12 : f32 to vector<512x6xf32>
    %19 = arith.addf %18, %17 : vector<512x6xf32>
    %20 = tpu.reciprocal %19 {approx = true} : vector<512x6xf32> -> vector<512x6xf32>
    %cst_13 = arith.constant 2.550000e+02 : f32
    %21 = vector.broadcast %cst_13 : f32 to vector<512x6xf32>
    %22 = arith.mulf %20, %21 : vector<512x6xf32>
    %23 = math.floor %22 : vector<512x6xf32>
    %cst_14 = arith.constant 0.00392156886 : f32
    %24 = vector.broadcast %cst_14 : f32 to vector<512x6xf32>
    %25 = arith.mulf %23, %24 : vector<512x6xf32>
    %26 = vector.extract_strided_slice %25 {offsets = [0, 0], sizes = [512, 3], strides = [1, 1]} : vector<512x6xf32> to vector<512x3xf32>
    %27 = arith.truncf %25 : vector<512x6xf32> to vector<512x6xbf16>
    %c0_15 = arith.constant 0 : index
    %c0_16 = arith.constant 0 : index
    %28 = vector.load %arg5[%c0_15, %c0_16] : memref<6x64xbf16, #tpu.memory_space<vmem>>, vector<6x64xbf16>
    %cst_17 = arith.constant dense<0.000000e+00> : vector<512x64xf32>
    %29 = tpu.matmul %27, %28, %cst_17 {dimension_numbers = #tpu.dot_dimension_numbers<[1], [0], [0], [1], [0, 0, 1, 1], [], []>} : vector<512x6xbf16>, vector<6x64xbf16>, vector<512x64xf32> -> vector<512x64xf32>
    %30 = arith.addf %4, %29 : vector<512x64xf32>
    %cst_18 = arith.constant 0.000000e+00 : f32
    %31 = vector.broadcast %cst_18 : f32 to vector<512x64xf32>
    %32 = arith.maximumf %30, %31 : vector<512x64xf32>
    %33 = arith.truncf %32 : vector<512x64xf32> to vector<512x64xbf16>
    %c0_19 = arith.constant 0 : index
    %c0_20 = arith.constant 0 : index
    %34 = vector.load %arg6[%c0_19, %c0_20] : memref<64x3xbf16, #tpu.memory_space<vmem>>, vector<64x3xbf16>
    %cst_21 = arith.constant dense<0.000000e+00> : vector<512x3xf32>
    %35 = tpu.matmul %33, %34, %cst_21 {dimension_numbers = #tpu.dot_dimension_numbers<[1], [0], [0], [1], [0, 0, 1, 1], [], []>} : vector<512x64xbf16>, vector<64x3xbf16>, vector<512x3xf32> -> vector<512x3xf32>
    %cst_22 = arith.constant 0.000000e+00 : f32
    %36 = vector.broadcast %cst_22 : f32 to vector<512x3xf32>
    %37 = arith.subf %36, %35 : vector<512x3xf32>
    %38 = math.exp %37 : vector<512x3xf32>
    %cst_23 = arith.constant 1.000000e+00 : f32
    %39 = vector.broadcast %cst_23 : f32 to vector<512x3xf32>
    %40 = arith.addf %39, %38 : vector<512x3xf32>
    %41 = tpu.reciprocal %40 {approx = true} : vector<512x3xf32> -> vector<512x3xf32>
    %42 = arith.truncf %26 : vector<512x3xf32> to vector<512x3xbf16>
    %c0_24 = arith.constant 0 : index
    %c0_25 = arith.constant 0 : index
    %43 = vector.load %arg7[%c0_24, %c0_25] : memref<512x6xbf16, #tpu.memory_space<vmem>>, vector<512x3xbf16>
    tpu.vector_store %arg7[%c0_24, %c0_25], %42 {strides = array<i32>} : memref<512x6xbf16, #tpu.memory_space<vmem>>, vector<512x3xbf16>,
    %44 = arith.truncf %41 : vector<512x3xf32> to vector<512x3xbf16>
    %c0_26 = arith.constant 0 : index
    %c3 = arith.constant 3 : index
    %45 = vector.load %arg7[%c0_26, %c3] : memref<512x6xbf16, #tpu.memory_space<vmem>>, vector<512x3xbf16>
    tpu.vector_store %arg7[%c0_26, %c3], %44 {strides = array<i32>} : memref<512x6xbf16, #tpu.memory_space<vmem>>, vector<512x3xbf16>,
    return
  }
  func.func @transform_0(%arg0: i32) -> (i32, i32) {
    %c0_i32 = arith.constant 0 : i32
    %c0_i32_0 = arith.constant 0 : i32
    return %arg0, %c0_i32 : i32, i32
  }
  func.func @transform_1(%arg0: i32) -> (i32, i32) {
    %c0_i32 = arith.constant 0 : i32
    %c0_i32_0 = arith.constant 0 : i32
    %c0_i32_1 = arith.constant 0 : i32
    return %c0_i32, %c0_i32_0 : i32, i32
  }
  func.func @transform_2(%arg0: i32) -> (i32, i32) {
    %c0_i32 = arith.constant 0 : i32
    %c0_i32_0 = arith.constant 0 : i32
    %c0_i32_1 = arith.constant 0 : i32
    return %c0_i32, %c0_i32_0 : i32, i32
  }
  func.func @transform_3(%arg0: i32) -> (i32, i32) {
    %c0_i32 = arith.constant 0 : i32
    %c0_i32_0 = arith.constant 0 : i32
    %c0_i32_1 = arith.constant 0 : i32
    return %c0_i32, %c0_i32_0 : i32, i32
  }
  func.func @transform_4(%arg0: i32) -> (i32, i32) {
    %c0_i32 = arith.constant 0 : i32
    %c0_i32_0 = arith.constant 0 : i32
    %c0_i32_1 = arith.constant 0 : i32
    return %c0_i32, %c0_i32_0 : i32, i32
  }
  func.func @transform_5(%arg0: i32) -> (i32, i32) {
    %c0_i32 = arith.constant 0 : i32
    %c0_i32_0 = arith.constant 0 : i32
    %c0_i32_1 = arith.constant 0 : i32
    return %c0_i32, %c0_i32_0 : i32, i32
  }
  func.func @transform_6(%arg0: i32) -> (i32, i32) {
    %c0_i32 = arith.constant 0 : i32
    %c0_i32_0 = arith.constant 0 : i32
    return %arg0, %c0_i32 : i32, i32
  }
}

</mosaic_0001>

<bundles_post_ra>
// kernel: tpu_custom_call.1
= control target key start
LH: loop header
LB: loop body
LE: loop exit
PB: predicated region body
PF: predicated region fallthrough
CT: control target
= control target key end

     0   :  { %s6496_s21 = smov 0   ;;  %s7670_s0 = inlined_call_operand.vmem [shape: bf16[1024,11], index: 0, kind: input, shape index: {}]   ;;  %s7671_s1 = inlined_call_operand.vmem [shape: bf16[11,128], index: 1, kind: input, shape index: {}]   ;;  %s7672_s2 = inlined_call_operand.vmem [shape: bf16[64,64], index: 2, kind: input, shape index: {}]   ;;  %s7673_s3 = inlined_call_operand.vmem [shape: bf16[64,6], index: 3, kind: input, shape index: {}]   ;;  %s7674_s4 = inlined_call_operand.vmem [shape: bf16[6,64], index: 4, kind: input, shape index: {}]   ;;  %s7675_s5 = inlined_call_operand.vmem [shape: bf16[64,3], index: 5, kind: input, shape index: {}]   ;;  %s7676_s6 = inlined_call_operand.vmem [shape: bf16[1024,6], index: 6, kind: output, shape index: {}]  }
   0x1 LB: > { %s4885_s22 = sadd.s32 4294967295, %s6456_s21   ;;  %p4889_p0 = scmp.ge.s32.totalorder %s6456_s21, 1  ;;  %s6456_s21 = sphi %s6496_s21, %s16_s21  }
   0x2   : > { %p213_p1 = scmp.lt.s32.totalorder %s6456_s21, 3 }
   0x4   : > { %p214_p2 = pnand %p4889_p0, %p213_p1 }
   0x6   : > { %217 = sbr.rel (%p214_p2) target bundleno = 1661 (0x67d), region = 44 }
   0xb   : > { %v5893_v0 = vld [vmem:[%s7671_s1] sm:$0x3f]   ;;  %vm584_vm0 = vcmask 1044480   ;;  %vm585_vm1 = vcmask 1045504   ;;  %s4890_s25 = sshll.u32 %s4885_s22, 6  ;;  %v6458_v1 = vmov 65535  }
   0xc   : > { %v586_v2 = vsel %vm584_vm0, 4294967295, %v6458_v1  ;;  %p244_p3 = scmp.lt.s32.totalorder %s4890_s25, 127  ;;  %v5924_v5 = vld [vmem:[%s7672_s2 + $0x18] sm:$0xff]   ;;  %vm487_vm2 = vcmask 89088   ;;  %v5927_v14 = vld [vmem:[%s7672_s2 + $0x10] sm:$0xff]   ;;  %v5928_v17 = vld [vmem:[%s7672_s2 + $0x8] sm:$0xff]  }
   0xd   : > { %v587_v3 = vsel %vm585_vm1, %v586_v2, 0  ;;  %v5929_v22 = vld [vmem:[%s7672_s2] sm:$0xff]   ;;  %v5930_v41 = vld [vmem:[%s7673_s3 + $0x18] sm:$0xff]   ;;  %v5931_v45 = vld [vmem:[%s7673_s3 + $0x10] sm:$0xff]   ;;  %vm1008_vm3 = vcmask 523264   ;;  %vm2549_vm4 = vcmask 1042432  }
   0xe   : > { %v589_v4 = vand.u32 %v5893_v0, %v587_v3  ;;  %s7819_s25 = smov (!%p244_p3, %s4890_s25), 127  ;;  %v5932_v46 = vld [vmem:[%s7673_s3 + $0x8] sm:$0xff]   ;;  %v5933_v53 = vld [vmem:[%s7673_s3] sm:$0xff]   ;;  %vm4315_vm5 = vcmask 19456   ;;  %vm2452_vm6 = vcmask 48128   ;;  %s6460_s13 = smov 3  }
   0xf   : > { %s4891_s28 = sshll.u32 %s7819_s25, 2  ;;  %s6459_s25 = smov 64   ;;  %vm4764_vm7 = vcmask 44056  }
  0x10   : > { %5531 = vmatprep.subr.bf16.mxu0 %v589_v4  ;;  %5879 = vmatprep.subr.bf16.mxu1 %v589_v4  ;;  %s6518_s7 = scalar_lea.vmem %s7670_s0, %s4891_s28  ;;  %s6871_s29 = scalar_lea.vmem %s7676_s6, %s4891_s28 }
  0x11   : > { %5532 = vmatpush3.bf16.msra.mxu0 %v589_v4  ;;  %5880 = vmatpush3.bf16.msra.mxu1 %v589_v4  ;;  %v5894_v6 = vld [vmem:[%s6518_s7] sm:$0xff]   ;;  %v5895_v7 = vld [vmem:[%s6518_s7 + $0x8] sm:$0xff]   ;;  %v5896_v8 = vld [vmem:[%s6518_s7 + $0x10] sm:$0xff]  }
  0x12   : > { %5597 = vmatprep.subr.bf16.mxu1 %v5924_v5  ;;  %5533 = vmatprep.mubr.msk.bf16.mxu0 %vm487_vm2, %v5894_v6  ;;  %v5897_v9 = vld [vmem:[%s6518_s7 + $0x18] sm:$0xff]   ;;  %v5898_v10 = vld [vmem:[%s6518_s7 + $0x20] sm:$0xff]   ;;  %v5899_v11 = vld [vmem:[%s6518_s7 + $0x28] sm:$0xff]  }
  0x13   : > { %v5900_v12 = vld [vmem:[%s6518_s7 + $0x30] sm:$0xff]   ;;  %v5910_v13 = vld [vmem:[%s6518_s7 + $0x80] sm:$0xff]   ;;  %v5911_v15 = vld [vmem:[%s6518_s7 + $0x88] sm:$0xff]   ;;  %5669 = vmatprep.subr.bf16.mxu0 %v5930_v41 }
  0x14   : > { %5534 = vmatmul.mubr.msk.bf16.vlgmr.msra.gmra.mxu0 %vm487_vm2, %v5895_v7  ;;  %5565 = vmatprep.mubr.msk.bf16.mxu1 %vm487_vm2, %v5910_v13  ;;  %v5912_v16 = vld [vmem:[%s6518_s7 + $0x90] sm:$0xff]   ;;  %v5901_v18 = vld [vmem:[%s6518_s7 + $0x38] sm:$0xff]   ;;  %v5902_v19 = vld [vmem:[%s6518_s7 + $0x40] sm:$0xff]  }
  0x15   : > { %5537 = vmatprep.mubr.msk.bf16.mxu0 %vm487_vm2, %v5896_v8  ;;  %5566 = vmatmul.mubr.msk.bf16.vlgmr.msra.gmra.mxu1 %vm487_vm2, %v5911_v15  ;;  %v5913_v20 = vld [vmem:[%s6518_s7 + $0x98] sm:$0xff]   ;;  %v5914_v21 = vld [vmem:[%s6518_s7 + $0xa0] sm:$0xff]   ;;  %v5903_v23 = vld [vmem:[%s6518_s7 + $0x48] sm:$0xff]  }
  0x16   : > { %5569 = vmatprep.mubr.msk.bf16.mxu1 %vm487_vm2, %v5912_v16  ;;  %5598 = vmatpush3.bf16.msra.mxu1 %v5924_v5  ;;  %v5904_v24 = vld [vmem:[%s6518_s7 + $0x50] sm:$0xff]   ;;  %v5915_v25 = vld [vmem:[%s6518_s7 + $0xa8] sm:$0xff]   ;;  %v5905_v27 = vld [vmem:[%s6518_s7 + $0x58] sm:$0xff]  }
  0x17   : > { %5599 = vmatprep.subr.bf16.mxu1 %v5927_v14  ;;  %v5916_v26 = vld [vmem:[%s6518_s7 + $0xb0] sm:$0xff]   ;;  %v5917_v28 = vld [vmem:[%s6518_s7 + $0xb8] sm:$0xff]   ;;  %v5906_v29 = vld [vmem:[%s6518_s7 + $0x60] sm:$0xff]   ;;  %5670 = vmatpush3.bf16.msra.mxu0 %v5930_v41 }
  0x18   : > { %v5918_v30 = vld [vmem:[%s6518_s7 + $0xc0] sm:$0xff]   ;;  %v5907_v31 = vld [vmem:[%s6518_s7 + $0x68] sm:$0xff]   ;;  %v5908_v33 = vld [vmem:[%s6518_s7 + $0x70] sm:$0xff]   ;;  %5671 = vmatprep.subr.bf16.mxu0 %v5931_v45 }
  0x19   : > { %v5919_v32 = vld [vmem:[%s6518_s7 + $0xc8] sm:$0xff]   ;;  %v5920_v34 = vld [vmem:[%s6518_s7 + $0xd0] sm:$0xff]   ;;  %v5909_v35 = vld [vmem:[%s6518_s7 + $0x78] sm:$0xff]  }
  0x1a   : > { %5600 = vmatpush3.bf16.msra.mxu1 %v5927_v14  ;;  %v5921_v36 = vld [vmem:[%s6518_s7 + $0xd8] sm:$0xff]   ;;  %v5922_v37 = vld [vmem:[%s6518_s7 + $0xe0] sm:$0xff]   ;;  %v5923_v38 = vld [vmem:[%s6518_s7 + $0xe8] sm:$0xff]  }
  0x1b   : > { %5601 = vmatprep.subr.bf16.mxu1 %v5928_v17  ;;  %v5925_v39 = vld [vmem:[%s6518_s7 + $0xf0] sm:$0xff]   ;;  %v5926_v40 = vld [vmem:[%s6518_s7 + $0xf8] sm:$0xff]   ;;  %5672 = vmatpush3.bf16.msra.mxu0 %v5931_v45 }
  0x1c   : > { %5538 = vmatmul.mubr.msk.bf16.gmra.mxu0 %vm487_vm2, %v5897_v9  ;;  %5673 = vmatprep.subr.bf16.mxu0 %v5932_v46 }
  0x1d   : > { %5541 = vmatprep.mubr.msk.bf16.mxu0 %vm487_vm2, %v5898_v10  ;;  %5570 = vmatmul.mubr.msk.bf16.gmra.mxu1 %vm487_vm2, %v5913_v20 }
  0x1e   : > { %5573 = vmatprep.mubr.msk.bf16.mxu1 %vm487_vm2, %v5914_v21  ;;  %5602 = vmatpush3.bf16.msra.mxu1 %v5928_v17 }
  0x1f   : > { %5603 = vmatprep.subr.bf16.mxu1 %v5929_v22  ;;  %5674 = vmatpush3.bf16.msra.mxu0 %v5932_v46 }
  0x20   : > { %5675 = vmatprep.subr.bf16.mxu0 %v5933_v53 }
  0x22   : > { %5604 = vmatpush3.bf16.msra.mxu1 %v5929_v22 }
  0x23   : > { %5676 = vmatpush3.bf16.msra.mxu0 %v5933_v53 }
  0x24   : > { %5542 = vmatmul.mubr.msk.bf16.gmra.mxu0 %vm487_vm2, %v5899_v11 }
  0x25   : > { %5545 = vmatprep.mubr.msk.bf16.mxu0 %vm487_vm2, %v5900_v12  ;;  %5574 = vmatmul.mubr.msk.bf16.gmra.mxu1 %vm487_vm2, %v5915_v25 }
  0x26   : > { %5577 = vmatprep.mubr.msk.bf16.mxu1 %vm487_vm2, %v5916_v26 }
  0x2c   : > { %5546 = vmatmul.mubr.msk.bf16.gmra.mxu0 %vm487_vm2, %v5901_v18 }
  0x2d   : > { %5549 = vmatprep.mubr.msk.bf16.mxu0 %vm487_vm2, %v5902_v19  ;;  %5578 = vmatmul.mubr.msk.bf16.gmra.mxu1 %vm487_vm2, %v5917_v28 }
  0x2e   : > { %5581 = vmatprep.mubr.msk.bf16.mxu1 %vm487_vm2, %v5918_v30 }
  0x34   : > { %5550 = vmatmul.mubr.msk.bf16.gmra.mxu0 %vm487_vm2, %v5903_v23 }
  0x35   : > { %5553 = vmatprep.mubr.msk.bf16.mxu0 %vm487_vm2, %v5904_v24  ;;  %5582 = vmatmul.mubr.msk.bf16.gmra.mxu1 %vm487_vm2, %v5919_v32 }
  0x36   : > { %5585 = vmatprep.mubr.msk.bf16.mxu1 %vm487_vm2, %v5920_v34 }
  0x3c   : > { %5554 = vmatmul.mubr.msk.bf16.gmra.mxu0 %vm487_vm2, %v5905_v27 }
  0x3d   : > { %5557 = vmatprep.mubr.msk.bf16.mxu0 %vm487_vm2, %v5906_v29  ;;  %5586 = vmatmul.mubr.msk.bf16.gmra.mxu1 %vm487_vm2, %v5921_v36 }
  0x3e   : > { %5589 = vmatprep.mubr.msk.bf16.mxu1 %vm487_vm2, %v5922_v37 }
  0x44   : > { %5558 = vmatmul.mubr.msk.bf16.gmra.mxu0 %vm487_vm2, %v5907_v31 }
  0x45   : > { %5561 = vmatprep.mubr.msk.bf16.mxu0 %vm487_vm2, %v5908_v33  ;;  %5590 = vmatmul.mubr.msk.bf16.gmra.mxu1 %vm487_vm2, %v5923_v38 }
  0x46   : > { %5593 = vmatprep.mubr.msk.bf16.mxu1 %vm487_vm2, %v5925_v39 }
  0x4c   : > { %5562 = vmatmul.mubr.msk.bf16.gmra.mxu0 %vm487_vm2, %v5909_v35 }
  0x4d   : > { %5594 = vmatmul.mubr.msk.bf16.gmra.mxu1 %vm487_vm2, %v5926_v40 }
  0xd4   : > { %v6596_v42 = vpop.f32.mrf.mxu0 }
  0xd5   : > { %v882_v51 = vmax.f32 %v6596_v42, 0.0  ;;  %v6633_v0 = vpop.f32.mrf.mxu1 }
  0xd6   : > { %v6598_v43 = vpop.f32.mrf.mxu0  ;;  %7719 = vst [vmem:[#allocation2_spill] sm:$0xff] %v6633_v0 }
  0xd7   : > { %v880_v49 = vmax.f32 %v6598_v43, 0.0  ;;  %v6637_v4 = vpop.f32.mrf.mxu1 }
  0xd8   : > { %v6600_v44 = vpop.f32.mrf.mxu0  ;;  %7720 = vst [vmem:[#allocation3_spill] sm:$0xff] %v6637_v4 }
  0xd9   : > { %v883_v47 = vmax.f32 %v6600_v44, 0.0  ;;  %v6643_v6 = vpop.f32.mrf.mxu1 }
  0xda   : > { %v6609_v48 = vpop.f32.mrf.mxu0  ;;  %7721 = vst [vmem:[#allocation4_spill] sm:$0xff] %v6643_v6 }
  0xdb   : > { %v881_v50 = vmax.f32 %v6609_v48, 0.0  ;;  %v945_v55 = vpack.c.bf16 %v883_v47, %v882_v51  ;;  %v6648_v9 = vpop.f32.mrf.mxu1 }
  0xdc   : > { %v6614_v52 = vpop.f32.mrf.mxu0  ;;  %7722 = vst [vmem:[#allocation5_spill] sm:$0xff] %v6648_v9 }
  0xdd   : > { %v944_v54 = vpack.c.bf16 %v881_v50, %v880_v49  ;;  %v886_v62 = vmax.f32 %v6614_v52, 0.0  ;;  %v6655_v14 = vpop.f32.mrf.mxu1 }
  0xde   : > { %v6619_v56 = vpop.f32.mrf.mxu0  ;;  %7723 = vst [vmem:[#allocation6_spill] sm:$0xff] %v6655_v14 }
  0xdf   : > { %5605 = vmatprep.mubr.msk.bf16.mxu1 %vm1008_vm3, %v944_v54  ;;  %v884_v60 = vmax.f32 %v6619_v56, 0.0  ;;  %v6659_v18 = vpop.f32.mrf.mxu1 }
  0xe0   : > { %v6622_v57 = vpop.f32.mrf.mxu0  ;;  %5606 = vmatmul.mubr.msk.bf16.vlgmr.msra.gmra.mxu1 %vm1008_vm3, %v945_v55  ;;  %7724 = vst [vmem:[#allocation7_spill] sm:$0xff] %v6659_v18 }
  0xe1   : > { %v887_v58 = vmax.f32 %v6622_v57, 0.0  ;;  %v6665_v20 = vpop.f32.mrf.mxu1 }
  0xe2   : > { %v6626_v59 = vpop.f32.mrf.mxu0  ;;  %7725 = vst [vmem:[#allocation8_spill] sm:$0xff] %v6665_v20 }
  0xe3   : > { %v885_v61 = vmax.f32 %v6626_v59, 0.0  ;;  %v947_v2 = vpack.c.bf16 %v887_v58, %v886_v62  ;;  %v6670_v23 = vpop.f32.mrf.mxu1 }
  0xe4   : > { %v6631_v63 = vpop.f32.mrf.mxu0  ;;  %7726 = vst [vmem:[#allocation9_spill] sm:$0xff] %v6670_v23 }
  0xe5   : > { %v946_v1 = vpack.c.bf16 %v885_v61, %v884_v60  ;;  %v890_v12 = vmax.f32 %v6631_v63, 0.0  ;;  %v6677_v28 = vpop.f32.mrf.mxu1 }
  0xe6   : > { %v6635_v3 = vpop.f32.mrf.mxu0  ;;  %7727 = vst [vmem:[#allocation10_spill] sm:$0xff] %v6677_v28 }
  0xe7   : > { %5609 = vmatprep.mubr.msk.bf16.mxu1 %vm1008_vm3, %v946_v1  ;;  %v888_v10 = vmax.f32 %v6635_v3, 0.0  ;;  %v6681_v32 = vpop.f32.mrf.mxu1 }
  0xe8   : > { %v6640_v5 = vpop.f32.mrf.mxu0  ;;  %5610 = vmatmul.mubr.msk.bf16.gmra.mxu1 %vm1008_vm3, %v947_v2  ;;  %7728 = vst [vmem:[#allocation11_spill] sm:$0xff] %v6681_v32 }
  0xe9   : > { %v891_v7 = vmax.f32 %v6640_v5, 0.0  ;;  %v6690_v36 = vpop.f32.mrf.mxu1 }
  0xea   : > { %v6646_v8 = vpop.f32.mrf.mxu0  ;;  %7729 = vst [vmem:[#allocation12_spill] sm:$0xff] %v6690_v36 }
  0xeb   : > { %v889_v11 = vmax.f32 %v6646_v8, 0.0  ;;  %v949_v16 = vpack.c.bf16 %v891_v7, %v890_v12  ;;  %v6699_v47 = vpop.f32.mrf.mxu1 }
  0xec   : > { %v6653_v13 = vpop.f32.mrf.mxu0  ;;  %7731 = vst [vmem:[#allocation14_spill] sm:$0xff] %v6699_v47 }
  0xed   : > { %v948_v15 = vpack.c.bf16 %v889_v11, %v888_v10  ;;  %v894_v26 = vmax.f32 %v6653_v13, 0.0  ;;  %v6708_v53 = vpop.f32.mrf.mxu1 }
  0xee   : > { %v6657_v17 = vpop.f32.mrf.mxu0  ;;  %7733 = vst [vmem:[#allocation16_spill] sm:$0xff] %v6708_v53 }
  0xef   : > { %5613 = vmatprep.mubr.msk.bf16.mxu1 %vm1008_vm3, %v948_v15  ;;  %v892_v24 = vmax.f32 %v6657_v17, 0.0  ;;  %v6717_v2 = vpop.f32.mrf.mxu1 }
  0xf0   : > { %v6662_v19 = vpop.f32.mrf.mxu0  ;;  %5614 = vmatmul.mubr.msk.bf16.gmra.mxu1 %vm1008_vm3, %v949_v16  ;;  %7736 = vst [vmem:[#allocation19_spill] sm:$0xff] %v6717_v2 }
  0xf1   : > { %v895_v21 = vmax.f32 %v6662_v19, 0.0  ;;  %v6726_v12 = vpop.f32.mrf.mxu1 }
  0xf2   : > { %v6668_v22 = vpop.f32.mrf.mxu0  ;;  %7739 = vst [vmem:[#allocation22_spill] sm:$0xff] %v6726_v12 }
  0xf3   : > { %v893_v25 = vmax.f32 %v6668_v22, 0.0  ;;  %v951_v30 = vpack.c.bf16 %v895_v21, %v894_v26 }
  0xf4   : > { %v6675_v27 = vpop.f32.mrf.mxu0 }
  0xf5   : > { %v950_v29 = vpack.c.bf16 %v893_v25, %v892_v24  ;;  %v898_v39 = vmax.f32 %v6675_v27, 0.0 }
  0xf6   : > { %v6679_v31 = vpop.f32.mrf.mxu0 }
  0xf7   : > { %5617 = vmatprep.mubr.msk.bf16.mxu1 %vm1008_vm3, %v950_v29  ;;  %v896_v37 = vmax.f32 %v6679_v31, 0.0 }
  0xf8   : > { %v6684_v33 = vpop.f32.mrf.mxu0  ;;  %5618 = vmatmul.mubr.msk.bf16.gmra.mxu1 %vm1008_vm3, %v951_v30  ;;  %v6735_v30 = vpop.f32.mrf.mxu1 }
  0xf9   : > { %v899_v34 = vmax.f32 %v6684_v33, 0.0  ;;  %7742 = vst [vmem:[#allocation25_spill] sm:$0xff] %v6735_v30 }
  0xfa   : > { %v6688_v35 = vpop.f32.mrf.mxu0 }
  0xfb   : > { %v897_v38 = vmax.f32 %v6688_v35, 0.0  ;;  %v953_v45 = vpack.c.bf16 %v899_v34, %v898_v39  ;;  %v913_v39 = vmax.f32 %v6648_v9, 0.0 }
  0xfc   : > { %v6695_v40 = vpop.f32.mrf.mxu0 }
  0xfd   : > { %v952_v41 = vpack.c.bf16 %v897_v38, %v896_v37  ;;  %v902_v58 = vmax.f32 %v6695_v40, 0.0  ;;  %v6741_v37 = vpop.f32.mrf.mxu1  ;;  %v912_v38 = vmax.f32 %v6637_v4, 0.0 }
  0xfe   : > { %v6697_v46 = vpop.f32.mrf.mxu0  ;;  %7744 = vst [vmem:[#allocation27_spill] sm:$0xff] %v6741_v37 }
  0xff   : > { %7730 = vst [vmem:[#allocation13_spill] sm:$0xff] %v6697_v46  ;;  %5621 = vmatprep.mubr.msk.bf16.mxu1 %vm1008_vm3, %v952_v41  ;;  %v900_v54 = vmax.f32 %v6697_v46, 0.0 }
 0x100   : > { %v6702_v49 = vpop.f32.mrf.mxu0  ;;  %5622 = vmatmul.mubr.msk.bf16.gmra.mxu1 %vm1008_vm3, %v953_v45 }
 0x101   : > { %v903_v50 = vmax.f32 %v6702_v49, 0.0 }
 0x102   : > { %v6706_v51 = vpop.f32.mrf.mxu0 }
 0x103   : > { %7732 = vst [vmem:[#allocation15_spill] sm:$0xff] %v6706_v51  ;;  %v901_v55 = vmax.f32 %v6706_v51, 0.0  ;;  %v955_v62 = vpack.c.bf16 %v903_v50, %v902_v58  ;;  %v6751_v58 = vpop.f32.mrf.mxu1 }
 0x104   : > { %v6713_v60 = vpop.f32.mrf.mxu0  ;;  %7746 = vst [vmem:[#allocation29_spill] sm:$0xff] %v6751_v58 }
 0x105   : > { %7734 = vst [vmem:[#allocation17_spill] sm:$0xff] %v6713_v60  ;;  %v954_v61 = vpack.c.bf16 %v901_v55, %v900_v54  ;;  %v906_v21 = vmax.f32 %v6713_v60, 0.0 }
 0x106   : > { %v6715_v1 = vpop.f32.mrf.mxu0 }
 0x107   : > { %7735 = vst [vmem:[#allocation18_spill] sm:$0xff] %v6715_v1  ;;  %5625 = vmatprep.mubr.msk.bf16.mxu1 %vm1008_vm3, %v954_v61  ;;  %v904_v15 = vmax.f32 %v6715_v1, 0.0 }
 0x108   : > { %v6720_v7 = vpop.f32.mrf.mxu0  ;;  %5626 = vmatmul.mubr.msk.bf16.gmra.mxu1 %vm1008_vm3, %v955_v62  ;;  %v960_v62 = vpack.c.bf16 %v913_v39, %v912_v38 }
 0x109   : > { %7737 = vst [vmem:[#allocation20_spill] sm:$0xff] %v6720_v7  ;;  %v907_v10 = vmax.f32 %v6720_v7, 0.0 }
 0x10a   : > { %v6724_v11 = vpop.f32.mrf.mxu0 }
 0x10b   : > { %7738 = vst [vmem:[#allocation21_spill] sm:$0xff] %v6724_v11  ;;  %v905_v16 = vmax.f32 %v6724_v11, 0.0  ;;  %v957_v26 = vpack.c.bf16 %v907_v10, %v906_v21  ;;  %v6757_v21 = vpop.f32.mrf.mxu1 }
 0x10c   : > { %v6731_v24 = vpop.f32.mrf.mxu0  ;;  %7747 = vst [vmem:[#allocation30_spill] sm:$0xff] %v6757_v21 }
 0x10d   : > { %7740 = vst [vmem:[#allocation23_spill] sm:$0xff] %v6731_v24  ;;  %v956_v25 = vpack.c.bf16 %v905_v16, %v904_v15  ;;  %v910_v55 = vmax.f32 %v6731_v24, 0.0  ;;  %v914_v15 = vmax.f32 %v6633_v0, 0.0  ;;  %v915_v16 = vmax.f32 %v6643_v6, 0.0 }
 0x10e   : > { %v6733_v29 = vpop.f32.mrf.mxu0 }
 0x10f   : > { %7741 = vst [vmem:[#allocation24_spill] sm:$0xff] %v6733_v29  ;;  %5629 = vmatprep.mubr.msk.bf16.mxu1 %vm1008_vm3, %v956_v25  ;;  %v908_v50 = vmax.f32 %v6733_v29, 0.0  ;;  %v916_v25 = vmax.f32 %v6659_v18, 0.0  ;;  %v961_v9 = vpack.c.bf16 %v915_v16, %v914_v15 }
 0x110   : > { %v6738_v34 = vpop.f32.mrf.mxu0  ;;  %5630 = vmatmul.mubr.msk.bf16.gmra.mxu1 %vm1008_vm3, %v957_v26  ;;  %v917_v26 = vmax.f32 %v6670_v23, 0.0 }
 0x111   : > { %7743 = vst [vmem:[#allocation26_spill] sm:$0xff] %v6738_v34  ;;  %v911_v41 = vmax.f32 %v6738_v34, 0.0 }
 0x112   : > { %v6746_v45 = vpop.f32.mrf.mxu0  ;;  %v962_v38 = vpack.c.bf16 %v917_v26, %v916_v25  ;;  %v922_v25 = vmax.f32 %v6677_v28, 0.0  ;;  %v923_v26 = vmax.f32 %v6690_v36, 0.0 }
 0x113   : > { %7745 = vst [vmem:[#allocation28_spill] sm:$0xff] %v6746_v45  ;;  %v909_v54 = vmax.f32 %v6746_v45, 0.0  ;;  %v959_v10 = vpack.c.bf16 %v911_v41, %v910_v55  ;;  %v918_v41 = vmax.f32 %v6655_v14, 0.0  ;;  %v920_v55 = vmax.f32 %v6681_v32, 0.0 }
 0x115   : > { %v958_v61 = vpack.c.bf16 %v909_v54, %v908_v50  ;;  %v6762_v50 = vpop.f32.mrf.mxu1  ;;  %v919_v54 = vmax.f32 %v6665_v20, 0.0 }
 0x116   : > { %7748 = vst [vmem:[#allocation31_spill] sm:$0xff] %v6762_v50 }
 0x117   : > { %5633 = vmatprep.mubr.msk.bf16.mxu1 %vm1008_vm3, %v958_v61  ;;  %v6764_v39 = vpop.f32.mrf.mxu1  ;;  %v921_v61 = vmax.f32 %v6699_v47, 0.0  ;;  %v965_v47 = vpack.c.bf16 %v923_v26, %v922_v25  ;;  %v930_v26 = vmax.f32 %v6741_v37, 0.0 }
 0x118   : > { %5634 = vmatmul.mubr.msk.bf16.gmra.mxu1 %vm1008_vm3, %v959_v10  ;;  %7749 = vst [vmem:[#allocation32_spill] sm:$0xff] %v6764_v39  ;;  %v963_v10 = vpack.c.bf16 %v919_v54, %v918_v41  ;;  %v926_v54 = vmax.f32 %v6708_v53, 0.0 }
 0x119   : > { %5637 = vmatprep.mubr.msk.bf16.mxu1 %vm1008_vm3, %v960_v62  ;;  %v6772_v62 = vpop.f32.mrf.mxu1  ;;  %v964_v15 = vpack.c.bf16 %v921_v61, %v920_v55  ;;  %v927_v55 = vmax.f32 %v6726_v12, 0.0 }
 0x11a   : > { %7750 = vst [vmem:[#allocation33_spill] sm:$0xff] %v6772_v62 }
 0x11b   : > { %v6774_v16 = vpop.f32.mrf.mxu1 }
 0x11c   : > { %7751 = vst [vmem:[#allocation34_spill] sm:$0xff] %v6774_v16 }
 0x11d   : > { %v6782_v32 = vpop.f32.mrf.mxu1 }
 0x11e   : > { %7752 = vst [vmem:[#allocation35_spill] sm:$0xff] %v6782_v32 }
 0x11f   : > { %v6784_v23 = vpop.f32.mrf.mxu1 }
 0x120   : > { %5638 = vmatmul.mubr.msk.bf16.gmra.mxu1 %vm1008_vm3, %v961_v9  ;;  %v924_v9 = vmax.f32 %v6717_v2, 0.0  ;;  %7753 = vst [vmem:[#allocation36_spill] sm:$0xff] %v6784_v23 }
 0x121   : > { %5641 = vmatprep.mubr.msk.bf16.mxu1 %vm1008_vm3, %v962_v38  ;;  %v925_v38 = vmax.f32 %v6735_v30, 0.0  ;;  %v6789_v61 = vpop.f32.mrf.mxu1  ;;  %v967_v30 = vpack.c.bf16 %v927_v55, %v926_v54 }
 0x122   : > { %7754 = vst [vmem:[#allocation37_spill] sm:$0xff] %v6789_v61 }
 0x123   : > { %v966_v41 = vpack.c.bf16 %v925_v38, %v924_v9  ;;  %v6794_v2 = vpop.f32.mrf.mxu1  ;;  %v931_v9 = vmax.f32 %v6757_v21, 0.0 }
 0x124   : > { %7755 = vst [vmem:[#allocation38_spill] sm:$0xff] %v6794_v2 }
 0x125   : > { %v6799_v38 = vpop.f32.mrf.mxu1  ;;  %v969_v54 = vpack.c.bf16 %v931_v9, %v930_v26  ;;  %v938_v9 = vmax.f32 %v6784_v23, 0.0 }
 0x126   : > { %7756 = vst [vmem:[#allocation39_spill] sm:$0xff] %v6799_v38 }
 0x128   : > { %5642 = vmatmul.mubr.msk.bf16.gmra.mxu1 %vm1008_vm3, %v963_v10  ;;  %v928_v10 = vmax.f32 %v6751_v58, 0.0  ;;  %v6804_v58 = vpop.f32.mrf.mxu1 }
 0x129   : > { %5645 = vmatprep.mubr.msk.bf16.mxu1 %vm1008_vm3, %v964_v15  ;;  %v929_v15 = vmax.f32 %v6762_v50, 0.0  ;;  %7757 = vst [vmem:[#allocation40_spill] sm:$0xff] %v6804_v58 }
 0x12a   : > { %v6806_v50 = vpop.f32.mrf.mxu1 }
 0x12b   : > { %v968_v25 = vpack.c.bf16 %v929_v15, %v928_v10  ;;  %7758 = vst [vmem:[#allocation41_spill] sm:$0xff] %v6806_v50  ;;  %v935_v10 = vmax.f32 %v6774_v16, 0.0  ;;  %v936_v15 = vmax.f32 %v6789_v61, 0.0 }
 0x130   : > { %5646 = vmatmul.mubr.msk.bf16.gmra.mxu1 %vm1008_vm3, %v965_v47  ;;  %v932_v47 = vmax.f32 %v6772_v62, 0.0  ;;  %v6814_v62 = vpop.f32.mrf.mxu1 }
 0x131   : > { %5649 = vmatprep.mubr.msk.bf16.mxu1 %vm1008_vm3, %v966_v41  ;;  %v933_v41 = vmax.f32 %v6782_v32, 0.0  ;;  %7759 = vst [vmem:[#allocation42_spill] sm:$0xff] %v6814_v62 }
 0x132   : > { %v6816_v26 = vpop.f32.mrf.mxu1 }
 0x133   : > { %v970_v55 = vpack.c.bf16 %v933_v41, %v932_v47  ;;  %7760 = vst [vmem:[#allocation43_spill] sm:$0xff] %v6816_v26  ;;  %v939_v47 = vmax.f32 %v6794_v2, 0.0  ;;  %v940_v41 = vmax.f32 %v6806_v50, 0.0 }
 0x138   : > { %5650 = vmatmul.mubr.msk.bf16.gmra.mxu1 %vm1008_vm3, %v967_v30  ;;  %v934_v30 = vmax.f32 %v6764_v39, 0.0 }
 0x139   : > { %5653 = vmatprep.mubr.msk.bf16.mxu1 %vm1008_vm3, %v968_v25  ;;  %v937_v25 = vmax.f32 %v6799_v38, 0.0 }
 0x13a   : > { %v971_v32 = vpack.c.bf16 %v935_v10, %v934_v30  ;;  %v942_v30 = vmax.f32 %v6804_v58, 0.0  ;;  %v943_v10 = vmax.f32 %v6814_v62, 0.0 }
 0x13b   : > { %v972_v21 = vpack.c.bf16 %v937_v25, %v936_v15 }
 0x140   : > { %5654 = vmatmul.mubr.msk.bf16.gmra.mxu1 %vm1008_vm3, %v969_v54  ;;  %v941_v54 = vmax.f32 %v6816_v26, 0.0 }
 0x141   : > { %5657 = vmatprep.mubr.msk.bf16.mxu1 %vm1008_vm3, %v970_v55  ;;  %v973_v55 = vpack.c.bf16 %v939_v47, %v938_v9 }
 0x142   : > { %v974_v61 = vpack.c.bf16 %v941_v54, %v940_v41 }
 0x148   : > { %5658 = vmatmul.mubr.msk.bf16.gmra.mxu1 %vm1008_vm3, %v971_v32  ;;  %v975_v32 = vpack.c.bf16 %v943_v10, %v942_v30 }
 0x149   : > { %5661 = vmatprep.mubr.msk.bf16.mxu1 %vm1008_vm3, %v972_v21  ;;  %v2451_v21 = vld [vmem:[%s7674_s4] sm:$0x7] }
 0x14a   : > { %5881 = vmatprep.subr.msk.bf16.mxu1 %vm2549_vm4, %v2451_v21  ;;  %v2551_v15 = vsel %vm2549_vm4, %v2451_v21, 0 }
 0x14b   : > { %5742 = vmatpush3.bf16.msra.mxu1 %v2551_v15 }
 0x150   : > { %5662 = vmatmul.mubr.msk.bf16.gmra.mxu1 %vm1008_vm3, %v973_v55 }
 0x151   : > { %5665 = vmatprep.mubr.msk.bf16.mxu1 %vm1008_vm3, %v974_v61 }
 0x158   : > { %5666 = vmatmul.mubr.msk.bf16.gmra.mxu1 %vm1008_vm3, %v975_v32 }
 0x1a0   : > { %v5607_v25 = vpop.f32.mrf.mxu1 }
 0x1a1   : > { %v1396_v58 = vmax.f32 %v5607_v25, 0.0 }
 0x1a2   : > { %v1139_v9 = vpop.f32.mrf.mxu1 }
 0x1a3   : > { %v1394_v55 = vmax.f32 %v1139_v9, 0.0 }
 0x1a4   : > { %v5608_v47 = vpop.f32.mrf.mxu1 }
 0x1a5   : > { %v1397_v41 = vmax.f32 %v5608_v47, 0.0 }
 0x1a6   : > { %v1142_v54 = vpop.f32.mrf.mxu1 }
 0x1a7   : > { %v1395_v62 = vmax.f32 %v1142_v54, 0.0  ;;  %v1459_v10 = vpack.c.bf16 %v1397_v41, %v1396_v58 }
 0x1a8   : > { %v5611_v61 = vpop.f32.mrf.mxu1 }
 0x1a9   : > { %v1458_v30 = vpack.c.bf16 %v1395_v62, %v1394_v55  ;;  %v1400_v23 = vmax.f32 %v5611_v61, 0.0 }
 0x1aa   : > { %v1155_v32 = vpop.f32.mrf.mxu1 }
 0x1ab   : > { %5677 = vmatprep.mubr.msk.bf16.mxu0 %vm1008_vm3, %v1458_v30  ;;  %v1398_v15 = vmax.f32 %v1155_v32, 0.0 }
 0x1ac   : > { %v5612_v50 = vpop.f32.mrf.mxu1  ;;  %5678 = vmatmul.mubr.msk.bf16.vlgmr.msra.gmra.mxu0 %vm1008_vm3, %v1459_v10 }
 0x1ad   : > { %v1401_v26 = vmax.f32 %v5612_v50, 0.0 }
 0x1ae   : > { %v1158_v21 = vpop.f32.mrf.mxu1 }
 0x1af   : > { %v1399_v2 = vmax.f32 %v1158_v21, 0.0  ;;  %v1461_v16 = vpack.c.bf16 %v1401_v26, %v1400_v23 }
 0x1b0   : > { %v5615_v38 = vpop.f32.mrf.mxu1 }
 0x1b1   : > { %v1460_v47 = vpack.c.bf16 %v1399_v2, %v1398_v15  ;;  %v1404_v55 = vmax.f32 %v5615_v38, 0.0 }
 0x1b2   : > { %v1171_v9 = vpop.f32.mrf.mxu1 }
 0x1b3   : > { %5681 = vmatprep.mubr.msk.bf16.mxu0 %vm1008_vm3, %v1460_v47  ;;  %v1402_v41 = vmax.f32 %v1171_v9, 0.0 }
 0x1b4   : > { %v5616_v25 = vpop.f32.mrf.mxu1  ;;  %5682 = vmatmul.mubr.msk.bf16.gmra.mxu0 %vm1008_vm3, %v1461_v16 }
 0x1b5   : > { %v1405_v58 = vmax.f32 %v5616_v25, 0.0 }
 0x1b6   : > { %v1174_v62 = vpop.f32.mrf.mxu1 }
 0x1b7   : > { %v1403_v54 = vmax.f32 %v1174_v62, 0.0  ;;  %v1463_v10 = vpack.c.bf16 %v1405_v58, %v1404_v55 }
 0x1b8   : > { %v5619_v30 = vpop.f32.mrf.mxu1 }
 0x1b9   : > { %v1462_v50 = vpack.c.bf16 %v1403_v54, %v1402_v41  ;;  %v1408_v15 = vmax.f32 %v5619_v30, 0.0 }
 0x1ba   : > { %v1187_v32 = vpop.f32.mrf.mxu1 }
 0x1bb   : > { %5685 = vmatprep.mubr.msk.bf16.mxu0 %vm1008_vm3, %v1462_v50  ;;  %v1406_v26 = vmax.f32 %v1187_v32, 0.0 }
 0x1bc   : > { %v5620_v61 = vpop.f32.mrf.mxu1  ;;  %5686 = vmatmul.mubr.msk.bf16.gmra.mxu0 %vm1008_vm3, %v1463_v10 }
 0x1bd   : > { %v1409_v23 = vmax.f32 %v5620_v61, 0.0 }
 0x1be   : > { %v1190_v2 = vpop.f32.mrf.mxu1 }
 0x1bf   : > { %v1407_v21 = vmax.f32 %v1190_v2, 0.0  ;;  %v1465_v25 = vpack.c.bf16 %v1409_v23, %v1408_v15 }
 0x1c0   : > { %v5623_v16 = vpop.f32.mrf.mxu1 }
 0x1c1   : > { %v1464_v47 = vpack.c.bf16 %v1407_v21, %v1406_v26  ;;  %v1412_v55 = vmax.f32 %v5623_v16, 0.0 }
 0x1c2   : > { %v1203_v9 = vpop.f32.mrf.mxu1 }
 0x1c3   : > { %5689 = vmatprep.mubr.msk.bf16.mxu0 %vm1008_vm3, %v1464_v47  ;;  %v1410_v41 = vmax.f32 %v1203_v9, 0.0 }
 0x1c4   : > { %v5624_v38 = vpop.f32.mrf.mxu1  ;;  %5690 = vmatmul.mubr.msk.bf16.gmra.mxu0 %vm1008_vm3, %v1465_v25 }
 0x1c5   : > { %v1413_v58 = vmax.f32 %v5624_v38, 0.0 }
 0x1c6   : > { %v1206_v62 = vpop.f32.mrf.mxu1 }
 0x1c7   : > { %v1411_v54 = vmax.f32 %v1206_v62, 0.0  ;;  %v1467_v61 = vpack.c.bf16 %v1413_v58, %v1412_v55 }
 0x1c8   : > { %v5627_v50 = vpop.f32.mrf.mxu1 }
 0x1c9   : > { %v1466_v10 = vpack.c.bf16 %v1411_v54, %v1410_v41  ;;  %v1416_v15 = vmax.f32 %v5627_v50, 0.0 }
 0x1ca   : > { %v1219_v32 = vpop.f32.mrf.mxu1 }
 0x1cb   : > { %5693 = vmatprep.mubr.msk.bf16.mxu0 %vm1008_vm3, %v1466_v10  ;;  %v1414_v26 = vmax.f32 %v1219_v32, 0.0 }
 0x1cc   : > { %v5628_v30 = vpop.f32.mrf.mxu1  ;;  %5694 = vmatmul.mubr.msk.bf16.gmra.mxu0 %vm1008_vm3, %v1467_v61 }
 0x1cd   : > { %v1417_v23 = vmax.f32 %v5628_v30, 0.0 }
 0x1ce   : > { %v1222_v2 = vpop.f32.mrf.mxu1 }
 0x1cf   : > { %v1415_v21 = vmax.f32 %v1222_v2, 0.0  ;;  %v1469_v38 = vpack.c.bf16 %v1417_v23, %v1416_v15 }
 0x1d0   : > { %v5631_v47 = vpop.f32.mrf.mxu1 }
 0x1d1   : > { %v1468_v25 = vpack.c.bf16 %v1415_v21, %v1414_v26  ;;  %v1420_v55 = vmax.f32 %v5631_v47, 0.0 }
 0x1d2   : > { %v1235_v9 = vpop.f32.mrf.mxu1 }
 0x1d3   : > { %5697 = vmatprep.mubr.msk.bf16.mxu0 %vm1008_vm3, %v1468_v25  ;;  %v1418_v41 = vmax.f32 %v1235_v9, 0.0 }
 0x1d4   : > { %v5632_v16 = vpop.f32.mrf.mxu1  ;;  %5698 = vmatmul.mubr.msk.bf16.gmra.mxu0 %vm1008_vm3, %v1469_v38 }
 0x1d5   : > { %v1421_v58 = vmax.f32 %v5632_v16, 0.0 }
 0x1d6   : > { %v1238_v62 = vpop.f32.mrf.mxu1 }
 0x1d7   : > { %v1419_v54 = vmax.f32 %v1238_v62, 0.0  ;;  %v1471_v30 = vpack.c.bf16 %v1421_v58, %v1420_v55 }
 0x1d8   : > { %v5635_v10 = vpop.f32.mrf.mxu1 }
 0x1d9   : > { %v1470_v61 = vpack.c.bf16 %v1419_v54, %v1418_v41  ;;  %v1424_v15 = vmax.f32 %v5635_v10, 0.0 }
 0x1da   : > { %v1251_v32 = vpop.f32.mrf.mxu1 }
 0x1db   : > { %5701 = vmatprep.mubr.msk.bf16.mxu0 %vm1008_vm3, %v1470_v61  ;;  %v1422_v26 = vmax.f32 %v1251_v32, 0.0 }
 0x1dc   : > { %v5636_v50 = vpop.f32.mrf.mxu1  ;;  %5702 = vmatmul.mubr.msk.bf16.gmra.mxu0 %vm1008_vm3, %v1471_v30 }
 0x1dd   : > { %v1425_v23 = vmax.f32 %v5636_v50, 0.0 }
 0x1de   : > { %v1254_v2 = vpop.f32.mrf.mxu1 }
 0x1df   : > { %v1423_v21 = vmax.f32 %v1254_v2, 0.0  ;;  %v1473_v16 = vpack.c.bf16 %v1425_v23, %v1424_v15 }
 0x1e0   : > { %v5639_v25 = vpop.f32.mrf.mxu1 }
 0x1e1   : > { %v1472_v38 = vpack.c.bf16 %v1423_v21, %v1422_v26  ;;  %v1428_v47 = vmax.f32 %v5639_v25, 0.0 }
 0x1e2   : > { %v1267_v9 = vpop.f32.mrf.mxu1 }
 0x1e3   : > { %5705 = vmatprep.mubr.msk.bf16.mxu0 %vm1008_vm3, %v1472_v38  ;;  %v1426_v58 = vmax.f32 %v1267_v9, 0.0 }
 0x1e4   : > { %v5640_v62 = vpop.f32.mrf.mxu1  ;;  %5706 = vmatmul.mubr.msk.bf16.gmra.mxu0 %vm1008_vm3, %v1473_v16 }
 0x1e5   : > { %v1429_v41 = vmax.f32 %v5640_v62, 0.0 }
 0x1e6   : > { %v1270_v54 = vpop.f32.mrf.mxu1 }
 0x1e7   : > { %v1427_v55 = vmax.f32 %v1270_v54, 0.0  ;;  %v1475_v61 = vpack.c.bf16 %v1429_v41, %v1428_v47 }
 0x1e8   : > { %v5643_v30 = vpop.f32.mrf.mxu1 }
 0x1e9   : > { %v1474_v50 = vpack.c.bf16 %v1427_v55, %v1426_v58  ;;  %v1432_v10 = vmax.f32 %v5643_v30, 0.0 }
 0x1ea   : > { %v1283_v32 = vpop.f32.mrf.mxu1 }
 0x1eb   : > { %5709 = vmatprep.mubr.msk.bf16.mxu0 %vm1008_vm3, %v1474_v50  ;;  %v1430_v23 = vmax.f32 %v1283_v32, 0.0 }
 0x1ec   : > { %v5644_v2 = vpop.f32.mrf.mxu1  ;;  %5710 = vmatmul.mubr.msk.bf16.gmra.mxu0 %vm1008_vm3, %v1475_v61 }
 0x1ed   : > { %v1433_v26 = vmax.f32 %v5644_v2, 0.0 }
 0x1ee   : > { %v1286_v21 = vpop.f32.mrf.mxu1 }
 0x1ef   : > { %v1431_v15 = vmax.f32 %v1286_v21, 0.0  ;;  %v1477_v25 = vpack.c.bf16 %v1433_v26, %v1432_v10 }
 0x1f0   : > { %v5647_v38 = vpop.f32.mrf.mxu1 }
 0x1f1   : > { %v1476_v16 = vpack.c.bf16 %v1431_v15, %v1430_v23  ;;  %v1436_v47 = vmax.f32 %v5647_v38, 0.0 }
 0x1f2   : > { %v1299_v9 = vpop.f32.mrf.mxu1 }
 0x1f3   : > { %5713 = vmatprep.mubr.msk.bf16.mxu0 %vm1008_vm3, %v1476_v16  ;;  %v1434_v58 = vmax.f32 %v1299_v9, 0.0 }
 0x1f4   : > { %v5648_v62 = vpop.f32.mrf.mxu1  ;;  %5714 = vmatmul.mubr.msk.bf16.gmra.mxu0 %vm1008_vm3, %v1477_v25 }
 0x1f5   : > { %v1437_v41 = vmax.f32 %v5648_v62, 0.0 }
 0x1f6   : > { %v1302_v54 = vpop.f32.mrf.mxu1 }
 0x1f7   : > { %v1435_v55 = vmax.f32 %v1302_v54, 0.0  ;;  %v1479_v30 = vpack.c.bf16 %v1437_v41, %v1436_v47 }
 0x1f8   : > { %v5651_v61 = vpop.f32.mrf.mxu1 }
 0x1f9   : > { %v1478_v50 = vpack.c.bf16 %v1435_v55, %v1434_v58  ;;  %v1440_v10 = vmax.f32 %v5651_v61, 0.0 }
 0x1fa   : > { %v1315_v32 = vpop.f32.mrf.mxu1 }
 0x1fb   : > { %5717 = vmatprep.mubr.msk.bf16.mxu0 %vm1008_vm3, %v1478_v50  ;;  %v1438_v23 = vmax.f32 %v1315_v32, 0.0 }
 0x1fc   : > { %v5652_v2 = vpop.f32.mrf.mxu1  ;;  %5718 = vmatmul.mubr.msk.bf16.gmra.mxu0 %vm1008_vm3, %v1479_v30 }
 0x1fd   : > { %v1441_v26 = vmax.f32 %v5652_v2, 0.0 }
 0x1fe   : > { %v1318_v21 = vpop.f32.mrf.mxu1 }
 0x1ff   : > { %v1439_v15 = vmax.f32 %v1318_v21, 0.0  ;;  %v1481_v38 = vpack.c.bf16 %v1441_v26, %v1440_v10 }
 0x200   : > { %v5655_v25 = vpop.f32.mrf.mxu1 }
 0x201   : > { %v1480_v16 = vpack.c.bf16 %v1439_v15, %v1438_v23  ;;  %v1444_v47 = vmax.f32 %v5655_v25, 0.0 }
 0x202   : > { %v1331_v9 = vpop.f32.mrf.mxu1 }
 0x203   : > { %5721 = vmatprep.mubr.msk.bf16.mxu0 %vm1008_vm3, %v1480_v16  ;;  %v1442_v58 = vmax.f32 %v1331_v9, 0.0 }
 0x204   : > { %5722 = vmatmul.mubr.msk.bf16.gmra.mxu0 %vm1008_vm3, %v1481_v38  ;;  %v5656_v62 = vpop.f32.mrf.mxu1 }
 0x205   : > { %v1445_v41 = vmax.f32 %v5656_v62, 0.0 }
 0x206   : > { %v1334_v54 = vpop.f32.mrf.mxu1 }
 0x207   : > { %v1443_v55 = vmax.f32 %v1334_v54, 0.0  ;;  %v1483_v61 = vpack.c.bf16 %v1445_v41, %v1444_v47 }
 0x208   : > { %v5659_v30 = vpop.f32.mrf.mxu1 }
 0x209   : > { %v1482_v50 = vpack.c.bf16 %v1443_v55, %v1442_v58  ;;  %v1448_v10 = vmax.f32 %v5659_v30, 0.0 }
 0x20a   : > { %v1347_v32 = vpop.f32.mrf.mxu1 }
 0x20b   : > { %5725 = vmatprep.mubr.msk.bf16.mxu0 %vm1008_vm3, %v1482_v50  ;;  %v1446_v23 = vmax.f32 %v1347_v32, 0.0 }
 0x20c   : > { %5726 = vmatmul.mubr.msk.bf16.gmra.mxu0 %vm1008_vm3, %v1483_v61  ;;  %v5660_v2 = vpop.f32.mrf.mxu1 }
 0x20d   : > { %v1449_v26 = vmax.f32 %v5660_v2, 0.0 }
 0x20e   : > { %v1350_v21 = vpop.f32.mrf.mxu1 }
 0x20f   : > { %v1447_v15 = vmax.f32 %v1350_v21, 0.0  ;;  %v1485_v38 = vpack.c.bf16 %v1449_v26, %v1448_v10 }
 0x210   : > { %v5663_v25 = vpop.f32.mrf.mxu1 }
 0x211   : > { %v1484_v16 = vpack.c.bf16 %v1447_v15, %v1446_v23  ;;  %v1452_v47 = vmax.f32 %v5663_v25, 0.0 }
 0x212   : > { %v1363_v9 = vpop.f32.mrf.mxu1 }
 0x213   : > { %5729 = vmatprep.mubr.msk.bf16.mxu0 %vm1008_vm3, %v1484_v16  ;;  %v1450_v58 = vmax.f32 %v1363_v9, 0.0 }
 0x214   : > { %5730 = vmatmul.mubr.msk.bf16.gmra.mxu0 %vm1008_vm3, %v1485_v38  ;;  %v5664_v62 = vpop.f32.mrf.mxu1 }
 0x215   : > { %v1453_v41 = vmax.f32 %v5664_v62, 0.0 }
 0x216   : > { %v1366_v54 = vpop.f32.mrf.mxu1 }
 0x217   : > { %v1451_v55 = vmax.f32 %v1366_v54, 0.0  ;;  %v1487_v61 = vpack.c.bf16 %v1453_v41, %v1452_v47 }
 0x218   : > { %v5667_v30 = vpop.f32.mrf.mxu1 }
 0x219   : > { %v1486_v50 = vpack.c.bf16 %v1451_v55, %v1450_v58  ;;  %v1456_v10 = vmax.f32 %v5667_v30, 0.0 }
 0x21a   : > { %v1379_v32 = vpop.f32.mrf.mxu1 }
 0x21b   : > { %5733 = vmatprep.mubr.msk.bf16.mxu0 %vm1008_vm3, %v1486_v50  ;;  %v1454_v23 = vmax.f32 %v1379_v32, 0.0 }
 0x21c   : > { %5734 = vmatmul.mubr.msk.bf16.gmra.mxu0 %vm1008_vm3, %v1487_v61  ;;  %v5668_v2 = vpop.f32.mrf.mxu1 }
 0x21d   : > { %v1457_v26 = vmax.f32 %v5668_v2, 0.0 }
 0x21e   : > { %v1382_v21 = vpop.f32.mrf.mxu1 }
 0x21f   : > { %v1455_v15 = vmax.f32 %v1382_v21, 0.0  ;;  %v1489_v38 = vpack.c.bf16 %v1457_v26, %v1456_v10 }
 0x221   : > { %v1488_v25 = vpack.c.bf16 %v1455_v15, %v1454_v23 }
 0x223   : > { %5737 = vmatprep.mubr.msk.bf16.mxu0 %vm1008_vm3, %v1488_v25 }
 0x224   : > { %5738 = vmatmul.mubr.msk.bf16.gmra.mxu0 %vm1008_vm3, %v1489_v38 }
 0x26c   : > { %v5679_v16 = vpop.f32.mrf.mxu0 }
 0x26d   : > { %v1909_v9 = vsub.f32 0.0, %v5679_v16 }
 0x26e   : > { %v1652_v47 = vpop.f32.mrf.mxu0 }
 0x26f   : > { %v1975_v62 = vmul.f32 1.442695, %v1909_v9  ;;  %v1907_v58 = vsub.f32 0.0, %v1652_v47 }
 0x270   : > { %v5680_v41 = vpop.f32.mrf.mxu0 }
 0x271   : > { %5938 = vpow2.f32 %v1975_v62  ;;  %v1971_v54 = vmul.f32 1.442695, %v1907_v58  ;;  %v1910_v55 = vsub.f32 0.0, %v5680_v41 }
 0x272   : > { %v1655_v61 = vpop.f32.mrf.mxu0 }
 0x273   : > { %5940 = vpow2.f32 %v1971_v54  ;;  %v1977_v30 = vmul.f32 1.442695, %v1910_v55  ;;  %v1908_v50 = vsub.f32 0.0, %v1655_v61 }
 0x274   : > { %v5683_v32 = vpop.f32.mrf.mxu0 }
 0x275   : > { %5942 = vpow2.f32 %v1977_v30  ;;  %v1973_v10 = vmul.f32 1.442695, %v1908_v50  ;;  %v1913_v2 = vsub.f32 0.0, %v5683_v32 }
 0x276   : > { %v1668_v23 = vpop.f32.mrf.mxu0 }
 0x277   : > { %5944 = vpow2.f32 %v1973_v10  ;;  %v1983_v26 = vmul.f32 1.442695, %v1913_v2  ;;  %v1911_v21 = vsub.f32 0.0, %v1668_v23 }
 0x278   : > { %v5684_v15 = vpop.f32.mrf.mxu0 }
 0x279   : > { %5946 = vpow2.f32 %v1983_v26  ;;  %v1979_v38 = vmul.f32 1.442695, %v1911_v21  ;;  %v1914_v25 = vsub.f32 0.0, %v5684_v15 }
 0x27a   : > { %v1671_v16 = vpop.f32.mrf.mxu0 }
 0x27b   : > { %5948 = vpow2.f32 %v1979_v38  ;;  %v1985_v9 = vmul.f32 1.442695, %v1914_v25  ;;  %v1912_v47 = vsub.f32 0.0, %v1671_v16 }
 0x27c   : > { %v5687_v62 = vpop.f32.mrf.mxu0 }
 0x27d   : > { %5950 = vpow2.f32 %v1985_v9  ;;  %v1981_v58 = vmul.f32 1.442695, %v1912_v47  ;;  %v1917_v41 = vsub.f32 0.0, %v5687_v62 }
 0x27e   : > { %v5939_v54 = vpop.eup %5938  ;;  %v1684_v55 = vpop.f32.mrf.mxu0 }
 0x27f   : > { %v2101_v61 = vadd.f32 1.0, %v5939_v54  ;;  %5952 = vpow2.f32 %v1981_v58  ;;  %v1991_v30 = vmul.f32 1.442695, %v1917_v41  ;;  %v1915_v50 = vsub.f32 0.0, %v1684_v55 }
 0x280   : > { %v5941_v32 = vpop.eup %5940  ;;  %v5688_v10 = vpop.f32.mrf.mxu0 }
 0x281   : > { %5954 = vrcp.f32 %v2101_v61  ;;  %v2099_v2 = vadd.f32 1.0, %v5941_v32  ;;  %v1987_v23 = vmul.f32 1.442695, %v1915_v50  ;;  %v1918_v26 = vsub.f32 0.0, %v5688_v10 }
 0x282   : > { %v5943_v21 = vpop.eup %5942  ;;  %5956 = vpow2.f32 %v1991_v30  ;;  %v1687_v15 = vpop.f32.mrf.mxu0 }
 0x283   : > { %5958 = vrcp.f32 %v2099_v2  ;;  %v2102_v38 = vadd.f32 1.0, %v5943_v21  ;;  %v1993_v25 = vmul.f32 1.442695, %v1918_v26  ;;  %v1916_v16 = vsub.f32 0.0, %v1687_v15 }
 0x284   : > { %v5945_v9 = vpop.eup %5944  ;;  %5960 = vpow2.f32 %v1987_v23  ;;  %v5691_v47 = vpop.f32.mrf.mxu0 }
 0x285   : > { %5962 = vrcp.f32 %v2102_v38  ;;  %v2100_v62 = vadd.f32 1.0, %v5945_v9  ;;  %v1989_v58 = vmul.f32 1.442695, %v1916_v16  ;;  %v1921_v41 = vsub.f32 0.0, %v5691_v47 }
 0x286   : > { %v5947_v54 = vpop.eup %5946  ;;  %5964 = vpow2.f32 %v1993_v25  ;;  %v1700_v55 = vpop.f32.mrf.mxu0 }
 0x287   : > { %5966 = vrcp.f32 %v2100_v62  ;;  %v2105_v61 = vadd.f32 1.0, %v5947_v54  ;;  %v1999_v50 = vmul.f32 1.442695, %v1921_v41  ;;  %v1919_v32 = vsub.f32 0.0, %v1700_v55 }
 0x288   : > { %v5949_v30 = vpop.eup %5948  ;;  %5968 = vpow2.f32 %v1989_v58  ;;  %v5692_v10 = vpop.f32.mrf.mxu0 }
 0x289   : > { %5970 = vrcp.f32 %v2105_v61  ;;  %v2103_v2 = vadd.f32 1.0, %v5949_v30  ;;  %v1995_v26 = vmul.f32 1.442695, %v1919_v32  ;;  %v1922_v21 = vsub.f32 0.0, %v5692_v10 }
 0x28a   : > { %v5951_v23 = vpop.eup %5950  ;;  %5972 = vpow2.f32 %v1999_v50  ;;  %v1703_v15 = vpop.f32.mrf.mxu0 }
 0x28b   : > { %5974 = vrcp.f32 %v2103_v2  ;;  %v2106_v38 = vadd.f32 1.0, %v5951_v23  ;;  %v2001_v16 = vmul.f32 1.442695, %v1922_v21  ;;  %v1920_v9 = vsub.f32 0.0, %v1703_v15 }
 0x28c   : > { %v5953_v25 = vpop.eup %5952  ;;  %5976 = vpow2.f32 %v1995_v26  ;;  %v5695_v47 = vpop.f32.mrf.mxu0 }
 0x28d   : > { %5978 = vrcp.f32 %v2106_v38  ;;  %v2104_v62 = vadd.f32 1.0, %v5953_v25  ;;  %v1997_v41 = vmul.f32 1.442695, %v1920_v9  ;;  %v1925_v54 = vsub.f32 0.0, %v5695_v47 }
 0x28e   : > { %v5955_v58 = vpop.eup %5954  ;;  %5980 = vpow2.f32 %v2001_v16  ;;  %v1716_v55 = vpop.f32.mrf.mxu0 }
 0x28f   : > { %v5957_v61 = vpop.eup %5956  ;;  %v2229_v32 = vmul.f32 255.0, %v5955_v58  ;;  %5982 = vrcp.f32 %v2104_v62  ;;  %v2007_v30 = vmul.f32 1.442695, %v1925_v54  ;;  %v1923_v50 = vsub.f32 0.0, %v1716_v55 }
 0x290   : > { %v5959_v10 = vpop.eup %5958  ;;  %v2109_v2 = vadd.f32 1.0, %v5957_v61  ;;  %5984 = vpow2.f32 %v1997_v41  ;;  %v5696_v21 = vpop.f32.mrf.mxu0 }
 0x291   : > { %v5961_v23 = vpop.eup %5960  ;;  %v2293_v15 = vfloor.f32 %v2229_v32  ;;  %v2227_v26 = vmul.f32 255.0, %v5959_v10  ;;  %5986 = vpow2.f32 %v2007_v30  ;;  %v2003_v38 = vmul.f32 1.442695, %v1923_v50 }
 0x292   : > { %v5963_v25 = vpop.eup %5962  ;;  %5988 = vrcp.f32 %v2109_v2  ;;  %v2107_v9 = vadd.f32 1.0, %v5961_v23  ;;  %v1926_v16 = vsub.f32 0.0, %v5696_v21  ;;  %v1719_v47 = vpop.f32.mrf.mxu0 }
 0x293   : > { %v5965_v58 = vpop.eup %5964  ;;  %v6864_v62 = vmul.f32 0.003921569, %v2293_v15  ;;  %v2291_v54 = vfloor.f32 %v2227_v26  ;;  %v2230_v55 = vmul.f32 255.0, %v5963_v25  ;;  %5990 = vpow2.f32 %v2003_v38 }
 0x294   : > { %v5967_v41 = vpop.eup %5966  ;;  %5992 = vrcp.f32 %v2107_v9  ;;  %v2110_v61 = vadd.f32 1.0, %v5965_v58  ;;  %v2009_v32 = vmul.f32 1.442695, %v1926_v16  ;;  %v1924_v10 = vsub.f32 0.0, %v1719_v47  ;;  %v5699_v30 = vpop.f32.mrf.mxu0 }
 0x295   : > { %v5969_v50 = vpop.eup %5968  ;;  %v2294_v2 = vfloor.f32 %v2230_v55  ;;  %v2228_v21 = vmul.f32 255.0, %v5967_v41  ;;  %v1929_v23 = vsub.f32 0.0, %v5699_v30  ;;  %v6873_v15 = vmul.f32 0.003921569, %v2291_v54 }
 0x296   : > { %v5971_v26 = vpop.eup %5970  ;;  %5994 = vrcp.f32 %v2110_v61  ;;  %v2108_v38 = vadd.f32 1.0, %v5969_v50  ;;  %v2005_v25 = vmul.f32 1.442695, %v1924_v10  ;;  %v1732_v9 = vpop.f32.mrf.mxu0  ;;  %v5231_v16 = vpack.c.bf16 %v6864_v62, %v6864_v62 }
 0x297   : > { %v5973_v47 = vpop.eup %5972  ;;  %v6877_v58 = vmul.f32 0.003921569, %v2294_v2  ;;  %v6879_v39 = vmul.f32 255.0, %v5971_v26  ;;  %5996 = vpow2.f32 %v2009_v32  ;;  %v2015_v55 = vmul.f32 1.442695, %v1929_v23 }
 0x298   : > { %v5975_v41 = vpop.eup %5974  ;;  %5998 = vrcp.f32 %v2108_v38  ;;  %v2113_v54 = vadd.f32 1.0, %v5973_v47  ;;  %v1927_v30 = vsub.f32 0.0, %v1732_v9  ;;  %v5700_v37 = vpop.f32.mrf.mxu0  ;;  %v2292_v61 = vfloor.f32 %v2228_v21  ;;  %4318 = vst.msk [vmem:[%s6871_s29 + $0x8] sm:$0xf] %vm4315_vm5, %v5231_v16 }
 0x299   : > { %v5977_v10 = vpop.eup %5976  ;;  %v2420_v50 = vpack.c.bf16 %v6877_v58, %v6864_v62  ;;  %v2231_v2 = vmul.f32 255.0, %v5975_v41  ;;  %6000 = vpow2.f32 %v2005_v25  ;;  %v1930_v53 = vsub.f32 0.0, %v5700_v37 }
 0x29a   : > { %v5979_v26 = vpop.eup %5978  ;;  %6002 = vrcp.f32 %v2113_v54  ;;  %v2111_v32 = vadd.f32 1.0, %v5977_v10  ;;  %v2011_v23 = vmul.f32 1.442695, %v1927_v30  ;;  %v1735_v38 = vpop.f32.mrf.mxu0  ;;  %v2356_v12 = vmul.f32 0.003921569, %v2292_v61 }
 0x29b   : > { %v5981_v47 = vpop.eup %5980  ;;  %v2295_v9 = vfloor.f32 %v2231_v2  ;;  %v6886_v36 = vmul.f32 255.0, %v5979_v26  ;;  %6004 = vpow2.f32 %v2015_v55  ;;  %v1928_v21 = vsub.f32 0.0, %v1735_v38 }
 0x29c   : > { %v5983_v16 = vpop.eup %5982  ;;  %6006 = vrcp.f32 %v2111_v32  ;;  %v2114_v28 = vadd.f32 1.0, %v5981_v47  ;;  %v2017_v62 = vmul.f32 1.442695, %v1930_v53  ;;  %v5703_v20 = vpop.f32.mrf.mxu0  ;;  %v2419_v26 = vpack.c.bf16 %v2356_v12, %v6873_v15 }
 0x29d   : > { %v5985_v41 = vpop.eup %5984  ;;  %v2232_v54 = vmul.f32 255.0, %v5983_v16  ;;  %6008 = vpow2.f32 %v2011_v23  ;;  %v2013_v30 = vmul.f32 1.442695, %v1928_v21  ;;  %v1933_v2 = vsub.f32 0.0, %v5703_v20 }
 0x29e   : > { %v5987_v37 = vpop.eup %5986  ;;  %6010 = vrcp.f32 %v2114_v28  ;;  %v2112_v10 = vadd.f32 1.0, %v5985_v41  ;;  %v1748_v55 = vpop.f32.mrf.mxu0  ;;  %v5229_v53 = vpack.c.bf16 %v6873_v15, %v6873_v15  ;;  %v5230_v61 = vpack.c.bf16 %v2356_v12, %v2356_v12  ;;  %5743 = vmatprep.mubr.msk.bf16.mxu1 %vm2452_vm6, %v2419_v26 }
 0x29f   : > { %v5989_v38 = vpop.eup %5988  ;;  %v2117_v18 = vadd.f32 1.0, %v5987_v37  ;;  %6012 = vpow2.f32 %v2017_v62  ;;  %v2023_v23 = vmul.f32 1.442695, %v1933_v2  ;;  %v1931_v20 = vsub.f32 0.0, %v1748_v55  ;;  %5744 = vmatmul.mubr.msk.bf16.vlgmr.msra.gmra.mxu1 %vm2452_vm6, %v2420_v50 }
 0x2a0   : > { %v5991_v32 = vpop.eup %5990  ;;  %v6892_v47 = vmul.f32 255.0, %v5989_v38  ;;  %6014 = vrcp.f32 %v2112_v10  ;;  %v5704_v28 = vpop.f32.mrf.mxu0  ;;  %v2296_v41 = vfloor.f32 %v2232_v54  ;;  %4316 = vst.msk [vmem:[%s6871_s29] sm:$0xf] %vm4315_vm5, %v5229_v53  ;;  %4317 = vst.msk [vmem:[%s6871_s29 + $0x4] sm:$0xf] %vm4315_vm5, %v5230_v61 }
 0x2a1   : > { %v5993_v21 = vpop.eup %5992  ;;  %6016 = vrcp.f32 %v2117_v18  ;;  %v2115_v16 = vadd.f32 1.0, %v5991_v32  ;;  %v1934_v62 = vsub.f32 0.0, %v5704_v28  ;;  %v2019_v37 = vmul.f32 1.442695, %v1931_v20 }
 0x2a2   : > { %v6901_v15 = vmul.f32 255.0, %v5993_v21  ;;  %6018 = vpow2.f32 %v2013_v30  ;;  %v1751_v10 = vpop.f32.mrf.mxu0  ;;  %v2359_v55 = vmul.f32 0.003921569, %v2295_v9  ;;  %v2360_v61 = vmul.f32 0.003921569, %v2296_v41 }
 0x2a3   : > { %v5995_v2 = vpop.eup %5994  ;;  %6020 = vrcp.f32 %v2115_v16  ;;  %v2025_v26 = vmul.f32 1.442695, %v1934_v62  ;;  %v1932_v18 = vsub.f32 0.0, %v1751_v10 }
 0x2a4   : > { %v5997_v38 = vpop.eup %5996  ;;  %v6904_v54 = vmul.f32 255.0, %v5995_v2  ;;  %6022 = vpow2.f32 %v2023_v23  ;;  %v5707_v53 = vpop.f32.mrf.mxu0  ;;  %v2421_v9 = vpack.c.bf16 %v2360_v61, %v2359_v55  ;;  %v5233_v50 = vpack.c.bf16 %v2359_v55, %v2359_v55 }
 0x2a5   : > { %v5999_v32 = vpop.eup %5998  ;;  %v2118_v28 = vadd.f32 1.0, %v5997_v38  ;;  %6024 = vpow2.f32 %v2019_v37  ;;  %v2021_v21 = vmul.f32 1.442695, %v1932_v18  ;;  %v1937_v30 = vsub.f32 0.0, %v5707_v53 }
 0x2a6   : > { %v6001_v20 = vpop.eup %6000  ;;  %v6907_v16 = vmul.f32 255.0, %v5999_v32  ;;  %6026 = vpow2.f32 %v2025_v26  ;;  %v1764_v62 = vpop.f32.mrf.mxu0  ;;  %5747 = vmatprep.mubr.msk.bf16.mxu1 %vm2452_vm6, %v2421_v9  ;;  %v5234_v37 = vpack.c.bf16 %v2360_v61, %v2360_v61  ;;  %v7761_v32 = vfloor.f32 %v6879_v39  ;;  %4320 = vst.msk [vmem:[%s6871_s29 + $0x10] sm:$0xf] %vm4315_vm5, %v5233_v50 }
 0x2a7   : > { %v6003_v10 = vpop.eup %6002  ;;  %6028 = vrcp.f32 %v2118_v28  ;;  %v2116_v2 = vadd.f32 1.0, %v6001_v20  ;;  %v2031_v23 = vmul.f32 1.442695, %v1937_v30  ;;  %v1935_v18 = vsub.f32 0.0, %v1764_v62 }
 0x2a8   : > { %v6005_v41 = vpop.eup %6004  ;;  %v6909_v25 = vmul.f32 255.0, %v6003_v10  ;;  %6030 = vpow2.f32 %v2021_v21  ;;  %v5708_v38 = vpop.f32.mrf.mxu0  ;;  %v2361_v28 = vmul.f32 0.003921569, %v7761_v32  ;;  %v7762_v20 = vfloor.f32 %v6886_v36  ;;  %4321 = vst.msk [vmem:[%s6871_s29 + $0x14] sm:$0xf] %vm4315_vm5, %v5234_v37 }
 0x2a9   : > { %v6007_v53 = vpop.eup %6006  ;;  %6032 = vrcp.f32 %v2116_v2  ;;  %v2121_v26 = vadd.f32 1.0, %v6005_v41  ;;  %v2027_v61 = vmul.f32 1.442695, %v1935_v18  ;;  %v1938_v37 = vsub.f32 0.0, %v5708_v38 }
 0x2aa   : > { %v2362_v30 = vmul.f32 0.003921569, %v7762_v20  ;;  %v6009_v55 = vpop.eup %6008  ;;  %v6919_v10 = vmul.f32 255.0, %v6007_v53  ;;  %6034 = vpow2.f32 %v2031_v23  ;;  %v1767_v9 = vpop.f32.mrf.mxu0  ;;  %v5235_v41 = vpack.c.bf16 %v2361_v28, %v2361_v28 }
 0x2ab   : > { %v6011_v62 = vpop.eup %6010  ;;  %6036 = vrcp.f32 %v2121_v26  ;;  %v2119_v39 = vadd.f32 1.0, %v6009_v55  ;;  %v1936_v26 = vsub.f32 0.0, %v1767_v9  ;;  %v7765_v0 = vfloor.f32 %v6904_v54 }
 0x2ac   : > { %v2422_v2 = vpack.c.bf16 %v2362_v30, %v2361_v28  ;;  %v6013_v36 = vpop.eup %6012  ;;  %v6924_v50 = vmul.f32 255.0, %v6011_v62  ;;  %6038 = vpow2.f32 %v2027_v61  ;;  %v5236_v53 = vpack.c.bf16 %v2362_v30, %v2362_v30  ;;  %v5711_v20 = vpop.f32.mrf.mxu0  ;;  %4322 = vst.msk [vmem:[%s6871_s29 + $0x18] sm:$0xf] %vm4315_vm5, %v5235_v41 }
 0x2ad   : > { %v6015_v23 = vpop.eup %6014  ;;  %6040 = vrcp.f32 %v2119_v39  ;;  %v2122_v18 = vadd.f32 1.0, %v6013_v36  ;;  %v1941_v62 = vsub.f32 0.0, %v5711_v20  ;;  %v2300_v61 = vfloor.f32 %v6907_v16 }
 0x2ae   : > { %5748 = vmatmul.mubr.msk.bf16.gmra.mxu1 %vm2452_vm6, %v2422_v2  ;;  %v6017_v55 = vpop.eup %6016  ;;  %v6930_v21 = vmul.f32 255.0, %v6015_v23  ;;  %v1780_v32 = vpop.f32.mrf.mxu0  ;;  %4323 = vst.msk [vmem:[%s6871_s29 + $0x1c] sm:$0xf] %vm4315_vm5, %v5236_v53  ;;  %v2033_v36 = vmul.f32 1.442695, %v1938_v37  ;;  %v7763_v41 = vfloor.f32 %v6901_v15 }
 0x2af   : > { %v6019_v30 = vpop.eup %6018  ;;  %v2245_v39 = vmul.f32 255.0, %v6017_v55  ;;  %6042 = vrcp.f32 %v2122_v18  ;;  %v2029_v2 = vmul.f32 1.442695, %v1936_v26  ;;  %v2039_v12 = vmul.f32 1.442695, %v1941_v62 }
 0x2b0   : > { %v6021_v38 = vpop.eup %6020  ;;  %v2120_v9 = vadd.f32 1.0, %v6019_v30  ;;  %v2363_v14 = vmul.f32 0.003921569, %v7763_v41  ;;  %v1939_v28 = vsub.f32 0.0, %v1780_v32  ;;  %v5712_v23 = vpop.f32.mrf.mxu0  ;;  %6044 = vpow2.f32 %v2033_v36 }
 0x2b1   : > { %v6023_v6 = vpop.eup %6022  ;;  %v2309_v20 = vfloor.f32 %v2245_v39  ;;  %v6937_v4 = vmul.f32 255.0, %v6021_v38  ;;  %v2364_v16 = vmul.f32 0.003921569, %v2300_v61  ;;  %v2366_v15 = vmul.f32 0.003921569, %v7765_v0 }
 0x2b2   : > { %v6025_v53 = vpop.eup %6024  ;;  %6046 = vrcp.f32 %v2120_v9  ;;  %v2125_v18 = vadd.f32 1.0, %v6023_v6  ;;  %v5237_v37 = vpack.c.bf16 %v2363_v14, %v2363_v14  ;;  %v2035_v26 = vmul.f32 1.442695, %v1939_v28  ;;  %v1783_v55 = vpop.f32.mrf.mxu0 }
 0x2b3   : > { %v6027_v30 = vpop.eup %6026  ;;  %v6939_v62 = vmul.f32 0.003921569, %v2309_v20  ;;  %v2123_v32 = vadd.f32 1.0, %v6025_v53  ;;  %6048 = vpow2.f32 %v2029_v2  ;;  %v2423_v38 = vpack.c.bf16 %v2364_v16, %v2363_v14 }
 0x2b4   : > { %v6029_v41 = vpop.eup %6028  ;;  %6050 = vrcp.f32 %v2125_v18  ;;  %v2126_v39 = vadd.f32 1.0, %v6027_v30  ;;  %v5238_v61 = vpack.c.bf16 %v2364_v16, %v2364_v16  ;;  %v5715_v36 = vpop.f32.mrf.mxu0  ;;  %4324 = vst.msk [vmem:[%s6871_s29 + $0x20] sm:$0xf] %vm4315_vm5, %v5237_v37  ;;  %v7764_v28 = vfloor.f32 %v6892_v47 }
 0x2b5   : > { %v6031_v6 = vpop.eup %6030  ;;  %v2246_v9 = vmul.f32 255.0, %v6029_v41  ;;  %6052 = vrcp.f32 %v2123_v32  ;;  %5751 = vmatprep.mubr.msk.bf16.mxu1 %vm2452_vm6, %v2423_v38  ;;  %v1942_v14 = vsub.f32 0.0, %v5712_v23  ;;  %v1940_v18 = vsub.f32 0.0, %v1783_v55 }
 0x2b6   : > { %v2365_v20 = vmul.f32 0.003921569, %v7764_v28  ;;  %v6033_v53 = vpop.eup %6032  ;;  %6054 = vrcp.f32 %v2126_v39  ;;  %v2124_v2 = vadd.f32 1.0, %v6031_v6  ;;  %v1796_v16 = vpop.f32.mrf.mxu0  ;;  %4325 = vst.msk [vmem:[%s6871_s29 + $0x24] sm:$0xf] %vm4315_vm5, %v5238_v61  ;;  %v5240_v39 = vpack.c.bf16 %v2366_v15, %v2366_v15 }
 0x2b7   : > { %v6035_v37 = vpop.eup %6034  ;;  %v2310_v30 = vfloor.f32 %v2246_v9  ;;  %v6951_v41 = vmul.f32 255.0, %v6033_v53  ;;  %6056 = vpow2.f32 %v2039_v12  ;;  %v2041_v28 = vmul.f32 1.442695, %v1942_v14 }
 0x2b8   : > { %v2424_v47 = vpack.c.bf16 %v2366_v15, %v2365_v20  ;;  %v6037_v32 = vpop.eup %6036  ;;  %6058 = vrcp.f32 %v2124_v2  ;;  %v2129_v54 = vadd.f32 1.0, %v6035_v37  ;;  %v5239_v0 = vpack.c.bf16 %v2365_v20, %v2365_v20  ;;  %v6953_v6 = vpop.f32.mrf.mxu0  ;;  %4327 = vst.msk [vmem:[%s6871_s29 + $0x2c] sm:$0xf] %vm4315_vm5, %v5240_v39 }
 0x2b9   : > { %v6039_v23 = vpop.eup %6038  ;;  %v6955_v55 = vmul.f32 0.003921569, %v2310_v30  ;;  %v2249_v61 = vmul.f32 255.0, %v6037_v32  ;;  %6060 = vpow2.f32 %v2035_v26  ;;  %v2037_v53 = vmul.f32 1.442695, %v1940_v18 }
 0x2ba   : > { %5752 = vmatmul.mubr.msk.bf16.gmra.mxu1 %vm2452_vm6, %v2424_v47  ;;  %v6041_v12 = vpop.eup %6040  ;;  %6062 = vrcp.f32 %v2129_v54  ;;  %v2127_v9 = vadd.f32 1.0, %v6039_v23  ;;  %v6959_v2 = vpop.f32.mrf.mxu0  ;;  %4326 = vst.msk [vmem:[%s6871_s29 + $0x28] sm:$0xf] %vm4315_vm5, %v5239_v0  ;;  %v1945_v37 = vsub.f32 0.0, %v5715_v36  ;;  %v2304_v30 = vfloor.f32 %v6930_v21 }
 0x2bb   : > { %v2313_v15 = vfloor.f32 %v2249_v61  ;;  %v6965_v20 = vmul.f32 255.0, %v6041_v12  ;;  %v7766_v47 = vfloor.f32 %v6919_v10  ;;  %v1943_v54 = vsub.f32 0.0, %v1796_v16 }
 0x2bc   : > { %v6043_v26 = vpop.eup %6042  ;;  %6064 = vrcp.f32 %v2127_v9  ;;  %v7767_v14 = vfloor.f32 %v6909_v25  ;;  %v6972_v23 = vpop.f32.mrf.mxu0  ;;  %v2047_v21 = vmul.f32 1.442695, %v1945_v37  ;;  %v2368_v12 = vmul.f32 0.003921569, %v2304_v30 }
 0x2bd   : > { %v2367_v32 = vmul.f32 0.003921569, %v7766_v47  ;;  %v6974_v0 = vmul.f32 0.003921569, %v2313_v15  ;;  %v2250_v61 = vmul.f32 255.0, %v6043_v26  ;;  %6066 = vpow2.f32 %v2041_v28  ;;  %v6045_v36 = vpop.eup %6044 }
 0x2be   : > { %v2369_v18 = vmul.f32 0.003921569, %v7767_v14  ;;  %6068 = vpow2.f32 %v2037_v53  ;;  %v6977_v10 = vpop.f32.mrf.mxu0  ;;  %v2130_v25 = vadd.f32 1.0, %v6045_v36  ;;  %v2043_v14 = vmul.f32 1.442695, %v1943_v54 }
 0x2bf   : > { %v5241_v9 = vpack.c.bf16 %v2367_v32, %v2367_v32  ;;  %v6047_v16 = vpop.eup %6046  ;;  %v2314_v47 = vfloor.f32 %v2250_v61  ;;  %v7768_v38 = vfloor.f32 %v6924_v50  ;;  %6070 = vpow2.f32 %v2047_v21 }
 0x2c0   : > { %v6049_v45 = vpop.eup %6048  ;;  %v6981_v29 = vmul.f32 255.0, %v6047_v16  ;;  %v2425_v28 = vpack.c.bf16 %v2368_v12, %v2367_v32  ;;  %v5242_v53 = vpack.c.bf16 %v2368_v12, %v2368_v12  ;;  %v6983_v26 = vpop.f32.mrf.mxu0  ;;  %6072 = vrcp.f32 %v2130_v25 }
 0x2c1   : > { %v2370_v15 = vmul.f32 0.003921569, %v7768_v38  ;;  %4328 = vst.msk [vmem:[%s6871_s29 + $0x30] sm:$0xf] %vm4315_vm5, %v5241_v9  ;;  %v6051_v37 = vpop.eup %6050  ;;  %v6987_v30 = vmul.f32 0.003921569, %v2314_v47  ;;  %6074 = vpow2.f32 %v2043_v14  ;;  %v5243_v32 = vpack.c.bf16 %v2369_v18, %v2369_v18 }
 0x2c2   : > { %v2128_v61 = vadd.f32 1.0, %v6049_v45  ;;  %v6053_v36 = vpop.eup %6052  ;;  %v2253_v38 = vmul.f32 255.0, %v6051_v37  ;;  %5755 = vmatprep.mubr.msk.bf16.mxu1 %vm2452_vm6, %v2425_v28  ;;  %v6991_v21 = vpop.f32.mrf.mxu0  ;;  %4329 = vst.msk [vmem:[%s6871_s29 + $0x34] sm:$0xf] %vm4315_vm5, %v5242_v53  ;;  %v1946_v16 = vsub.f32 0.0, %v6953_v6  ;;  %v1944_v14 = vsub.f32 0.0, %v6959_v2 }
 0x2c3   : > { %v2426_v54 = vpack.c.bf16 %v2370_v15, %v2369_v18  ;;  %v6055_v12 = vpop.eup %6054  ;;  %v6995_v9 = vmul.f32 255.0, %v6053_v36  ;;  %v5244_v45 = vpack.c.bf16 %v2370_v15, %v2370_v15  ;;  %v1949_v18 = vsub.f32 0.0, %v6972_v23  ;;  %4330 = vst.msk [vmem:[%s6871_s29 + $0x38] sm:$0xf] %vm4315_vm5, %v5243_v32 }
 0x2c4   : > { %6076 = vrcp.f32 %v2128_v61  ;;  %v6057_v47 = vpop.eup %6056  ;;  %v2317_v25 = vfloor.f32 %v2253_v38  ;;  %v2254_v28 = vmul.f32 255.0, %v6055_v12  ;;  %v7001_v37 = vpop.f32.mrf.mxu0  ;;  %v2049_v50 = vmul.f32 1.442695, %v1946_v16 }
 0x2c5   : > { %5756 = vmatmul.mubr.msk.bf16.gmra.mxu1 %vm2452_vm6, %v2426_v54  ;;  %v6059_v53 = vpop.eup %6058  ;;  %v2133_v36 = vadd.f32 1.0, %v6057_v47  ;;  %v7769_v15 = vfloor.f32 %v6937_v4  ;;  %4331 = vst.msk [vmem:[%s6871_s29 + $0x3c] sm:$0xf] %vm4315_vm5, %v5244_v45  ;;  %v2045_v23 = vmul.f32 1.442695, %v1944_v14  ;;  %v7770_v16 = vfloor.f32 %v6951_v41 }
 0x2c6   : > { %v6061_v6 = vpop.eup %6060  ;;  %v7010_v38 = vmul.f32 0.003921569, %v2317_v25  ;;  %v2318_v2 = vfloor.f32 %v2254_v28  ;;  %v7012_v12 = vmul.f32 255.0, %v6059_v53  ;;  %v7014_v39 = vpop.f32.mrf.mxu0  ;;  %v2055_v61 = vmul.f32 1.442695, %v1949_v18 }
 0x2c7   : > { %v2371_v54 = vmul.f32 0.003921569, %v7769_v15  ;;  %v6063_v32 = vpop.eup %6062  ;;  %6078 = vrcp.f32 %v2133_v36  ;;  %v2131_v24 = vadd.f32 1.0, %v6061_v6  ;;  %v2372_v47 = vmul.f32 0.003921569, %v7770_v16 }
 0x2c8   : > { %v7018_v4 = vmul.f32 0.003921569, %v2318_v2  ;;  %v2257_v15 = vmul.f32 255.0, %v6063_v32  ;;  %6080 = vpow2.f32 %v2049_v50  ;;  %v7021_v25 = vpop.f32.mrf.mxu0  ;;  %v1947_v41 = vsub.f32 0.0, %v6977_v10 }
 0x2c9   : > { %v6065_v28 = vpop.eup %6064  ;;  %6082 = vrcp.f32 %v2131_v24  ;;  %v2427_v14 = vpack.c.bf16 %v2372_v47, %v2371_v54  ;;  %v5245_v53 = vpack.c.bf16 %v2371_v54, %v2371_v54  ;;  %v5246_v36 = vpack.c.bf16 %v2372_v47, %v2372_v47 }
 0x2ca   : > { %v6067_v6 = vpop.eup %6066  ;;  %v2321_v18 = vfloor.f32 %v2257_v15  ;;  %v7023_v34 = vmul.f32 255.0, %v6065_v28  ;;  %6084 = vpow2.f32 %v2045_v23  ;;  %v1831_v2 = vpop.f32.mrf.mxu0  ;;  %v2428_v24 = vpack.c.bf16 %v6955_v55, %v6939_v62 }
 0x2cb   : > { %v6069_v16 = vpop.eup %6068  ;;  %v2134_v32 = vadd.f32 1.0, %v6067_v6  ;;  %6086 = vpow2.f32 %v2055_v61  ;;  %5759 = vmatprep.mubr.msk.bf16.mxu1 %vm2452_vm6, %v2427_v14  ;;  %v1950_v50 = vsub.f32 0.0, %v6983_v26  ;;  %4332 = vst.msk [vmem:[%s6871_s29 + $0x40] sm:$0xf] %vm4315_vm5, %v5245_v53  ;;  %4333 = vst.msk [vmem:[%s6871_s29 + $0x44] sm:$0xf] %vm4315_vm5, %v5246_v36  ;;  %v7771_v6 = vfloor.f32 %v6965_v20 }
 0x2cc   : > { %v7034_v54 = vmul.f32 0.003921569, %v2321_v18  ;;  %v2132_v10 = vadd.f32 1.0, %v6069_v16  ;;  %v2051_v47 = vmul.f32 1.442695, %v1947_v41  ;;  %v7037_v15 = vpop.f32.mrf.mxu0  ;;  %v6071_v61 = vpop.eup %6070  ;;  %v1948_v14 = vsub.f32 0.0, %v6991_v21 }
 0x2cd   : > { %6088 = vrcp.f32 %v2134_v32  ;;  %5760 = vmatmul.mubr.msk.bf16.gmra.mxu1 %vm2452_vm6, %v2428_v24  ;;  %v2057_v28 = vmul.f32 1.442695, %v1950_v50  ;;  %v1953_v26 = vsub.f32 0.0, %v7001_v37  ;;  %v6073_v53 = vpop.eup %6072  ;;  %v2137_v36 = vadd.f32 1.0, %v6071_v61 }
 0x2ce   : > { %6090 = vrcp.f32 %v2132_v10  ;;  %v2375_v18 = vmul.f32 0.003921569, %v7771_v6  ;;  %v7772_v16 = vfloor.f32 %v6981_v29  ;;  %v7046_v23 = vpop.f32.mrf.mxu0  ;;  %v6075_v45 = vpop.eup %6074  ;;  %v2258_v32 = vmul.f32 255.0, %v6073_v53 }
 0x2cf   : > { %6092 = vpow2.f32 %v2051_v47  ;;  %v2053_v24 = vmul.f32 1.442695, %v1948_v14  ;;  %v2063_v50 = vmul.f32 1.442695, %v1953_v26  ;;  %v2135_v21 = vadd.f32 1.0, %v6075_v45 }
 0x2d0   : > { %v2376_v41 = vmul.f32 0.003921569, %v7772_v16  ;;  %6094 = vrcp.f32 %v2137_v36  ;;  %v5249_v10 = vpack.c.bf16 %v2375_v18, %v2375_v18  ;;  %v7048_v61 = vpop.f32.mrf.mxu0  ;;  %v2322_v20 = vfloor.f32 %v2258_v32 }
 0x2d1   : > { %v6077_v11 = vpop.eup %6076  ;;  %6096 = vpow2.f32 %v2057_v28  ;;  %v1951_v47 = vsub.f32 0.0, %v7014_v39  ;;  %v2430_v14 = vpack.c.bf16 %v6987_v30, %v6974_v0  ;;  %v1954_v26 = vsub.f32 0.0, %v7021_v25 }
 0x2d2   : > { %v2429_v37 = vpack.c.bf16 %v2376_v41, %v2375_v18  ;;  %v2256_v6 = vmul.f32 255.0, %v6077_v11  ;;  %v5250_v29 = vpack.c.bf16 %v2376_v41, %v2376_v41  ;;  %6098 = vrcp.f32 %v2135_v21  ;;  %v7055_v45 = vpop.f32.mrf.mxu0  ;;  %4336 = vst.msk [vmem:[%s6871_s29 + $0x50] sm:$0xf] %vm4315_vm5, %v5249_v10 }
 0x2d3   : > { %v7059_v53 = vmul.f32 0.003921569, %v2322_v20  ;;  %6100 = vpow2.f32 %v2053_v24  ;;  %v1952_v11 = vsub.f32 0.0, %v1831_v2  ;;  %v2059_v18 = vmul.f32 1.442695, %v1951_v47 }
 0x2d4   : > { %5763 = vmatprep.mubr.msk.bf16.mxu1 %vm2452_vm6, %v2429_v37  ;;  %v2320_v36 = vfloor.f32 %v2256_v6  ;;  %4337 = vst.msk [vmem:[%s6871_s29 + $0x54] sm:$0xf] %vm4315_vm5, %v5250_v29  ;;  %v6079_v28 = vpop.eup %6078  ;;  %6102 = vpow2.f32 %v2063_v50  ;;  %v2065_v39 = vmul.f32 1.442695, %v1954_v26  ;;  %v7773_v16 = vfloor.f32 %v6995_v9  ;;  %v7065_v32 = vpop.f32.mrf.mxu0 }
 0x2d5   : > { %v6081_v25 = vpop.eup %6080  ;;  %v2261_v21 = vmul.f32 255.0, %v6079_v28  ;;  %5764 = vmatmul.mubr.msk.bf16.gmra.mxu1 %vm2452_vm6, %v2430_v14  ;;  %v2061_v37 = vmul.f32 1.442695, %v1952_v11  ;;  %v7774_v10 = vfloor.f32 %v7012_v12  ;;  %v2432_v2 = vpack.c.bf16 %v7018_v4, %v7010_v38 }
 0x2d6   : > { %v2379_v41 = vmul.f32 0.003921569, %v7773_v16  ;;  %v6083_v20 = vpop.eup %6082  ;;  %v2138_v50 = vadd.f32 1.0, %v6081_v25  ;;  %6104 = vpow2.f32 %v2059_v18  ;;  %v1957_v9 = vsub.f32 0.0, %v7037_v15  ;;  %v7073_v29 = vpop.f32.mrf.mxu0 }
 0x2d7   : > { %v2380_v24 = vmul.f32 0.003921569, %v7774_v10  ;;  %v6085_v47 = vpop.eup %6084  ;;  %v2325_v26 = vfloor.f32 %v2261_v21  ;;  %v2259_v28 = vmul.f32 255.0, %v6083_v20  ;;  %6106 = vpow2.f32 %v2065_v39 }
 0x2d8   : > { %v5253_v6 = vpack.c.bf16 %v2379_v41, %v2379_v41  ;;  %v6087_v11 = vpop.eup %6086  ;;  %6108 = vrcp.f32 %v2138_v50  ;;  %v2136_v12 = vadd.f32 1.0, %v6085_v47  ;;  %v2071_v10 = vmul.f32 1.442695, %v1957_v9  ;;  %v7075_v1 = vpop.f32.mrf.mxu0 }
 0x2d9   : > { %v2431_v14 = vpack.c.bf16 %v2380_v24, %v2379_v41  ;;  %v5254_v16 = vpack.c.bf16 %v2380_v24, %v2380_v24  ;;  %v7079_v18 = vmul.f32 0.003921569, %v2325_v26  ;;  %v2323_v15 = vfloor.f32 %v2259_v28 }
 0x2da   : > { %4340 = vst.msk [vmem:[%s6871_s29 + $0x60] sm:$0xf] %vm4315_vm5, %v5253_v6  ;;  %v2141_v25 = vadd.f32 1.0, %v6087_v11  ;;  %6110 = vpow2.f32 %v2061_v37  ;;  %v6089_v21 = vpop.eup %6088  ;;  %v7775_v39 = vfloor.f32 %v7023_v34  ;;  %v2384_v20 = vmul.f32 0.003921569, %v2320_v36  ;;  %v7090_v47 = vpop.f32.mrf.mxu0 }
 0x2db   : > { %5767 = vmatprep.mubr.msk.bf16.mxu1 %vm2452_vm6, %v2431_v14  ;;  %6112 = vrcp.f32 %v2136_v12  ;;  %v1955_v24 = vsub.f32 0.0, %v7046_v23  ;;  %4341 = vst.msk [vmem:[%s6871_s29 + $0x64] sm:$0xf] %vm4315_vm5, %v5254_v16  ;;  %v6091_v50 = vpop.eup %6090  ;;  %v2262_v9 = vmul.f32 255.0, %v6089_v21  ;;  %v2434_v6 = vpack.c.bf16 %v7059_v53, %v7034_v54 }
 0x2dc   : > { %v2383_v41 = vmul.f32 0.003921569, %v7775_v39  ;;  %6114 = vrcp.f32 %v2141_v25  ;;  %v1958_v37 = vsub.f32 0.0, %v7048_v61  ;;  %v6093_v26 = vpop.eup %6092  ;;  %v2260_v28 = vmul.f32 255.0, %v6091_v50  ;;  %v7093_v25 = vpop.f32.mrf.mxu0 }
 0x2dd   : > { %6116 = vpow2.f32 %v2071_v10  ;;  %v6095_v14 = vpop.eup %6094  ;;  %v2326_v23 = vfloor.f32 %v2262_v9  ;;  %v2139_v11 = vadd.f32 1.0, %v6093_v26  ;;  %5768 = vmatmul.mubr.msk.bf16.gmra.mxu1 %vm2452_vm6, %v2432_v2  ;;  %v5258_v12 = vpack.c.bf16 %v2384_v20, %v2384_v20 }
 0x2de   : > { %v2433_v34 = vpack.c.bf16 %v2384_v20, %v2383_v41  ;;  %v5257_v36 = vpack.c.bf16 %v2383_v41, %v2383_v41  ;;  %v2067_v16 = vmul.f32 1.442695, %v1955_v24  ;;  %v6097_v21 = vpop.eup %6096  ;;  %v2324_v61 = vfloor.f32 %v2260_v28 }
 0x2df   : > { %v2265_v39 = vmul.f32 255.0, %v6095_v14  ;;  %v2073_v50 = vmul.f32 1.442695, %v1958_v37  ;;  %v1956_v10 = vsub.f32 0.0, %v7055_v45  ;;  %v6099_v41 = vpop.eup %6098  ;;  %v7099_v9 = vmul.f32 0.003921569, %v2326_v23 }
 0x2e0   : > { %5771 = vmatprep.mubr.msk.bf16.mxu1 %vm2452_vm6, %v2433_v34  ;;  %4344 = vst.msk [vmem:[%s6871_s29 + $0x70] sm:$0xf] %vm4315_vm5, %v5257_v36  ;;  %6118 = vrcp.f32 %v2139_v11  ;;  %v2142_v2 = vadd.f32 1.0, %v6097_v21  ;;  %v2387_v26 = vmul.f32 0.003921569, %v2323_v15  ;;  %v6101_v20 = vpop.eup %6100  ;;  %v2263_v7 = vmul.f32 255.0, %v6099_v41  ;;  %v1876_v36 = vpop.f32.mrf.mxu0 }
 0x2e1   : > { %4345 = vst.msk [vmem:[%s6871_s29 + $0x74] sm:$0xf] %vm4315_vm5, %v5258_v12  ;;  %v2329_v24 = vfloor.f32 %v2265_v39  ;;  %6120 = vpow2.f32 %v2067_v16  ;;  %v2069_v28 = vmul.f32 1.442695, %v1956_v10  ;;  %v6103_v34 = vpop.eup %6102  ;;  %v2140_v37 = vadd.f32 1.0, %v6101_v20 }
 0x2e2   : > { %6122 = vrcp.f32 %v2142_v2  ;;  %v2388_v45 = vmul.f32 0.003921569, %v2324_v61  ;;  %v5261_v14 = vpack.c.bf16 %v2387_v26, %v2387_v26  ;;  %v2327_v23 = vfloor.f32 %v2263_v7  ;;  %v5736_v20 = vpop.f32.mrf.mxu0 }
 0x2e3   : > { %v7103_v60 = vmul.f32 0.003921569, %v2329_v24  ;;  %v2145_v11 = vadd.f32 1.0, %v6103_v34  ;;  %6124 = vpow2.f32 %v2073_v50  ;;  %v6105_v15 = vpop.eup %6104  ;;  %v2436_v16 = vpack.c.bf16 %v7099_v9, %v7079_v18 }
 0x2e4   : > { %6126 = vrcp.f32 %v2140_v37  ;;  %v2435_v12 = vpack.c.bf16 %v2388_v45, %v2387_v26  ;;  %v5262_v21 = vpack.c.bf16 %v2388_v45, %v2388_v45  ;;  %4348 = vst.msk [vmem:[%s6871_s29 + $0x80] sm:$0xf] %vm4315_vm5, %v5261_v14  ;;  %v6107_v39 = vpop.eup %6106  ;;  %v2143_v61 = vadd.f32 1.0, %v6105_v15 }
 0x2e5   : > { %6128 = vrcp.f32 %v2145_v11  ;;  %v1961_v10 = vsub.f32 0.0, %v7065_v32  ;;  %v7110_v41 = vmul.f32 0.003921569, %v2327_v23  ;;  %v6109_v7 = vpop.eup %6108  ;;  %v2146_v2 = vadd.f32 1.0, %v6107_v39  ;;  %5772 = vmatmul.mubr.msk.bf16.gmra.mxu1 %vm2452_vm6, %v2434_v6 }
 0x2e6   : > { %6130 = vpow2.f32 %v2069_v28  ;;  %v1959_v50 = vsub.f32 0.0, %v7073_v29  ;;  %v1962_v26 = vsub.f32 0.0, %v7075_v1  ;;  %4349 = vst.msk [vmem:[%s6871_s29 + $0x84] sm:$0xf] %vm4315_vm5, %v5262_v21  ;;  %v2266_v34 = vmul.f32 255.0, %v6109_v7  ;;  %5775 = vmatprep.mubr.msk.bf16.mxu1 %vm2452_vm6, %v2435_v12 }
 0x2e7   : > { %v6111_v24 = vpop.eup %6110  ;;  %6132 = vrcp.f32 %v2143_v61  ;;  %v2079_v32 = vmul.f32 1.442695, %v1961_v10  ;;  %v5265_v37 = vpack.c.bf16 %v7110_v41, %v7110_v41  ;;  %v1960_v11 = vsub.f32 0.0, %v7090_v47  ;;  %v1879_v61 = vpop.f32.mrf.mxu0 }
 0x2e8   : > { %v6113_v45 = vpop.eup %6112  ;;  %6134 = vrcp.f32 %v2146_v2  ;;  %v2144_v6 = vadd.f32 1.0, %v6111_v24  ;;  %v2075_v28 = vmul.f32 1.442695, %v1959_v50  ;;  %v2081_v29 = vmul.f32 1.442695, %v1962_v26 }
 0x2e9   : > { %v6115_v14 = vpop.eup %6114  ;;  %v2330_v1 = vfloor.f32 %v2266_v34  ;;  %v2264_v23 = vmul.f32 255.0, %v6113_v45  ;;  %6136 = vpow2.f32 %v2079_v32  ;;  %4352 = vst.msk [vmem:[%s6871_s29 + $0x90] sm:$0xf] %vm4315_vm5, %v5265_v37  ;;  %v1965_v12 = vsub.f32 0.0, %v7093_v25  ;;  %v5739_v34 = vpop.f32.mrf.mxu0 }
 0x2ea   : > { %v6117_v15 = vpop.eup %6116  ;;  %v2269_v21 = vmul.f32 255.0, %v6115_v14  ;;  %6138 = vrcp.f32 %v2144_v6  ;;  %v1963_v39 = vsub.f32 0.0, %v1876_v36  ;;  %v2077_v26 = vmul.f32 1.442695, %v1960_v11 }
 0x2eb   : > { %v7124_v10 = vmul.f32 0.003921569, %v2330_v1  ;;  %v2328_v7 = vfloor.f32 %v2264_v23  ;;  %v2149_v2 = vadd.f32 1.0, %v6117_v15  ;;  %6140 = vpow2.f32 %v2075_v28 }
 0x2ec   : > { %v2333_v50 = vfloor.f32 %v2269_v21  ;;  %6142 = vpow2.f32 %v2081_v29  ;;  %v2087_v24 = vmul.f32 1.442695, %v1965_v12  ;;  %v2083_v45 = vmul.f32 1.442695, %v1963_v39  ;;  %v1892_v39 = vpop.f32.mrf.mxu0 }
 0x2ed   : > { %v6119_v47 = vpop.eup %6118  ;;  %6144 = vrcp.f32 %v2149_v2  ;;  %v2392_v32 = vmul.f32 0.003921569, %v2328_v7  ;;  %v2438_v37 = vpack.c.bf16 %v7124_v10, %v7103_v60  ;;  %5776 = vmatmul.mubr.msk.bf16.gmra.mxu1 %vm2452_vm6, %v2436_v16  ;;  %v1966_v28 = vsub.f32 0.0, %v5736_v20 }
 0x2ee   : > { %v6121_v25 = vpop.eup %6120  ;;  %v7128_v36 = vmul.f32 0.003921569, %v2333_v50  ;;  %v2267_v6 = vmul.f32 255.0, %v6119_v47  ;;  %6146 = vpow2.f32 %v2077_v26  ;;  %v1964_v16 = vsub.f32 0.0, %v1879_v61 }
 0x2ef   : > { %v6123_v14 = vpop.eup %6122  ;;  %v2147_v29 = vadd.f32 1.0, %v6121_v25  ;;  %v2437_v1 = vpack.c.bf16 %v2392_v32, %v7110_v41  ;;  %v5266_v23 = vpack.c.bf16 %v2392_v32, %v2392_v32  ;;  %6148 = vpow2.f32 %v2087_v24 }
 0x2f0   : > { %v6125_v11 = vpop.eup %6124  ;;  %v2331_v15 = vfloor.f32 %v2267_v6  ;;  %v2270_v21 = vmul.f32 255.0, %v6123_v14  ;;  %6150 = vpow2.f32 %v2083_v45  ;;  %v2089_v12 = vmul.f32 1.442695, %v1966_v28 }
 0x2f1   : > { %v6127_v7 = vpop.eup %6126  ;;  %6152 = vrcp.f32 %v2147_v29  ;;  %v2150_v2 = vadd.f32 1.0, %v6125_v11  ;;  %5779 = vmatprep.mubr.msk.bf16.mxu1 %vm2452_vm6, %v2437_v1  ;;  %v1969_v20 = vsub.f32 0.0, %v5739_v34  ;;  %4353 = vst.msk [vmem:[%s6871_s29 + $0x94] sm:$0xf] %vm4315_vm5, %v5266_v23  ;;  %v2085_v45 = vmul.f32 1.442695, %v1964_v16  ;;  %v5740_v34 = vpop.f32.mrf.mxu0 }
 0x2f2   : > { %v6129_v50 = vpop.eup %6128  ;;  %v2334_v26 = vfloor.f32 %v2270_v21  ;;  %v2268_v41 = vmul.f32 255.0, %v6127_v7  ;;  %v2395_v47 = vmul.f32 0.003921569, %v2331_v15  ;;  %6154 = vpow2.f32 %v2089_v12 }
 0x2f3   : > { %v6131_v24 = vpop.eup %6130  ;;  %v2273_v32 = vmul.f32 255.0, %v6129_v50  ;;  %6156 = vrcp.f32 %v2150_v2  ;;  %v2095_v25 = vmul.f32 1.442695, %v1969_v20  ;;  %v1967_v21 = vsub.f32 0.0, %v1892_v39 }
 0x2f4   : > { %v6133_v6 = vpop.eup %6132  ;;  %v7135_v28 = vmul.f32 0.003921569, %v2334_v26  ;;  %v2332_v14 = vfloor.f32 %v2268_v41  ;;  %v2148_v29 = vadd.f32 1.0, %v6131_v24  ;;  %v5269_v61 = vpack.c.bf16 %v2395_v47, %v2395_v47 }
 0x2f5   : > { %v6135_v1 = vpop.eup %6134  ;;  %v2337_v23 = vfloor.f32 %v2273_v32  ;;  %v2271_v11 = vmul.f32 255.0, %v6133_v6  ;;  %6158 = vpow2.f32 %v2085_v45  ;;  %5780 = vmatmul.mubr.msk.bf16.gmra.mxu1 %vm2452_vm6, %v2438_v37  ;;  %v1895_v6 = vpop.f32.mrf.mxu0 }
 0x2f6   : > { %v6137_v15 = vpop.eup %6136  ;;  %v2274_v12 = vmul.f32 255.0, %v6135_v1  ;;  %6160 = vrcp.f32 %v2148_v29  ;;  %v2396_v7 = vmul.f32 0.003921569, %v2332_v14  ;;  %v2440_v2 = vpack.c.bf16 %v7135_v28, %v7128_v36  ;;  %4356 = vst.msk [vmem:[%s6871_s29 + $0xa0] sm:$0xf] %vm4315_vm5, %v5269_v61 }
 0x2f7   : > { %v6139_v16 = vpop.eup %6138  ;;  %v7142_v20 = vmul.f32 0.003921569, %v2337_v23  ;;  %v2335_v50 = vfloor.f32 %v2271_v11  ;;  %v2153_v26 = vadd.f32 1.0, %v6137_v15  ;;  %6162 = vpow2.f32 %v2095_v25 }
 0x2f8   : > { %v6141_v41 = vpop.eup %6140  ;;  %v2338_v24 = vfloor.f32 %v2274_v12  ;;  %v2272_v39 = vmul.f32 255.0, %v6139_v16  ;;  %v2439_v32 = vpack.c.bf16 %v2396_v7, %v2395_v47  ;;  %v5270_v45 = vpack.c.bf16 %v2396_v7, %v2396_v7 }
 0x2f9   : > { %v6143_v37 = vpop.eup %6142  ;;  %6164 = vrcp.f32 %v2153_v26  ;;  %v2151_v14 = vadd.f32 1.0, %v6141_v41  ;;  %v2399_v29 = vmul.f32 0.003921569, %v2335_v50  ;;  %v2091_v1 = vmul.f32 1.442695, %v1967_v21 }
 0x2fa   : > { %v6145_v51 = vpop.eup %6144  ;;  %v7144_v61 = vmul.f32 0.003921569, %v2338_v24  ;;  %v2336_v23 = vfloor.f32 %v2272_v39  ;;  %v2154_v46 = vadd.f32 1.0, %v6143_v37  ;;  %5783 = vmatprep.mubr.msk.bf16.mxu1 %vm2452_vm6, %v2439_v32  ;;  %v1970_v25 = vsub.f32 0.0, %v5740_v34  ;;  %4357 = vst.msk [vmem:[%s6871_s29 + $0xa4] sm:$0xf] %vm4315_vm5, %v5270_v45 }
 0x2fb   : > { %v6147_v11 = vpop.eup %6146  ;;  %v2277_v47 = vmul.f32 255.0, %v6145_v51  ;;  %6166 = vrcp.f32 %v2151_v14  ;;  %v5273_v15 = vpack.c.bf16 %v2399_v29, %v2399_v29  ;;  %v1968_v12 = vsub.f32 0.0, %v1895_v6 }
 0x2fc   : > { %v6149_v7 = vpop.eup %6148  ;;  %6168 = vrcp.f32 %v2154_v46  ;;  %v2152_v16 = vadd.f32 1.0, %v6147_v11  ;;  %v2400_v21 = vmul.f32 0.003921569, %v2336_v23  ;;  %v2442_v50 = vpack.c.bf16 %v7144_v61, %v7142_v20 }
 0x2fd   : > { %v6151_v26 = vpop.eup %6150  ;;  %v2341_v41 = vfloor.f32 %v2277_v47  ;;  %v2157_v24 = vadd.f32 1.0, %v6149_v7  ;;  %6170 = vpow2.f32 %v2091_v1  ;;  %v2097_v34 = vmul.f32 1.442695, %v1970_v25  ;;  %4360 = vst.msk [vmem:[%s6871_s29 + $0xb0] sm:$0xf] %vm4315_vm5, %v5273_v15  ;;  %5784 = vmatmul.mubr.msk.bf16.gmra.mxu1 %vm2452_vm6, %v2440_v2 }
 0x2fe   : > { %v6153_v39 = vpop.eup %6152  ;;  %6172 = vrcp.f32 %v2152_v16  ;;  %v2441_v51 = vpack.c.bf16 %v2400_v21, %v2399_v29  ;;  %v5274_v32 = vpack.c.bf16 %v2400_v21, %v2400_v21  ;;  %v2155_v46 = vadd.f32 1.0, %v6151_v26 }
 0x2ff   : > { %v6155_v45 = vpop.eup %6154  ;;  %v7154_v6 = vmul.f32 0.003921569, %v2341_v41  ;;  %v2275_v37 = vmul.f32 255.0, %v6153_v39  ;;  %6174 = vrcp.f32 %v2157_v24  ;;  %v2093_v14 = vmul.f32 1.442695, %v1968_v12 }
 0x300   : > { %v6157_v1 = vpop.eup %6156  ;;  %5787 = vmatprep.mubr.msk.bf16.mxu1 %vm2452_vm6, %v2441_v51  ;;  %6176 = vrcp.f32 %v2155_v46  ;;  %v2158_v23 = vadd.f32 1.0, %v6155_v45  ;;  %4361 = vst.msk [vmem:[%s6871_s29 + $0xb4] sm:$0xf] %vm4315_vm5, %v5274_v32  ;;  %v5232_v2 = vpack.c.bf16 %v6877_v58, %v6877_v58  ;;  %v5247_v29 = vpack.c.bf16 %v6939_v62, %v6939_v62 }
 0x301   : > { %v2339_v25 = vfloor.f32 %v2275_v37  ;;  %v2278_v11 = vmul.f32 255.0, %v6157_v1  ;;  %6178 = vpow2.f32 %v2097_v34  ;;  %v5248_v47 = vpack.c.bf16 %v6955_v55, %v6955_v55 }
 0x302   : > { %v6159_v15 = vpop.eup %6158  ;;  %6180 = vrcp.f32 %v2158_v23  ;;  %4319 = vst.msk [vmem:[%s6871_s29 + $0xc] sm:$0xf] %vm4315_vm5, %v5232_v2  ;;  %4334 = vst.msk [vmem:[%s6871_s29 + $0x48] sm:$0xf] %vm4315_vm5, %v5247_v29  ;;  %v5251_v58 = vpack.c.bf16 %v6974_v0, %v6974_v0  ;;  %v5252_v62 = vpack.c.bf16 %v6987_v30, %v6987_v30  ;;  %v5255_v12 = vpack.c.bf16 %v7010_v38, %v7010_v38 }
 0x303   : > { %v6161_v7 = vpop.eup %6160  ;;  %v2342_v55 = vfloor.f32 %v2278_v11  ;;  %v2156_v16 = vadd.f32 1.0, %v6159_v15  ;;  %v2403_v21 = vmul.f32 0.003921569, %v2339_v25  ;;  %6182 = vpow2.f32 %v2093_v14  ;;  %4335 = vst.msk [vmem:[%s6871_s29 + $0x4c] sm:$0xf] %vm4315_vm5, %v5248_v47 }
 0x304   : > { %v6163_v26 = vpop.eup %6162  ;;  %v2276_v41 = vmul.f32 255.0, %v6161_v7  ;;  %4338 = vst.msk [vmem:[%s6871_s29 + $0x58] sm:$0xf] %vm4315_vm5, %v5251_v58  ;;  %4339 = vst.msk [vmem:[%s6871_s29 + $0x5c] sm:$0xf] %vm4315_vm5, %v5252_v62  ;;  %v5256_v0 = vpack.c.bf16 %v7018_v4, %v7018_v4  ;;  %v5259_v30 = vpack.c.bf16 %v7034_v54, %v7034_v54  ;;  %v5260_v38 = vpack.c.bf16 %v7059_v53, %v7059_v53 }
 0x305   : > { %4342 = vst.msk [vmem:[%s6871_s29 + $0x68] sm:$0xf] %vm4315_vm5, %v5255_v12  ;;  %v2406_v24 = vmul.f32 0.003921569, %v2342_v55  ;;  %6184 = vrcp.f32 %v2156_v16  ;;  %v2161_v34 = vadd.f32 1.0, %v6163_v26  ;;  %v5277_v39 = vpack.c.bf16 %v2403_v21, %v2403_v21  ;;  %5788 = vmatmul.mubr.msk.bf16.gmra.mxu1 %vm2452_vm6, %v2442_v50 }
 0x306   : > { %v6165_v51 = vpop.eup %6164  ;;  %v2340_v32 = vfloor.f32 %v2276_v41  ;;  %4343 = vst.msk [vmem:[%s6871_s29 + $0x6c] sm:$0xf] %vm4315_vm5, %v5256_v0  ;;  %4346 = vst.msk [vmem:[%s6871_s29 + $0x78] sm:$0xf] %vm4315_vm5, %v5259_v30  ;;  %v5263_v4 = vpack.c.bf16 %v7079_v18, %v7079_v18  ;;  %v5264_v54 = vpack.c.bf16 %v7099_v9, %v7099_v9  ;;  %v5267_v53 = vpack.c.bf16 %v7103_v60, %v7103_v60 }
 0x307   : > { %4347 = vst.msk [vmem:[%s6871_s29 + $0x7c] sm:$0xf] %vm4315_vm5, %v5260_v38  ;;  %v2281_v46 = vmul.f32 255.0, %v6165_v51  ;;  %6186 = vrcp.f32 %v2161_v34  ;;  %v2444_v50 = vpack.c.bf16 %v2406_v24, %v7154_v6  ;;  %4364 = vst.msk [vmem:[%s6871_s29 + $0xc0] sm:$0xf] %vm4315_vm5, %v5277_v39  ;;  %v5268_v45 = vpack.c.bf16 %v7124_v10, %v7124_v10 }
 0x308   : > { %v6167_v37 = vpop.eup %6166  ;;  %v2404_v14 = vmul.f32 0.003921569, %v2340_v32  ;;  %4350 = vst.msk [vmem:[%s6871_s29 + $0x88] sm:$0xf] %vm4315_vm5, %v5263_v4  ;;  %4351 = vst.msk [vmem:[%s6871_s29 + $0x8c] sm:$0xf] %vm4315_vm5, %v5264_v54  ;;  %v5271_v60 = vpack.c.bf16 %v7128_v36, %v7128_v36  ;;  %v5272_v18 = vpack.c.bf16 %v7135_v28, %v7135_v28  ;;  %v5275_v9 = vpack.c.bf16 %v7142_v20, %v7142_v20 }
 0x309   : > { %4354 = vst.msk [vmem:[%s6871_s29 + $0x98] sm:$0xf] %vm4315_vm5, %v5267_v53  ;;  %v6169_v10 = vpop.eup %6168  ;;  %v2345_v1 = vfloor.f32 %v2281_v46  ;;  %v2279_v23 = vmul.f32 255.0, %v6167_v37  ;;  %4355 = vst.msk [vmem:[%s6871_s29 + $0x9c] sm:$0xf] %vm4315_vm5, %v5268_v45  ;;  %v5276_v2 = vpack.c.bf16 %v7144_v61, %v7144_v61  ;;  %v5279_v29 = vpack.c.bf16 %v7154_v6, %v7154_v6 }
 0x30a   : > { %v6171_v36 = vpop.eup %6170  ;;  %v2282_v25 = vmul.f32 255.0, %v6169_v10  ;;  %v2443_v11 = vpack.c.bf16 %v2404_v14, %v2403_v21  ;;  %v5278_v28 = vpack.c.bf16 %v2404_v14, %v2404_v14  ;;  %4358 = vst.msk [vmem:[%s6871_s29 + $0xa8] sm:$0xf] %vm4315_vm5, %v5271_v60  ;;  %4359 = vst.msk [vmem:[%s6871_s29 + $0xac] sm:$0xf] %vm4315_vm5, %v5272_v18  ;;  %v5280_v20 = vpack.c.bf16 %v2406_v24, %v2406_v24 }
 0x30b   : > { %4362 = vst.msk [vmem:[%s6871_s29 + $0xb8] sm:$0xf] %vm4315_vm5, %v5275_v9  ;;  %v6173_v47 = vpop.eup %6172  ;;  %v2409_v15 = vmul.f32 0.003921569, %v2345_v1  ;;  %v2343_v58 = vfloor.f32 %v2279_v23  ;;  %v2159_v61 = vadd.f32 1.0, %v6171_v36 }
 0x30c   : > { %4363 = vst.msk [vmem:[%s6871_s29 + $0xbc] sm:$0xf] %vm4315_vm5, %v5276_v2  ;;  %4366 = vst.msk [vmem:[%s6871_s29 + $0xc8] sm:$0xf] %vm4315_vm5, %v5279_v29  ;;  %v6175_v6 = vpop.eup %6174  ;;  %v2346_v62 = vfloor.f32 %v2282_v25  ;;  %v2280_v12 = vmul.f32 255.0, %v6173_v47  ;;  %5791 = vmatprep.mubr.msk.bf16.mxu1 %vm2452_vm6, %v2443_v11 }
 0x30d   : > { %4365 = vst.msk [vmem:[%s6871_s29 + $0xc4] sm:$0xf] %vm4315_vm5, %v5278_v28  ;;  %4367 = vst.msk [vmem:[%s6871_s29 + $0xcc] sm:$0xf] %vm4315_vm5, %v5280_v20  ;;  %v6177_v7 = vpop.eup %6176  ;;  %v2285_v55 = vmul.f32 255.0, %v6175_v6  ;;  %6188 = vrcp.f32 %v2159_v61  ;;  %v5283_v21 = vpack.c.bf16 %v2409_v15, %v2409_v15  ;;  %5792 = vmatmul.mubr.msk.bf16.gmra.mxu1 %vm2452_vm6, %v2444_v50 }
 0x30e   : > { %v2407_v16 = vmul.f32 0.003921569, %v2343_v58  ;;  %v6179_v26 = vpop.eup %6178  ;;  %v2410_v41 = vmul.f32 0.003921569, %v2346_v62  ;;  %v2344_v0 = vfloor.f32 %v2280_v12  ;;  %v2283_v30 = vmul.f32 255.0, %v6177_v7 }
 0x30f   : > { %v6181_v38 = vpop.eup %6180  ;;  %v2349_v24 = vfloor.f32 %v2285_v55  ;;  %v2162_v34 = vadd.f32 1.0, %v6179_v26  ;;  %4370 = vst.msk [vmem:[%s6871_s29 + $0xd8] sm:$0xf] %vm4315_vm5, %v5283_v21 }
 0x310   : > { %v5281_v39 = vpack.c.bf16 %v2407_v16, %v2407_v16  ;;  %v6183_v51 = vpop.eup %6182  ;;  %v2347_v32 = vfloor.f32 %v2283_v30  ;;  %v2286_v4 = vmul.f32 255.0, %v6181_v38  ;;  %v2408_v54 = vmul.f32 0.003921569, %v2344_v0 }
 0x311   : > { %v2446_v53 = vpack.c.bf16 %v2410_v41, %v2409_v15  ;;  %v2413_v46 = vmul.f32 0.003921569, %v2349_v24  ;;  %6190 = vrcp.f32 %v2162_v34  ;;  %v2160_v45 = vadd.f32 1.0, %v6183_v51 }
 0x312   : > { %4368 = vst.msk [vmem:[%s6871_s29 + $0xd0] sm:$0xf] %vm4315_vm5, %v5281_v39  ;;  %v5284_v37 = vpack.c.bf16 %v2410_v41, %v2410_v41  ;;  %v6185_v50 = vpop.eup %6184  ;;  %v2350_v14 = vfloor.f32 %v2286_v4  ;;  %v2445_v60 = vpack.c.bf16 %v2408_v54, %v2407_v16  ;;  %v5282_v18 = vpack.c.bf16 %v2408_v54, %v2408_v54 }
 0x313   : > { %v2411_v9 = vmul.f32 0.003921569, %v2347_v32  ;;  %v2284_v10 = vmul.f32 255.0, %v6185_v50  ;;  %6192 = vrcp.f32 %v2160_v45  ;;  %v5287_v1 = vpack.c.bf16 %v2413_v46, %v2413_v46 }
 0x314   : > { %4371 = vst.msk [vmem:[%s6871_s29 + $0xdc] sm:$0xf] %vm4315_vm5, %v5284_v37  ;;  %v6187_v23 = vpop.eup %6186  ;;  %v2414_v2 = vmul.f32 0.003921569, %v2350_v14  ;;  %5795 = vmatprep.mubr.msk.bf16.mxu1 %vm2452_vm6, %v2445_v60  ;;  %4369 = vst.msk [vmem:[%s6871_s29 + $0xd4] sm:$0xf] %vm4315_vm5, %v5282_v18 }
 0x315   : > { %v5285_v29 = vpack.c.bf16 %v2411_v9, %v2411_v9  ;;  %v2348_v36 = vfloor.f32 %v2284_v10  ;;  %4374 = vst.msk [vmem:[%s6871_s29 + $0xe8] sm:$0xf] %vm4315_vm5, %v5287_v1  ;;  %5796 = vmatmul.mubr.msk.bf16.gmra.mxu1 %vm2452_vm6, %v2446_v53  ;;  %v2289_v11 = vmul.f32 255.0, %v6187_v23 }
 0x316   : > { %v5288_v25 = vpack.c.bf16 %v2414_v2, %v2414_v2  ;;  %v2448_v58 = vpack.c.bf16 %v2414_v2, %v2413_v46 }
 0x317   : > { %4372 = vst.msk [vmem:[%s6871_s29 + $0xe0] sm:$0xf] %vm4315_vm5, %v5285_v29  ;;  %v2412_v28 = vmul.f32 0.003921569, %v2348_v36  ;;  %v2353_v61 = vfloor.f32 %v2289_v11 }
 0x318   : > { %4375 = vst.msk [vmem:[%s6871_s29 + $0xec] sm:$0xf] %vm4315_vm5, %v5288_v25 }
 0x319   : > { %v2447_v20 = vpack.c.bf16 %v2412_v28, %v2411_v9  ;;  %v5286_v47 = vpack.c.bf16 %v2412_v28, %v2412_v28  ;;  %v2417_v7 = vmul.f32 0.003921569, %v2353_v61 }
 0x31a   : > { %v6189_v15 = vpop.eup %6188 }
 0x31b   : > { %v2287_v6 = vmul.f32 255.0, %v6189_v15  ;;  %5799 = vmatprep.mubr.msk.bf16.mxu1 %vm2452_vm6, %v2447_v20  ;;  %4373 = vst.msk [vmem:[%s6871_s29 + $0xe4] sm:$0xf] %vm4315_vm5, %v5286_v47  ;;  %v5291_v30 = vpack.c.bf16 %v2417_v7, %v2417_v7 }
 0x31d   : > { %v2351_v62 = vfloor.f32 %v2287_v6  ;;  %5800 = vmatmul.mubr.msk.bf16.gmra.mxu1 %vm2452_vm6, %v2448_v58  ;;  %4378 = vst.msk [vmem:[%s6871_s29 + $0xf8] sm:$0xf] %vm4315_vm5, %v5291_v30 }
 0x31e   : > { %v6191_v12 = vpop.eup %6190 }
 0x31f   : > { %v2290_v55 = vmul.f32 255.0, %v6191_v12  ;;  %v2415_v16 = vmul.f32 0.003921569, %v2351_v62  ;;  %v5934_v12 = vld [vmem:[%s7675_s5 + $0x18] sm:$0xff]  }
 0x320   : > { %v6193_v21 = vpop.eup %6192  ;;  %5807 = vmatprep.subr.bf16.mxu0 %v5934_v12 }
 0x321   : > { %v2354_v26 = vfloor.f32 %v2290_v55  ;;  %v2288_v41 = vmul.f32 255.0, %v6193_v21  ;;  %v5289_v0 = vpack.c.bf16 %v2415_v16, %v2415_v16  ;;  %5808 = vmatpush3.bf16.msra.mxu0 %v5934_v12 }
 0x323   : > { %v2418_v38 = vmul.f32 0.003921569, %v2354_v26  ;;  %v2352_v24 = vfloor.f32 %v2288_v41  ;;  %4376 = vst.msk [vmem:[%s6871_s29 + $0xf0] sm:$0xf] %vm4315_vm5, %v5289_v0 }
 0x325   : > { %v2416_v34 = vmul.f32 0.003921569, %v2352_v24  ;;  %v5292_v39 = vpack.c.bf16 %v2418_v38, %v2418_v38  ;;  %v2450_v51 = vpack.c.bf16 %v2418_v38, %v2417_v7 }
 0x327   : > { %v2449_v32 = vpack.c.bf16 %v2416_v34, %v2415_v16  ;;  %v5290_v4 = vpack.c.bf16 %v2416_v34, %v2416_v34  ;;  %4379 = vst.msk [vmem:[%s6871_s29 + $0xfc] sm:$0xf] %vm4315_vm5, %v5292_v39 }
 0x329   : > { %5803 = vmatprep.mubr.msk.bf16.mxu1 %vm2452_vm6, %v2449_v32  ;;  %4377 = vst.msk [vmem:[%s6871_s29 + $0xf4] sm:$0xf] %vm4315_vm5, %v5290_v4 }
 0x32a   : > { %5804 = vmatmul.mubr.msk.bf16.gmra.mxu1 %vm2452_vm6, %v2450_v51 }
 0x35f   : > { %v5745_v54 = vpop.f32.mrf.mxu1 }
 0x360   : > { %2910 = vrot.lane.b32.xlu1 %v5745_v54, %s6459_s25 }
 0x361   : > { %v2587_v53 = vpop.f32.mrf.mxu1 }
 0x362   : > { %2906 = vrot.lane.b32.xlu0 %v2587_v53, %s6459_s25  ;;  %v5935_v53 = vld [vmem:[%s7675_s5 + $0x10] sm:$0xff]  }
 0x363   : > { %v5746_v46 = vpop.f32.mrf.mxu1  ;;  %5809 = vmatprep.subr.bf16.mxu0 %v5935_v53 }
 0x364   : > { %2912 = vrot.lane.b32.xlu1 %v5746_v46, %s6459_s25  ;;  %5810 = vmatpush3.bf16.msra.mxu0 %v5935_v53 }
 0x365   : > { %v2590_v45 = vpop.f32.mrf.mxu1 }
 0x366   : > { %2908 = vrot.lane.b32.xlu0 %v2590_v45, %s6459_s25 }
 0x36e   : > { %v5749_v37 = vpop.f32.mrf.mxu1 }
 0x36f   : > { %2918 = vrot.lane.b32.xlu0 %v5749_v37, %s6459_s25 }
 0x370   : > { %v2603_v50 = vpop.f32.mrf.mxu1 }
 0x372   : > { %v5750_v14 = vpop.f32.mrf.mxu1 }
 0x373   : > { %2920 = vrot.lane.b32.xlu1 %v5750_v14, %s6459_s25  ;;  %2914 = vrot.lane.b32.xlu0 %v2603_v50, %s6459_s25  ;;  %v5936_v14 = vld [vmem:[%s7675_s5 + $0x8] sm:$0xff]  }
 0x374   : > { %v2606_v60 = vpop.f32.mrf.mxu1  ;;  %5811 = vmatprep.subr.bf16.mxu0 %v5936_v14 }
 0x375   : > { %5812 = vmatpush3.bf16.msra.mxu0 %v5936_v14 }
 0x377   : > { %2916 = vrot.lane.b32.xlu1 %v2606_v60, %s6459_s25  ;;  %v5937_v60 = vld [vmem:[%s7675_s5] sm:$0xff]  }
 0x378   : > { %5813 = vmatprep.subr.bf16.mxu0 %v5937_v60 }
 0x379   : > { %5814 = vmatpush3.bf16.msra.mxu0 %v5937_v60 }
 0x37a   : > { %v5753_v18 = vpop.f32.mrf.mxu1 }
 0x37b   : > { %2926 = vrot.lane.b32.xlu0 %v5753_v18, %s6459_s25 }
 0x37c   : > { %v2619_v9 = vpop.f32.mrf.mxu1 }
 0x37e   : > { %v5754_v10 = vpop.f32.mrf.mxu1 }
 0x37f   : > { %2928 = vrot.lane.b32.xlu1 %v5754_v10, %s6459_s25  ;;  %2922 = vrot.lane.b32.xlu0 %v2619_v9, %s6459_s25 }
 0x380   : > { %v2622_v1 = vpop.f32.mrf.mxu1 }
 0x383   : > { %2924 = vrot.lane.b32.xlu1 %v2622_v1, %s6459_s25 }
 0x385   : > { %v5757_v23 = vpop.f32.mrf.mxu1 }
 0x386   : > { %2934 = vrot.lane.b32.xlu0 %v5757_v23, %s6459_s25 }
 0x387   : > { %v2635_v2 = vpop.f32.mrf.mxu1 }
 0x389   : > { %v5758_v29 = vpop.f32.mrf.mxu1 }
 0x38a   : > { %2936 = vrot.lane.b32.xlu1 %v5758_v29, %s6459_s25  ;;  %2930 = vrot.lane.b32.xlu0 %v2635_v2, %s6459_s25 }
 0x38b   : > { %v2638_v36 = vpop.f32.mrf.mxu1 }
 0x38d   : > { %v5761_v25 = vpop.f32.mrf.mxu1 }
 0x38e   : > { %2932 = vrot.lane.b32.xlu1 %v2638_v36, %s6459_s25  ;;  %2942 = vrot.lane.b32.xlu0 %v5761_v25, %s6459_s25 }
 0x38f   : > { %v2651_v11 = vpop.f32.mrf.mxu1 }
 0x391   : > { %v5762_v28 = vpop.f32.mrf.mxu1 }
 0x392   : > { %2944 = vrot.lane.b32.xlu1 %v5762_v28, %s6459_s25  ;;  %2938 = vrot.lane.b32.xlu0 %v2651_v11, %s6459_s25 }
 0x393   : > { %v2654_v20 = vpop.f32.mrf.mxu1 }
 0x395   : > { %v5765_v47 = vpop.f32.mrf.mxu1 }
 0x396   : > { %2940 = vrot.lane.b32.xlu1 %v2654_v20, %s6459_s25  ;;  %2950 = vrot.lane.b32.xlu0 %v5765_v47, %s6459_s25 }
 0x397   : > { %v2667_v15 = vpop.f32.mrf.mxu1 }
 0x399   : > { %v5766_v58 = vpop.f32.mrf.mxu1 }
 0x39a   : > { %2952 = vrot.lane.b32.xlu1 %v5766_v58, %s6459_s25  ;;  %2946 = vrot.lane.b32.xlu0 %v2667_v15, %s6459_s25 }
 0x39b   : > { %v2670_v61 = vpop.f32.mrf.mxu1 }
 0x39d   : > { %v5769_v6 = vpop.f32.mrf.mxu1 }
 0x39e   : > { %2948 = vrot.lane.b32.xlu1 %v2670_v61, %s6459_s25  ;;  %2958 = vrot.lane.b32.xlu0 %v5769_v6, %s6459_s25 }
 0x39f   : > { %v2683_v62 = vpop.f32.mrf.mxu1 }
 0x3a1   : > { %v5770_v7 = vpop.f32.mrf.mxu1 }
 0x3a2   : > { %2960 = vrot.lane.b32.xlu1 %v5770_v7, %s6459_s25  ;;  %2954 = vrot.lane.b32.xlu0 %v2683_v62, %s6459_s25 }
 0x3a3   : > { %v2686_v55 = vpop.f32.mrf.mxu1 }
 0x3a5   : > { %v5773_v16 = vpop.f32.mrf.mxu1 }
 0x3a6   : > { %2956 = vrot.lane.b32.xlu1 %v2686_v55, %s6459_s25  ;;  %2966 = vrot.lane.b32.xlu0 %v5773_v16, %s6459_s25 }
 0x3a7   : > { %v2699_v21 = vpop.f32.mrf.mxu1 }
 0x3a9   : > { %v5774_v26 = vpop.f32.mrf.mxu1 }
 0x3aa   : > { %2968 = vrot.lane.b32.xlu1 %v5774_v26, %s6459_s25  ;;  %2962 = vrot.lane.b32.xlu0 %v2699_v21, %s6459_s25 }
 0x3ab   : > { %v2702_v41 = vpop.f32.mrf.mxu1 }
 0x3ad   : > { %v5777_v0 = vpop.f32.mrf.mxu1 }
 0x3ae   : > { %2964 = vrot.lane.b32.xlu1 %v2702_v41, %s6459_s25 }
 0x3af   : > { %v2715_v30 = vpop.f32.mrf.mxu1 }
 0x3b0   : > { %2970 = vrot.lane.b32.xlu0 %v2715_v30, %s6459_s25 }
 0x3b1   : > { %v5778_v38 = vpop.f32.mrf.mxu1 }
 0x3b2   : > { %2974 = vrot.lane.b32.xlu1 %v5777_v0, %s6459_s25 }
 0x3b3   : > { %v2718_v24 = vpop.f32.mrf.mxu1 }
 0x3b4   : > { %2976 = vrot.lane.b32.xlu0 %v5778_v38, %s6459_s25 }
 0x3b5   : > { %v5781_v34 = vpop.f32.mrf.mxu1 }
 0x3b6   : > { %2972 = vrot.lane.b32.xlu1 %v2718_v24, %s6459_s25 }
 0x3b7   : > { %v2731_v39 = vpop.f32.mrf.mxu1 }
 0x3b8   : > { %2978 = vrot.lane.b32.xlu0 %v2731_v39, %s6459_s25 }
 0x3b9   : > { %v5782_v51 = vpop.f32.mrf.mxu1 }
 0x3ba   : > { %2982 = vrot.lane.b32.xlu1 %v5781_v34, %s6459_s25 }
 0x3bb   : > { %v2734_v32 = vpop.f32.mrf.mxu1 }
 0x3bc   : > { %2984 = vrot.lane.b32.xlu0 %v5782_v51, %s6459_s25 }
 0x3bd   : > { %v5785_v4 = vpop.f32.mrf.mxu1 }
 0x3be   : > { %2980 = vrot.lane.b32.xlu1 %v2734_v32, %s6459_s25 }
 0x3bf   : > { %v2747_v54 = vpop.f32.mrf.mxu1 }
 0x3c0   : > { %2986 = vrot.lane.b32.xlu0 %v2747_v54, %s6459_s25 }
 0x3c1   : > { %v5786_v46 = vpop.f32.mrf.mxu1 }
 0x3c2   : > { %2990 = vrot.lane.b32.xlu1 %v5785_v4, %s6459_s25 }
 0x3c3   : > { %v2750_v45 = vpop.f32.mrf.mxu1 }
 0x3c4   : > { %2992 = vrot.lane.b32.xlu0 %v5786_v46, %s6459_s25 }
 0x3c5   : > { %v5789_v37 = vpop.f32.mrf.mxu1 }
 0x3c6   : > { %2988 = vrot.lane.b32.xlu1 %v2750_v45, %s6459_s25 }
 0x3c7   : > { %v2763_v50 = vpop.f32.mrf.mxu1 }
 0x3c8   : > { %2994 = vrot.lane.b32.xlu0 %v2763_v50, %s6459_s25 }
 0x3c9   : > { %v5790_v18 = vpop.f32.mrf.mxu1 }
 0x3ca   : > { %2998 = vrot.lane.b32.xlu1 %v5789_v37, %s6459_s25 }
 0x3cb   : > { %v2766_v9 = vpop.f32.mrf.mxu1 }
 0x3cc   : > { %3000 = vrot.lane.b32.xlu0 %v5790_v18, %s6459_s25 }
 0x3cd   : > { %v5793_v1 = vpop.f32.mrf.mxu1 }
 0x3ce   : > { %2996 = vrot.lane.b32.xlu1 %v2766_v9, %s6459_s25 }
 0x3cf   : > { %v2779_v11 = vpop.f32.mrf.mxu1 }
 0x3d1   : > { %v5794_v62 = vpop.f32.mrf.mxu1 }
 0x3d2   : > { %v2911_v10 = vpop.permute.xlu1 %2910 }
 0x3d3   : > { %v3100_v2 = vadd.f32 %v6596_v42, %v2911_v10  ;;  %v2782_v42 = vpop.f32.mrf.mxu1 }
 0x3d4   : > { %v2907_v23 = vpop.permute.xlu0 %2906 }
 0x3d5   : > { %v3098_v36 = vadd.f32 %v2907_v23, %v6598_v43  ;;  %v3164_v20 = vmax.f32 %v3100_v2, 0.0  ;;  %v5797_v34 = vpop.f32.mrf.mxu1 }
 0x3d6   : > { %v2913_v29 = vpop.permute.xlu1 %2912 }
 0x3d7   : > { %v3101_v25 = vadd.f32 %v6600_v44, %v2913_v29  ;;  %v3162_v58 = vmax.f32 %v3098_v36, 0.0 }
 0x3d8   : > { %v2909_v28 = vpop.permute.xlu0 %2908 }
 0x3d9   : > { %v3165_v47 = vmax.f32 %v3101_v25, 0.0  ;;  %v3099_v15 = vadd.f32 %v2909_v28, %v6609_v48 }
 0x3db   : > { %v3163_v61 = vmax.f32 %v3099_v15, 0.0  ;;  %v3227_v6 = vpack.c.bf16 %v3165_v47, %v3164_v20 }
 0x3dd   : > { %3300 = vrot.lane.b32.xlu1 %v3227_v6, %s6459_s25  ;;  %v3226_v12 = vpack.c.bf16 %v3163_v61, %v3162_v58 }
 0x3df   : > { %3298 = vrot.lane.b32.xlu0 %v3226_v12, %s6459_s25 }
 0x3e1   : > { %v2919_v7 = vpop.permute.xlu0 %2918  ;;  %3004 = vrot.lane.b32.xlu1 %v2782_v42, %s6459_s25 }
 0x3e2   : > { %v3104_v43 = vadd.f32 %v6614_v52, %v2919_v7 }
 0x3e3   : > { %3002 = vrot.lane.b32.xlu0 %v2779_v11, %s6459_s25 }
 0x3e4   : > { %v3168_v48 = vmax.f32 %v3104_v43, 0.0 }
 0x3e5   : > { %v2921_v44 = vpop.permute.xlu1 %2920  ;;  %v2915_v55 = vpop.permute.xlu0 %2914  ;;  %3006 = vrot.lane.b32.xlu1 %v5793_v1, %s6459_s25 }
 0x3e6   : > { %v3105_v16 = vadd.f32 %v6622_v57, %v2921_v44  ;;  %v3102_v26 = vadd.f32 %v2915_v55, %v6619_v56  ;;  %v2795_v56 = vpop.f32.mrf.mxu1 }
 0x3e8   : > { %v3169_v21 = vmax.f32 %v3105_v16, 0.0  ;;  %v3166_v38 = vmax.f32 %v3102_v26, 0.0  ;;  %v5798_v45 = vpop.f32.mrf.mxu1 }
 0x3e9   : > { %v2917_v41 = vpop.permute.xlu1 %2916 }
 0x3ea   : > { %v3103_v0 = vadd.f32 %v2917_v41, %v6626_v59  ;;  %v3229_v30 = vpack.c.bf16 %v3169_v21, %v3168_v48  ;;  %v2798_v18 = vpop.f32.mrf.mxu1  ;;  %v7776_v41 = vld [vmem:[#allocation13_spill] sm:$0xff] }
 0x3ec   : > { %v3167_v52 = vmax.f32 %v3103_v0, 0.0  ;;  %3304 = vrot.lane.b32.xlu1 %v3229_v30, %s6459_s25 }
 0x3ed   : > { %v2927_v24 = vpop.permute.xlu0 %2926 }
 0x3ee   : > { %v3228_v39 = vpack.c.bf16 %v3167_v52, %v3166_v38  ;;  %v3108_v57 = vadd.f32 %v6631_v63, %v2927_v24  ;;  %v7777_v52 = vld [vmem:[#allocation15_spill] sm:$0xff] }
 0x3f0   : > { %3302 = vrot.lane.b32.xlu0 %v3228_v39, %s6459_s25  ;;  %v3172_v54 = vmax.f32 %v3108_v57, 0.0 }
 0x3f1   : > { %v2929_v51 = vpop.permute.xlu1 %2928  ;;  %v2923_v32 = vpop.permute.xlu0 %2922 }
 0x3f2   : > { %v3109_v4 = vadd.f32 %v6640_v5, %v2929_v51  ;;  %v3106_v59 = vadd.f32 %v2923_v32, %v6635_v3 }
 0x3f4   : > { %v3173_v53 = vmax.f32 %v3109_v4, 0.0  ;;  %3008 = vrot.lane.b32.xlu0 %v5794_v62, %s6459_s25  ;;  %v3170_v63 = vmax.f32 %v3106_v59, 0.0  ;;  %v7779_v4 = vld [vmem:[#allocation20_spill] sm:$0xff] }
 0x3f5   : > { %v2925_v46 = vpop.permute.xlu1 %2924 }
 0x3f6   : > { %v3107_v37 = vadd.f32 %v2925_v46, %v6646_v8  ;;  %v3231_v50 = vpack.c.bf16 %v3173_v53, %v3172_v54 }
 0x3f8   : > { %v2935_v14 = vpop.permute.xlu0 %2934  ;;  %v3171_v60 = vmax.f32 %v3107_v37, 0.0  ;;  %3308 = vrot.lane.b32.xlu1 %v3231_v50, %s6459_s25  ;;  %v7780_v50 = vld [vmem:[#allocation18_spill] sm:$0xff] }
 0x3f9   : > { %v3112_v1 = vadd.f32 %v6653_v13, %v2935_v14 }
 0x3fa   : > { %v3230_v9 = vpack.c.bf16 %v3171_v60, %v3170_v63 }
 0x3fb   : > { %v3176_v29 = vmax.f32 %v3112_v1, 0.0 }
 0x3fc   : > { %v2937_v10 = vpop.permute.xlu1 %2936  ;;  %v2931_v5 = vpop.permute.xlu0 %2930  ;;  %3306 = vrot.lane.b32.xlu0 %v3230_v9, %s6459_s25  ;;  %3012 = vrot.lane.b32.xlu1 %v2798_v18, %s6459_s25  ;;  %v7781_v18 = vld [vmem:[#allocation21_spill] sm:$0xff] }
 0x3fd   : > { %v3113_v3 = vadd.f32 %v6662_v19, %v2937_v10  ;;  %v3110_v8 = vadd.f32 %v2931_v5, %v6657_v17  ;;  %v5801_v19 = vpop.f32.mrf.mxu1 }
 0x3ff   : > { %v3177_v23 = vmax.f32 %v3113_v3, 0.0  ;;  %v3174_v11 = vmax.f32 %v3110_v8, 0.0 }
 0x400   : > { %v2933_v2 = vpop.permute.xlu1 %2932  ;;  %3010 = vrot.lane.b32.xlu0 %v2795_v56, %s6459_s25  ;;  %3014 = vrot.lane.b32.xlu1 %v5797_v34, %s6459_s25  ;;  %v2943_v25 = vpop.permute.xlu0 %2942 }
 0x401   : > { %v3111_v36 = vadd.f32 %v2933_v2, %v6668_v22  ;;  %v3233_v28 = vpack.c.bf16 %v3177_v23, %v3176_v29  ;;  %v3116_v20 = vadd.f32 %v6675_v27, %v2943_v25  ;;  %v2811_v22 = vpop.f32.mrf.mxu1  ;;  %v7782_v2 = vld [vmem:[#allocation26_spill] sm:$0xff] }
 0x403   : > { %v3175_v13 = vmax.f32 %v3111_v36, 0.0  ;;  %v3180_v61 = vmax.f32 %v3116_v20, 0.0  ;;  %v5802_v43 = vpop.f32.mrf.mxu1 }
 0x404   : > { %3312 = vrot.lane.b32.xlu1 %v3233_v28, %s6459_s25  ;;  %v2945_v15 = vpop.permute.xlu1 %2944  ;;  %v2939_v17 = vpop.permute.xlu0 %2938  ;;  %v7784_v28 = vld [vmem:[#allocation24_spill] sm:$0xff] }
 0x405   : > { %v3232_v47 = vpack.c.bf16 %v3175_v13, %v3174_v11  ;;  %v3117_v58 = vadd.f32 %v6684_v33, %v2945_v15  ;;  %v3114_v62 = vadd.f32 %v2939_v17, %v6679_v31  ;;  %v2814_v26 = vpop.f32.mrf.mxu1  ;;  %v7783_v11 = vld [vmem:[#allocation23_spill] sm:$0xff]  ;;  %v7785_v15 = vld [vmem:[#allocation28_spill] sm:$0xff] }
 0x407   : > { %3310 = vrot.lane.b32.xlu0 %v3232_v47, %s6459_s25  ;;  %v3181_v6 = vmax.f32 %v3117_v58, 0.0  ;;  %v3178_v44 = vmax.f32 %v3114_v62, 0.0  ;;  %v5805_v34 = vpop.f32.mrf.mxu1 }
 0x408   : > { %v2941_v12 = vpop.permute.xlu1 %2940  ;;  %v2951_v7 = vpop.permute.xlu0 %2950 }
 0x409   : > { %v3115_v42 = vadd.f32 %v2941_v12, %v6688_v35  ;;  %v3235_v27 = vpack.c.bf16 %v3181_v6, %v3180_v61  ;;  %v3120_v31 = vadd.f32 %v6695_v40, %v2951_v7  ;;  %v2827_v46 = vpop.f32.mrf.mxu1  ;;  %v7786_v12 = vld [vmem:[#allocation2_spill] sm:$0xff] }
 0x40b   : > { %3016 = vrot.lane.b32.xlu0 %v5798_v45, %s6459_s25  ;;  %v3179_v55 = vmax.f32 %v3115_v42, 0.0  ;;  %3316 = vrot.lane.b32.xlu1 %v3235_v27, %s6459_s25  ;;  %v3184_v39 = vmax.f32 %v3120_v31, 0.0  ;;  %v5806_v5 = vpop.f32.mrf.mxu1  ;;  %v7789_v31 = vld [vmem:[#allocation5_spill] sm:$0xff] }
 0x40c   : > { %v2953_v33 = vpop.permute.xlu1 %2952  ;;  %v2947_v16 = vpop.permute.xlu0 %2946 }
 0x40d   : > { %v3121_v48 = vadd.f32 %v6702_v49, %v2953_v33  ;;  %v3234_v21 = vpack.c.bf16 %v3179_v55, %v3178_v44  ;;  %v3118_v0 = vadd.f32 %v2947_v16, %v7776_v41  ;;  %v7778_v49 = vld [vmem:[#allocation17_spill] sm:$0xff]  ;;  %v2830_v25 = vpop.f32.mrf.mxu1  ;;  %v7787_v44 = vld [vmem:[#allocation3_spill] sm:$0xff]  ;;  %v7788_v33 = vld [vmem:[#allocation4_spill] sm:$0xff] }
 0x40f   : > { %3314 = vrot.lane.b32.xlu0 %v3234_v21, %s6459_s25  ;;  %3020 = vrot.lane.b32.xlu1 %v2814_v26, %s6459_s25  ;;  %v3185_v38 = vmax.f32 %v3121_v48, 0.0  ;;  %v3182_v57 = vmax.f32 %v3118_v0, 0.0 }
 0x410   : > { %v2949_v35 = vpop.permute.xlu1 %2948  ;;  %v2959_v30 = vpop.permute.xlu0 %2958 }
 0x411   : > { %v3119_v24 = vadd.f32 %v2949_v35, %v7777_v52  ;;  %v3124_v32 = vadd.f32 %v7778_v49, %v2959_v30  ;;  %v3237_v59 = vpack.c.bf16 %v3185_v38, %v3184_v39 }
 0x413   : > { %v3183_v51 = vmax.f32 %v3119_v24, 0.0  ;;  %3018 = vrot.lane.b32.xlu0 %v2811_v22, %s6459_s25  ;;  %3022 = vrot.lane.b32.xlu1 %v5801_v19, %s6459_s25  ;;  %v3188_v45 = vmax.f32 %v3124_v32, 0.0  ;;  %v7790_v24 = vld [vmem:[#allocation6_spill] sm:$0xff]  ;;  %v7792_v32 = vld [vmem:[#allocation8_spill] sm:$0xff] }
 0x414   : > { %v2961_v40 = vpop.permute.xlu1 %2960  ;;  %v2955_v56 = vpop.permute.xlu0 %2954 }
 0x415   : > { %v3125_v54 = vadd.f32 %v7779_v4, %v2961_v40  ;;  %v3236_v53 = vpack.c.bf16 %v3183_v51, %v3182_v57  ;;  %v3122_v14 = vadd.f32 %v2955_v56, %v7780_v50  ;;  %v7791_v51 = vld [vmem:[#allocation7_spill] sm:$0xff] }
 0x417   : > { %v3189_v37 = vmax.f32 %v3125_v54, 0.0  ;;  %3318 = vrot.lane.b32.xlu0 %v3236_v53, %s6459_s25  ;;  %3320 = vrot.lane.b32.xlu1 %v3237_v59, %s6459_s25  ;;  %v3186_v1 = vmax.f32 %v3122_v14, 0.0  ;;  %v7793_v53 = vld [vmem:[#allocation9_spill] sm:$0xff] }
 0x418   : > { %v2957_v63 = vpop.permute.xlu1 %2956  ;;  %v2967_v60 = vpop.permute.xlu0 %2966 }
 0x419   : > { %v3123_v9 = vadd.f32 %v2957_v63, %v7781_v18  ;;  %v3239_v10 = vpack.c.bf16 %v3189_v37, %v3188_v45  ;;  %v3128_v13 = vadd.f32 %v7783_v11, %v2967_v60  ;;  %v7794_v63 = vld [vmem:[#allocation10_spill] sm:$0xff] }
 0x41b   : > { %v3187_v3 = vmax.f32 %v3123_v9, 0.0  ;;  %3024 = vrot.lane.b32.xlu0 %v5802_v43, %s6459_s25  ;;  %3324 = vrot.lane.b32.xlu1 %v3239_v10, %s6459_s25  ;;  %v3192_v22 = vmax.f32 %v3128_v13, 0.0  ;;  %v7795_v10 = vld [vmem:[#allocation11_spill] sm:$0xff] }
 0x41c   : > { %v2969_v23 = vpop.permute.xlu1 %2968  ;;  %v2963_v8 = vpop.permute.xlu0 %2962 }
 0x41d   : > { %v3129_v29 = vadd.f32 %v7782_v2, %v2969_v23  ;;  %v3238_v36 = vpack.c.bf16 %v3187_v3, %v3186_v1  ;;  %v3126_v19 = vadd.f32 %v2963_v8, %v7784_v28  ;;  %v7796_v1 = vld [vmem:[#allocation12_spill] sm:$0xff] }
 0x41f   : > { %3322 = vrot.lane.b32.xlu0 %v3238_v36, %s6459_s25  ;;  %3028 = vrot.lane.b32.xlu1 %v2830_v25, %s6459_s25  ;;  %v3193_v47 = vmax.f32 %v3129_v29, 0.0  ;;  %v3190_v61 = vmax.f32 %v3126_v19, 0.0  ;;  %v7797_v29 = vld [vmem:[#allocation14_spill] sm:$0xff] }
 0x420   : > { %v2965_v20 = vpop.permute.xlu1 %2964 }
 0x421   : > { %v3127_v17 = vadd.f32 %v2965_v20, %v7785_v15  ;;  %v3241_v27 = vpack.c.bf16 %v3193_v47, %v3192_v22  ;;  %v7798_v20 = vld [vmem:[#allocation16_spill] sm:$0xff] }
 0x422   : > { %v2971_v58 = vpop.permute.xlu0 %2970 }
 0x423   : > { %v3191_v6 = vmax.f32 %v3127_v17, 0.0  ;;  %3026 = vrot.lane.b32.xlu0 %v2827_v46, %s6459_s25  ;;  %3030 = vrot.lane.b32.xlu1 %v5805_v34, %s6459_s25  ;;  %v3130_v55 = vadd.f32 %v2971_v58, %v7787_v44  ;;  %v7799_v58 = vld [vmem:[#allocation19_spill] sm:$0xff] }
 0x424   : > { %v2975_v62 = vpop.permute.xlu1 %2974 }
 0x425   : > { %v3132_v7 = vadd.f32 %v7786_v12, %v2975_v62  ;;  %v3240_v42 = vpack.c.bf16 %v3191_v6, %v3190_v61  ;;  %v3194_v35 = vmax.f32 %v3130_v55, 0.0  ;;  %v7800_v61 = vld [vmem:[#allocation22_spill] sm:$0xff] }
 0x426   : > { %v2977_v43 = vpop.permute.xlu0 %2976 }
 0x427   : > { %v3133_v16 = vadd.f32 %v7788_v33, %v2977_v43  ;;  %3326 = vrot.lane.b32.xlu0 %v3240_v42, %s6459_s25  ;;  %3328 = vrot.lane.b32.xlu1 %v3241_v27, %s6459_s25  ;;  %v3196_v21 = vmax.f32 %v3132_v7, 0.0  ;;  %v7801_v42 = vld [vmem:[#allocation25_spill] sm:$0xff] }
 0x428   : > { %v2973_v48 = vpop.permute.xlu1 %2972 }
 0x429   : > { %v3197_v26 = vmax.f32 %v3133_v16, 0.0  ;;  %v3131_v41 = vadd.f32 %v2973_v48, %v7789_v31 }
 0x42a   : > { %v2979_v0 = vpop.permute.xlu0 %2978 }
 0x42b   : > { %v3195_v30 = vmax.f32 %v3131_v41, 0.0  ;;  %3032 = vrot.lane.b32.xlu0 %v5806_v5, %s6459_s25  ;;  %v3243_v38 = vpack.c.bf16 %v3197_v26, %v3196_v21  ;;  %v3134_v49 = vadd.f32 %v2979_v0, %v7791_v51  ;;  %v7802_v26 = vld [vmem:[#allocation31_spill] sm:$0xff]  ;;  %v7803_v0 = vld [vmem:[#allocation29_spill] sm:$0xff] }
 0x42c   : > { %v2983_v52 = vpop.permute.xlu1 %2982 }
 0x42d   : > { %v3136_v34 = vadd.f32 %v7790_v24, %v2983_v52  ;;  %3332 = vrot.lane.b32.xlu1 %v3243_v38, %s6459_s25  ;;  %v3242_v39 = vpack.c.bf16 %v3195_v30, %v3194_v35  ;;  %v3198_v45 = vmax.f32 %v3134_v49, 0.0 }
 0x42e   : > { %v2985_v57 = vpop.permute.xlu0 %2984 }
 0x42f   : > { %v3137_v40 = vadd.f32 %v7792_v32, %v2985_v57  ;;  %3330 = vrot.lane.b32.xlu0 %v3242_v39, %s6459_s25  ;;  %v3200_v4 = vmax.f32 %v3136_v34, 0.0  ;;  %v7804_v57 = vld [vmem:[#allocation27_spill] sm:$0xff]  ;;  %v7805_v32 = vld [vmem:[#allocation30_spill] sm:$0xff] }
 0x430   : > { %v2981_v56 = vpop.permute.xlu1 %2980 }
 0x431   : > { %v3201_v54 = vmax.f32 %v3137_v40, 0.0  ;;  %v3135_v59 = vadd.f32 %v2981_v56, %v7793_v53 }
 0x432   : > { %v2987_v46 = vpop.permute.xlu0 %2986 }
 0x433   : > { %v3199_v37 = vmax.f32 %v3135_v59, 0.0  ;;  %v3245_v50 = vpack.c.bf16 %v3201_v54, %v3200_v4  ;;  %v3138_v5 = vadd.f32 %v2987_v46, %v7795_v10 }
 0x434   : > { %v2991_v14 = vpop.permute.xlu1 %2990 }
 0x435   : > { %v3140_v60 = vadd.f32 %v7794_v63, %v2991_v14  ;;  %3336 = vrot.lane.b32.xlu1 %v3245_v50, %s6459_s25  ;;  %v3244_v18 = vpack.c.bf16 %v3199_v37, %v3198_v45  ;;  %v3202_v11 = vmax.f32 %v3138_v5, 0.0  ;;  %v7806_v45 = vld [vmem:[#allocation35_spill] sm:$0xff]  ;;  %v7807_v63 = vld [vmem:[#allocation33_spill] sm:$0xff] }
 0x436   : > { %v2993_v9 = vpop.permute.xlu0 %2992 }
 0x437   : > { %v3141_v3 = vadd.f32 %v7796_v1, %v2993_v9  ;;  %3334 = vrot.lane.b32.xlu0 %v3244_v18, %s6459_s25  ;;  %v3204_v8 = vmax.f32 %v3140_v60, 0.0 }
 0x438   : > { %v2989_v23 = vpop.permute.xlu1 %2988 }
 0x439   : > { %v3205_v2 = vmax.f32 %v3141_v3, 0.0  ;;  %v3139_v36 = vadd.f32 %v2989_v23, %v7797_v29  ;;  %v7808_v3 = vld [vmem:[#allocation32_spill] sm:$0xff] }
 0x43a   : > { %v2995_v25 = vpop.permute.xlu0 %2994 }
 0x43b   : > { %v3203_v13 = vmax.f32 %v3139_v36, 0.0  ;;  %v3247_v28 = vpack.c.bf16 %v3205_v2, %v3204_v8  ;;  %v3142_v22 = vadd.f32 %v2995_v25, %v7799_v58  ;;  %v7809_v2 = vld [vmem:[#allocation34_spill] sm:$0xff]  ;;  %v7811_v58 = vld [vmem:[#allocation37_spill] sm:$0xff] }
 0x43c   : > { %v2999_v19 = vpop.permute.xlu1 %2998 }
 0x43d   : > { %v3144_v47 = vadd.f32 %v7798_v20, %v2999_v19  ;;  %3340 = vrot.lane.b32.xlu1 %v3247_v28, %s6459_s25  ;;  %v3246_v15 = vpack.c.bf16 %v3203_v13, %v3202_v11  ;;  %v3206_v43 = vmax.f32 %v3142_v22, 0.0  ;;  %v7810_v20 = vld [vmem:[#allocation39_spill] sm:$0xff] }
 0x43e   : > { %v3001_v17 = vpop.permute.xlu0 %3000 }
 0x43f   : > { %v3145_v6 = vadd.f32 %v7800_v61, %v3001_v17  ;;  %3338 = vrot.lane.b32.xlu0 %v3246_v15, %s6459_s25  ;;  %v3208_v12 = vmax.f32 %v3144_v47, 0.0 }
 0x440   : > { %v2997_v62 = vpop.permute.xlu1 %2996 }
 0x441   : > { %v3209_v7 = vmax.f32 %v3145_v6, 0.0  ;;  %v3143_v27 = vadd.f32 %v2997_v62, %v7801_v42  ;;  %v7812_v42 = vld [vmem:[#allocation36_spill] sm:$0xff] }
 0x443   : > { %v3207_v44 = vmax.f32 %v3143_v27, 0.0  ;;  %v3249_v55 = vpack.c.bf16 %v3209_v7, %v3208_v12 }
 0x445   : > { %3344 = vrot.lane.b32.xlu1 %v3249_v55, %s6459_s25  ;;  %v3248_v33 = vpack.c.bf16 %v3207_v44, %v3206_v43  ;;  %v7813_v55 = vld [vmem:[#allocation38_spill] sm:$0xff] }
 0x447   : > { %3342 = vrot.lane.b32.xlu0 %v3248_v33, %s6459_s25 }
 0x44f   : > { %v3301_v16 = vpop.permute.xlu1 %3300 }
 0x451   : > { %v3299_v48 = vpop.permute.xlu0 %3298 }
 0x452   : > { %5815 = vmatprep.mubr.msk.bf16.mxu0 %vm1008_vm3, %v3299_v48 }
 0x453   : > { %v3005_v21 = vpop.permute.xlu1 %3004  ;;  %5816 = vmatmul.mubr.msk.bf16.vlgmr.msra.gmra.mxu0 %vm1008_vm3, %v3301_v16 }
 0x454   : > { %v3147_v31 = vadd.f32 %v3005_v21, %v7802_v26 }
 0x455   : > { %v3003_v41 = vpop.permute.xlu0 %3002 }
 0x456   : > { %v3146_v35 = vadd.f32 %v3003_v41, %v7803_v0  ;;  %v3211_v30 = vmax.f32 %v3147_v31, 0.0  ;;  %v7814_v41 = vld [vmem:[#allocation43_spill] sm:$0xff] }
 0x457   : > { %v3007_v52 = vpop.permute.xlu1 %3006 }
 0x458   : > { %v3210_v38 = vmax.f32 %v3146_v35, 0.0  ;;  %v3148_v51 = vadd.f32 %v7804_v57, %v3007_v52 }
 0x45a   : > { %v3250_v24 = vpack.c.bf16 %v3211_v30, %v3210_v38  ;;  %v3212_v56 = vmax.f32 %v3148_v51, 0.0  ;;  %v7815_v38 = vld [vmem:[#allocation41_spill] sm:$0xff] }
 0x45c   : > { %3346 = vrot.lane.b32.xlu0 %v3250_v24, %s6459_s25 }
 0x45e   : > { %v3305_v34 = vpop.permute.xlu1 %3304 }
 0x462   : > { %v3303_v39 = vpop.permute.xlu0 %3302 }
 0x463   : > { %5819 = vmatprep.mubr.msk.bf16.mxu0 %vm1008_vm3, %v3303_v39 }
 0x464   : > { %5820 = vmatmul.mubr.msk.bf16.gmra.mxu0 %vm1008_vm3, %v3305_v34 }
 0x466   : > { %v3009_v49 = vpop.permute.xlu0 %3008 }
 0x467   : > { %v3149_v40 = vadd.f32 %v7805_v32, %v3009_v49  ;;  %v7816_v49 = vld [vmem:[#allocation40_spill] sm:$0xff] }
 0x469   : > { %v3213_v4 = vmax.f32 %v3149_v40, 0.0 }
 0x46a   : > { %v3309_v54 = vpop.permute.xlu1 %3308 }
 0x46b   : > { %v3251_v53 = vpack.c.bf16 %v3213_v4, %v3212_v56  ;;  %v7817_v56 = vld [vmem:[#allocation42_spill] sm:$0xff] }
 0x46d   : > { %3348 = vrot.lane.b32.xlu1 %v3251_v53, %s6459_s25 }
 0x46e   : > { %v3307_v59 = vpop.permute.xlu0 %3306  ;;  %v3013_v46 = vpop.permute.xlu1 %3012 }
 0x46f   : > { %5823 = vmatprep.mubr.msk.bf16.mxu0 %vm1008_vm3, %v3307_v59  ;;  %v3151_v37 = vadd.f32 %v3013_v46, %v7806_v45 }
 0x470   : > { %5824 = vmatmul.mubr.msk.bf16.gmra.mxu0 %vm1008_vm3, %v3309_v54 }
 0x471   : > { %v3215_v18 = vmax.f32 %v3151_v37, 0.0 }
 0x472   : > { %v3011_v50 = vpop.permute.xlu0 %3010  ;;  %v3015_v14 = vpop.permute.xlu1 %3014 }
 0x473   : > { %v3150_v60 = vadd.f32 %v3011_v50, %v7807_v63  ;;  %v3152_v23 = vadd.f32 %v7808_v3, %v3015_v14 }
 0x475   : > { %v3214_v9 = vmax.f32 %v3150_v60, 0.0  ;;  %v3216_v25 = vmax.f32 %v3152_v23, 0.0 }
 0x476   : > { %v3313_v10 = vpop.permute.xlu1 %3312 }
 0x477   : > { %v3252_v5 = vpack.c.bf16 %v3215_v18, %v3214_v9 }
 0x479   : > { %v3311_v1 = vpop.permute.xlu0 %3310  ;;  %3350 = vrot.lane.b32.xlu0 %v3252_v5, %s6459_s25 }
 0x47a   : > { %5827 = vmatprep.mubr.msk.bf16.mxu0 %vm1008_vm3, %v3311_v1 }
 0x47b   : > { %5828 = vmatmul.mubr.msk.bf16.gmra.mxu0 %vm1008_vm3, %v3313_v10 }
 0x47d   : > { %v3017_v8 = vpop.permute.xlu0 %3016  ;;  %v3317_v36 = vpop.permute.xlu1 %3316 }
 0x47e   : > { %v3153_v29 = vadd.f32 %v7809_v2, %v3017_v8 }
 0x480   : > { %v3217_v11 = vmax.f32 %v3153_v29, 0.0 }
 0x481   : > { %v3315_v28 = vpop.permute.xlu0 %3314  ;;  %v3021_v19 = vpop.permute.xlu1 %3020 }
 0x482   : > { %v3253_v13 = vpack.c.bf16 %v3217_v11, %v3216_v25  ;;  %5831 = vmatprep.mubr.msk.bf16.mxu0 %vm1008_vm3, %v3315_v28  ;;  %v3155_v47 = vadd.f32 %v3021_v19, %v7810_v20 }
 0x483   : > { %5832 = vmatmul.mubr.msk.bf16.gmra.mxu0 %vm1008_vm3, %v3317_v36 }
 0x484   : > { %3352 = vrot.lane.b32.xlu1 %v3253_v13, %s6459_s25  ;;  %v3219_v61 = vmax.f32 %v3155_v47, 0.0 }
 0x485   : > { %v3019_v15 = vpop.permute.xlu0 %3018  ;;  %v3023_v17 = vpop.permute.xlu1 %3022 }
 0x486   : > { %v3154_v22 = vadd.f32 %v3019_v15, %v7811_v58  ;;  %v3156_v27 = vadd.f32 %v7812_v42, %v3023_v17 }
 0x488   : > { %v3218_v6 = vmax.f32 %v3154_v22, 0.0  ;;  %v3220_v16 = vmax.f32 %v3156_v27, 0.0 }
 0x489   : > { %v3319_v62 = vpop.permute.xlu0 %3318  ;;  %v3321_v12 = vpop.permute.xlu1 %3320 }
 0x48a   : > { %v3254_v7 = vpack.c.bf16 %v3219_v61, %v3218_v6  ;;  %5835 = vmatprep.mubr.msk.bf16.mxu0 %vm1008_vm3, %v3319_v62 }
 0x48b   : > { %5836 = vmatmul.mubr.msk.bf16.gmra.mxu0 %vm1008_vm3, %v3321_v12 }
 0x48c   : > { %3354 = vrot.lane.b32.xlu0 %v3254_v7, %s6459_s25 }
 0x48d   : > { %v3025_v43 = vpop.permute.xlu0 %3024  ;;  %v3325_v44 = vpop.permute.xlu1 %3324 }
 0x48e   : > { %v3157_v33 = vadd.f32 %v7813_v55, %v3025_v43 }
 0x490   : > { %v3221_v48 = vmax.f32 %v3157_v33, 0.0 }
 0x491   : > { %v3323_v21 = vpop.permute.xlu0 %3322  ;;  %v3029_v26 = vpop.permute.xlu1 %3028 }
 0x492   : > { %v3255_v31 = vpack.c.bf16 %v3221_v48, %v3220_v16  ;;  %5839 = vmatprep.mubr.msk.bf16.mxu0 %vm1008_vm3, %v3323_v21  ;;  %v3159_v0 = vadd.f32 %v3029_v26, %v7814_v41 }
 0x493   : > { %5840 = vmatmul.mubr.msk.bf16.gmra.mxu0 %vm1008_vm3, %v3325_v44 }
 0x494   : > { %3356 = vrot.lane.b32.xlu1 %v3255_v31, %s6459_s25  ;;  %v3223_v24 = vmax.f32 %v3159_v0, 0.0 }
 0x495   : > { %v3027_v35 = vpop.permute.xlu0 %3026  ;;  %v3031_v30 = vpop.permute.xlu1 %3030 }
 0x496   : > { %v3158_v52 = vadd.f32 %v3027_v35, %v7815_v38  ;;  %v3160_v32 = vadd.f32 %v7816_v49, %v3031_v30 }
 0x498   : > { %v3222_v34 = vmax.f32 %v3158_v52, 0.0  ;;  %v3224_v54 = vmax.f32 %v3160_v32, 0.0 }
 0x499   : > { %v3327_v39 = vpop.permute.xlu0 %3326  ;;  %v3329_v57 = vpop.permute.xlu1 %3328 }
 0x49a   : > { %v3256_v51 = vpack.c.bf16 %v3223_v24, %v3222_v34  ;;  %5843 = vmatprep.mubr.msk.bf16.mxu0 %vm1008_vm3, %v3327_v39 }
 0x49b   : > { %5844 = vmatmul.mubr.msk.bf16.gmra.mxu0 %vm1008_vm3, %v3329_v57 }
 0x49c   : > { %3358 = vrot.lane.b32.xlu0 %v3256_v51, %s6459_s25 }
 0x49d   : > { %v3033_v40 = vpop.permute.xlu0 %3032 }
 0x49e   : > { %v3161_v4 = vadd.f32 %v7817_v56, %v3033_v40 }
 0x49f   : > { %v3333_v45 = vpop.permute.xlu1 %3332 }
 0x4a0   : > { %v3225_v53 = vmax.f32 %v3161_v4, 0.0 }
 0x4a1   : > { %v3331_v59 = vpop.permute.xlu0 %3330 }
 0x4a2   : > { %v3257_v46 = vpack.c.bf16 %v3225_v53, %v3224_v54  ;;  %5847 = vmatprep.mubr.msk.bf16.mxu0 %vm1008_vm3, %v3331_v59 }
 0x4a3   : > { %5848 = vmatmul.mubr.msk.bf16.gmra.mxu0 %vm1008_vm3, %v3333_v45 }
 0x4a4   : > { %3360 = vrot.lane.b32.xlu1 %v3257_v46, %s6459_s25 }
 0x4a7   : > { %v3337_v50 = vpop.permute.xlu1 %3336 }
 0x4a9   : > { %v3335_v37 = vpop.permute.xlu0 %3334 }
 0x4aa   : > { %5851 = vmatprep.mubr.msk.bf16.mxu0 %vm1008_vm3, %v3335_v37 }
 0x4ab   : > { %5852 = vmatmul.mubr.msk.bf16.gmra.mxu0 %vm1008_vm3, %v3337_v50 }
 0x4af   : > { %v3341_v63 = vpop.permute.xlu1 %3340 }
 0x4b1   : > { %v3339_v14 = vpop.permute.xlu0 %3338 }
 0x4b2   : > { %5855 = vmatprep.mubr.msk.bf16.mxu0 %vm1008_vm3, %v3339_v14 }
 0x4b3   : > { %5856 = vmatmul.mubr.msk.bf16.gmra.mxu0 %vm1008_vm3, %v3341_v63 }
 0x4b7   : > { %v3345_v18 = vpop.permute.xlu1 %3344 }
 0x4b9   : > { %v3343_v60 = vpop.permute.xlu0 %3342 }
 0x4ba   : > { %5859 = vmatprep.mubr.msk.bf16.mxu0 %vm1008_vm3, %v3343_v60 }
 0x4bb   : > { %5860 = vmatmul.mubr.msk.bf16.gmra.mxu0 %vm1008_vm3, %v3345_v18 }
 0x4ce   : > { %v3347_v9 = vpop.permute.xlu0 %3346 }
 0x4cf   : > { %5863 = vmatprep.mubr.msk.bf16.mxu0 %vm1008_vm3, %v3347_v9 }
 0x4df   : > { %v3349_v10 = vpop.permute.xlu1 %3348 }
 0x4e0   : > { %5864 = vmatmul.mubr.msk.bf16.gmra.mxu0 %vm1008_vm3, %v3349_v10 }
 0x4eb   : > { %v3351_v5 = vpop.permute.xlu0 %3350 }
 0x4ec   : > { %5867 = vmatprep.mubr.msk.bf16.mxu0 %vm1008_vm3, %v3351_v5 }
 0x4f6   : > { %v3353_v1 = vpop.permute.xlu1 %3352 }
 0x4f7   : > { %5868 = vmatmul.mubr.msk.bf16.gmra.mxu0 %vm1008_vm3, %v3353_v1 }
 0x4fe   : > { %v3355_v3 = vpop.permute.xlu0 %3354 }
 0x4ff   : > { %5871 = vmatprep.mubr.msk.bf16.mxu0 %vm1008_vm3, %v3355_v3 }
 0x506   : > { %v3357_v23 = vpop.permute.xlu1 %3356 }
 0x507   : > { %5872 = vmatmul.mubr.msk.bf16.gmra.mxu0 %vm1008_vm3, %v3357_v23 }
 0x50e   : > { %v3359_v8 = vpop.permute.xlu0 %3358 }
 0x50f   : > { %5875 = vmatprep.mubr.msk.bf16.mxu0 %vm1008_vm3, %v3359_v8 }
 0x513   : > { %v5817_v2 = vpop.f32.mrf.mxu0 }
 0x514   : > { %v3773_v36 = vsub.f32 0.0, %v5817_v2 }
 0x515   : > { %v3516_v25 = vpop.f32.mrf.mxu0 }
 0x516   : > { %v3361_v29 = vpop.permute.xlu1 %3360  ;;  %v3839_v11 = vmul.f32 1.442695, %v3773_v36  ;;  %v3771_v13 = vsub.f32 0.0, %v3516_v25 }
 0x517   : > { %5876 = vmatmul.mubr.msk.bf16.gmra.mxu0 %vm1008_vm3, %v3361_v29  ;;  %v5818_v28 = vpop.f32.mrf.mxu0 }
 0x518   : > { %6194 = vpow2.f32 %v3839_v11  ;;  %v3835_v19 = vmul.f32 1.442695, %v3771_v13  ;;  %v3774_v20 = vsub.f32 0.0, %v5818_v28 }
 0x519   : > { %v3519_v47 = vpop.f32.mrf.mxu0 }
 0x51a   : > { %6196 = vpow2.f32 %v3835_v19  ;;  %v3841_v15 = vmul.f32 1.442695, %v3774_v20  ;;  %v3772_v17 = vsub.f32 0.0, %v3519_v47 }
 0x51c   : > { %6198 = vpow2.f32 %v3841_v15  ;;  %v3837_v58 = vmul.f32 1.442695, %v3772_v17 }
 0x51e   : > { %6200 = vpow2.f32 %v3837_v58 }
 0x524   : > { %v5821_v22 = vpop.f32.mrf.mxu0 }
 0x525   : > { %v3777_v61 = vsub.f32 0.0, %v5821_v22  ;;  %v6195_v7 = vpop.eup %6194 }
 0x526   : > { %v3532_v6 = vpop.f32.mrf.mxu0  ;;  %v3965_v27 = vadd.f32 1.0, %v6195_v7 }
 0x527   : > { %v3847_v62 = vmul.f32 1.442695, %v3777_v61  ;;  %v3775_v12 = vsub.f32 0.0, %v3532_v6  ;;  %v6197_v55 = vpop.eup %6196 }
 0x528   : > { %v5822_v42 = vpop.f32.mrf.mxu0  ;;  %v3963_v16 = vadd.f32 1.0, %v6197_v55 }
 0x529   : > { %6202 = vpow2.f32 %v3847_v62  ;;  %v3843_v43 = vmul.f32 1.442695, %v3775_v12  ;;  %v3778_v44 = vsub.f32 0.0, %v5822_v42  ;;  %v6199_v26 = vpop.eup %6198 }
 0x52a   : > { %v3535_v33 = vpop.f32.mrf.mxu0  ;;  %6204 = vrcp.f32 %v3965_v27  ;;  %v3966_v31 = vadd.f32 1.0, %v6199_v26 }
 0x52b   : > { %v3849_v48 = vmul.f32 1.442695, %v3778_v44  ;;  %v3776_v21 = vsub.f32 0.0, %v3535_v33  ;;  %6206 = vpow2.f32 %v3843_v43  ;;  %v6201_v0 = vpop.eup %6200 }
 0x52c   : > { %6208 = vrcp.f32 %v3963_v16  ;;  %v3964_v35 = vadd.f32 1.0, %v6201_v0 }
 0x52d   : > { %v3845_v41 = vmul.f32 1.442695, %v3776_v21  ;;  %6210 = vpow2.f32 %v3849_v48 }
 0x52e   : > { %6212 = vrcp.f32 %v3966_v31 }
 0x52f   : > { %6214 = vpow2.f32 %v3845_v41 }
 0x530   : > { %v5825_v30 = vpop.f32.mrf.mxu0  ;;  %6216 = vrcp.f32 %v3964_v35 }
 0x531   : > { %v3781_v38 = vsub.f32 0.0, %v5825_v30 }
 0x532   : > { %v3548_v52 = vpop.f32.mrf.mxu0 }
 0x533   : > { %v3855_v24 = vmul.f32 1.442695, %v3781_v38  ;;  %v3779_v34 = vsub.f32 0.0, %v3548_v52 }
 0x534   : > { %v5826_v39 = vpop.f32.mrf.mxu0 }
 0x535   : > { %6218 = vpow2.f32 %v3855_v24  ;;  %v3851_v57 = vmul.f32 1.442695, %v3779_v34  ;;  %v3782_v51 = vsub.f32 0.0, %v5826_v39 }
 0x536   : > { %v6203_v49 = vpop.eup %6202  ;;  %v3551_v32 = vpop.f32.mrf.mxu0 }
 0x537   : > { %v3969_v40 = vadd.f32 1.0, %v6203_v49  ;;  %6220 = vpow2.f32 %v3851_v57  ;;  %v3857_v56 = vmul.f32 1.442695, %v3782_v51  ;;  %v3780_v4 = vsub.f32 0.0, %v3551_v32  ;;  %v6205_v54 = vpop.eup %6204 }
 0x538   : > { %v6207_v53 = vpop.eup %6206  ;;  %v5295_v46 = vpack.c.bf16 %v6205_v54, %v6205_v54 }
 0x539   : > { %6222 = vrcp.f32 %v3969_v40  ;;  %v3853_v59 = vmul.f32 1.442695, %v3780_v4  ;;  %v6209_v45 = vpop.eup %6208  ;;  %v3967_v37 = vadd.f32 1.0, %v6207_v53 }
 0x53a   : > { %6224 = vpow2.f32 %v3857_v56  ;;  %v6211_v14 = vpop.eup %6210  ;;  %4576 = vrot.lane.b32.xlu0 %v5295_v46, %s6460_s13  ;;  %v5293_v3 = vpack.c.bf16 %v6209_v45, %v6209_v45 }
 0x53b   : > { %v5829_v50 = vpop.f32.mrf.mxu0  ;;  %6226 = vpow2.f32 %v3853_v59  ;;  %v6213_v60 = vpop.eup %6212  ;;  %v3970_v18 = vadd.f32 1.0, %v6211_v14 }
 0x53c   : > { %v3785_v63 = vsub.f32 0.0, %v5829_v50  ;;  %6228 = vrcp.f32 %v3967_v37  ;;  %v6215_v10 = vpop.eup %6214  ;;  %v5296_v23 = vpack.c.bf16 %v6213_v60, %v6213_v60 }
 0x53d   : > { %v3564_v9 = vpop.f32.mrf.mxu0  ;;  %v6217_v8 = vpop.eup %6216  ;;  %6230 = vrcp.f32 %v3970_v18  ;;  %v3968_v2 = vadd.f32 1.0, %v6215_v10 }
 0x53e   : > { %v3863_v5 = vmul.f32 1.442695, %v3785_v63  ;;  %v3783_v1 = vsub.f32 0.0, %v3564_v9  ;;  %4572 = vrot.lane.b32.xlu0 %v5293_v3, %s6460_s13  ;;  %4578 = vrot.lane.b32.xlu1 %v5296_v23, %s6460_s13  ;;  %v5294_v19 = vpack.c.bf16 %v6217_v8, %v6217_v8 }
 0x53f   : > { %v5830_v29 = vpop.f32.mrf.mxu0 }
 0x540   : > { %6232 = vpow2.f32 %v3863_v5  ;;  %v3859_v36 = vmul.f32 1.442695, %v3783_v1  ;;  %v3786_v25 = vsub.f32 0.0, %v5830_v29 }
 0x541   : > { %6234 = vrcp.f32 %v3968_v2  ;;  %v3567_v11 = vpop.f32.mrf.mxu0 }
 0x542   : > { %6236 = vpow2.f32 %v3859_v36  ;;  %v3865_v13 = vmul.f32 1.442695, %v3786_v25  ;;  %v3784_v28 = vsub.f32 0.0, %v3567_v11  ;;  %v6219_v20 = vpop.eup %6218  ;;  %4574 = vrot.lane.b32.xlu1 %v5294_v19, %s6460_s13 }
 0x543   : > { %v3973_v47 = vadd.f32 1.0, %v6219_v20  ;;  %v5833_v58 = vpop.f32.mrf.mxu0 }
 0x544   : > { %6238 = vpow2.f32 %v3865_v13  ;;  %v3861_v15 = vmul.f32 1.442695, %v3784_v28  ;;  %v6221_v17 = vpop.eup %6220  ;;  %v3789_v61 = vsub.f32 0.0, %v5833_v58 }
 0x545   : > { %6240 = vrcp.f32 %v3973_v47  ;;  %v3971_v22 = vadd.f32 1.0, %v6221_v17  ;;  %v3580_v62 = vpop.f32.mrf.mxu0 }
 0x546   : > { %v6223_v6 = vpop.eup %6222  ;;  %6242 = vpow2.f32 %v3861_v15  ;;  %v3871_v7 = vmul.f32 1.442695, %v3789_v61  ;;  %v3787_v42 = vsub.f32 0.0, %v3580_v62 }
 0x547   : > { %v6225_v12 = vpop.eup %6224  ;;  %6244 = vrcp.f32 %v3971_v22  ;;  %v5299_v27 = vpack.c.bf16 %v6223_v6, %v6223_v6  ;;  %v5834_v55 = vpop.f32.mrf.mxu0 }
 0x548   : > { %v6227_v43 = vpop.eup %6226  ;;  %v3974_v44 = vadd.f32 1.0, %v6225_v12  ;;  %6246 = vpow2.f32 %v3871_v7  ;;  %v3867_v48 = vmul.f32 1.442695, %v3787_v42  ;;  %v3790_v21 = vsub.f32 0.0, %v5834_v55 }
 0x549   : > { %v6229_v33 = vpop.eup %6228  ;;  %v3972_v16 = vadd.f32 1.0, %v6227_v43  ;;  %4584 = vrot.lane.b32.xlu0 %v5299_v27, %s6460_s13  ;;  %v3583_v26 = vpop.f32.mrf.mxu0 }
 0x54a   : > { %6248 = vrcp.f32 %v3974_v44  ;;  %v6231_v31 = vpop.eup %6230  ;;  %v3873_v41 = vmul.f32 1.442695, %v3790_v21  ;;  %v3788_v0 = vsub.f32 0.0, %v3583_v26  ;;  %v5297_v35 = vpack.c.bf16 %v6229_v33, %v6229_v33 }
 0x54b   : > { %6250 = vrcp.f32 %v3972_v16  ;;  %v5837_v38 = vpop.f32.mrf.mxu0  ;;  %v5300_v52 = vpack.c.bf16 %v6231_v31, %v6231_v31 }
 0x54c   : > { %6252 = vpow2.f32 %v3867_v48  ;;  %v3869_v39 = vmul.f32 1.442695, %v3788_v0  ;;  %v3793_v57 = vsub.f32 0.0, %v5837_v38 }
 0x54d   : > { %v6233_v30 = vpop.eup %6232  ;;  %6254 = vpow2.f32 %v3873_v41  ;;  %4580 = vrot.lane.b32.xlu0 %v5297_v35, %s6460_s13  ;;  %v3596_v49 = vpop.f32.mrf.mxu0  ;;  %4586 = vrot.lane.b32.xlu1 %v5300_v52, %s6460_s13 }
 0x54e   : > { %v6235_v24 = vpop.eup %6234  ;;  %v3977_v34 = vadd.f32 1.0, %v6233_v30  ;;  %v3879_v40 = vmul.f32 1.442695, %v3793_v57  ;;  %v3791_v56 = vsub.f32 0.0, %v3596_v49 }
 0x54f   : > { %v6237_v51 = vpop.eup %6236  ;;  %v5838_v54 = vpop.f32.mrf.mxu0  ;;  %v5298_v53 = vpack.c.bf16 %v6235_v24, %v6235_v24 }
 0x550   : > { %6256 = vrcp.f32 %v3977_v34  ;;  %v3975_v32 = vadd.f32 1.0, %v6237_v51  ;;  %v3875_v46 = vmul.f32 1.442695, %v3791_v56  ;;  %v3794_v45 = vsub.f32 0.0, %v5838_v54 }
 0x551   : > { %v6239_v4 = vpop.eup %6238  ;;  %6258 = vpow2.f32 %v3869_v39  ;;  %v3599_v50 = vpop.f32.mrf.mxu0  ;;  %4582 = vrot.lane.b32.xlu1 %v5298_v53, %s6460_s13 }
 0x552   : > { %6260 = vrcp.f32 %v3975_v32  ;;  %v3978_v59 = vadd.f32 1.0, %v6239_v4  ;;  %v6241_v37 = vpop.eup %6240  ;;  %v3881_v63 = vmul.f32 1.442695, %v3794_v45  ;;  %v3792_v60 = vsub.f32 0.0, %v3599_v50 }
 0x553   : > { %6262 = vpow2.f32 %v3879_v40  ;;  %v6243_v14 = vpop.eup %6242  ;;  %v5303_v18 = vpack.c.bf16 %v6241_v37, %v6241_v37  ;;  %v5841_v5 = vpop.f32.mrf.mxu0 }
 0x554   : > { %6264 = vrcp.f32 %v3978_v59  ;;  %v6245_v9 = vpop.eup %6244  ;;  %v3976_v10 = vadd.f32 1.0, %v6243_v14  ;;  %v3877_v1 = vmul.f32 1.442695, %v3792_v60  ;;  %v3797_v3 = vsub.f32 0.0, %v5841_v5 }
 0x555   : > { %6266 = vpow2.f32 %v3875_v46  ;;  %4592 = vrot.lane.b32.xlu0 %v5303_v18, %s6460_s13  ;;  %v6247_v23 = vpop.eup %6246  ;;  %v3612_v8 = vpop.f32.mrf.mxu0  ;;  %v5301_v2 = vpack.c.bf16 %v6245_v9, %v6245_v9 }
 0x556   : > { %6268 = vpow2.f32 %v3881_v63  ;;  %v3981_v36 = vadd.f32 1.0, %v6247_v23  ;;  %v3887_v25 = vmul.f32 1.442695, %v3797_v3  ;;  %v3795_v11 = vsub.f32 0.0, %v3612_v8 }
 0x557   : > { %6270 = vrcp.f32 %v3976_v10  ;;  %v6249_v29 = vpop.eup %6248  ;;  %v5842_v28 = vpop.f32.mrf.mxu0 }
 0x558   : > { %6272 = vpow2.f32 %v3877_v1  ;;  %v6251_v13 = vpop.eup %6250  ;;  %v5304_v19 = vpack.c.bf16 %v6249_v29, %v6249_v29  ;;  %v3883_v47 = vmul.f32 1.442695, %v3795_v11  ;;  %v3798_v15 = vsub.f32 0.0, %v5842_v28 }
 0x559   : > { %v6253_v20 = vpop.eup %6252  ;;  %6274 = vrcp.f32 %v3981_v36  ;;  %4588 = vrot.lane.b32.xlu0 %v5301_v2, %s6460_s13  ;;  %v3615_v22 = vpop.f32.mrf.mxu0  ;;  %v5302_v42 = vpack.c.bf16 %v6251_v13, %v6251_v13 }
 0x55a   : > { %v6255_v17 = vpop.eup %6254  ;;  %v3979_v58 = vadd.f32 1.0, %v6253_v20  ;;  %6276 = vpow2.f32 %v3887_v25  ;;  %4594 = vrot.lane.b32.xlu1 %v5304_v19, %s6460_s13  ;;  %v3889_v6 = vmul.f32 1.442695, %v3798_v15  ;;  %v3796_v62 = vsub.f32 0.0, %v3615_v22 }
 0x55b   : > { %v3982_v61 = vadd.f32 1.0, %v6255_v17  ;;  %6278 = vpow2.f32 %v3883_v47  ;;  %v5845_v7 = vpop.f32.mrf.mxu0 }
 0x55c   : > { %6280 = vrcp.f32 %v3979_v58  ;;  %v3885_v43 = vmul.f32 1.442695, %v3796_v62  ;;  %v3801_v44 = vsub.f32 0.0, %v5845_v7 }
 0x55d   : > { %v6257_v12 = vpop.eup %6256  ;;  %6282 = vrcp.f32 %v3982_v61  ;;  %v3628_v48 = vpop.f32.mrf.mxu0 }
 0x55e   : > { %v6259_v27 = vpop.eup %6258  ;;  %v5307_v55 = vpack.c.bf16 %v6257_v12, %v6257_v12  ;;  %6284 = vpow2.f32 %v3889_v6  ;;  %4590 = vrot.lane.b32.xlu1 %v5302_v42, %s6460_s13  ;;  %v3895_v26 = vmul.f32 1.442695, %v3801_v44  ;;  %v3799_v31 = vsub.f32 0.0, %v3628_v48 }
 0x55f   : > { %v6261_v33 = vpop.eup %6260  ;;  %v3980_v16 = vadd.f32 1.0, %v6259_v27  ;;  %6286 = vpow2.f32 %v3885_v43  ;;  %v5846_v35 = vpop.f32.mrf.mxu0 }
 0x560   : > { %v6263_v21 = vpop.eup %6262  ;;  %4600 = vrot.lane.b32.xlu0 %v5307_v55, %s6460_s13  ;;  %v5305_v30 = vpack.c.bf16 %v6261_v33, %v6261_v33  ;;  %v3891_v52 = vmul.f32 1.442695, %v3799_v31  ;;  %v3802_v24 = vsub.f32 0.0, %v5846_v35 }
 0x561   : > { %v6265_v41 = vpop.eup %6264  ;;  %6288 = vrcp.f32 %v3980_v16  ;;  %v3985_v0 = vadd.f32 1.0, %v6263_v21  ;;  %v3631_v51 = vpop.f32.mrf.mxu0 }
 0x562   : > { %v6267_v38 = vpop.eup %6266  ;;  %6290 = vpow2.f32 %v3895_v26  ;;  %v5308_v34 = vpack.c.bf16 %v6265_v41, %v6265_v41  ;;  %v3897_v40 = vmul.f32 1.442695, %v3802_v24  ;;  %v3800_v56 = vsub.f32 0.0, %v3631_v51 }
 0x563   : > { %v6269_v39 = vpop.eup %6268  ;;  %6292 = vrcp.f32 %v3985_v0  ;;  %v3983_v57 = vadd.f32 1.0, %v6267_v38  ;;  %v5849_v54 = vpop.f32.mrf.mxu0 }
 0x564   : > { %v6271_v49 = vpop.eup %6270  ;;  %v3986_v32 = vadd.f32 1.0, %v6269_v39  ;;  %6294 = vpow2.f32 %v3891_v52  ;;  %4596 = vrot.lane.b32.xlu0 %v5305_v30, %s6460_s13  ;;  %4602 = vrot.lane.b32.xlu1 %v5308_v34, %s6460_s13  ;;  %v3893_v46 = vmul.f32 1.442695, %v3800_v56  ;;  %v3805_v45 = vsub.f32 0.0, %v5849_v54 }
 0x565   : > { %v6273_v4 = vpop.eup %6272  ;;  %6296 = vrcp.f32 %v3983_v57  ;;  %v5306_v53 = vpack.c.bf16 %v6271_v49, %v6271_v49  ;;  %v3644_v50 = vpop.f32.mrf.mxu0 }
 0x566   : > { %6298 = vrcp.f32 %v3986_v32  ;;  %v3984_v59 = vadd.f32 1.0, %v6273_v4  ;;  %v6275_v37 = vpop.eup %6274  ;;  %v3903_v63 = vmul.f32 1.442695, %v3805_v45  ;;  %v3803_v60 = vsub.f32 0.0, %v3644_v50 }
 0x567   : > { %6300 = vpow2.f32 %v3897_v40  ;;  %v6277_v14 = vpop.eup %6276  ;;  %v5311_v18 = vpack.c.bf16 %v6275_v37, %v6275_v37  ;;  %v5850_v5 = vpop.f32.mrf.mxu0 }
 0x568   : > { %6302 = vrcp.f32 %v3984_v59  ;;  %4598 = vrot.lane.b32.xlu1 %v5306_v53, %s6460_s13  ;;  %v6279_v9 = vpop.eup %6278  ;;  %v3989_v10 = vadd.f32 1.0, %v6277_v14  ;;  %v3899_v23 = vmul.f32 1.442695, %v3803_v60  ;;  %v3806_v8 = vsub.f32 0.0, %v5850_v5 }
 0x569   : > { %6304 = vpow2.f32 %v3893_v46  ;;  %v6281_v1 = vpop.eup %6280  ;;  %v3987_v3 = vadd.f32 1.0, %v6279_v9  ;;  %4608 = vrot.lane.b32.xlu0 %v5311_v18, %s6460_s13  ;;  %v3647_v29 = vpop.f32.mrf.mxu0 }
 0x56a   : > { %6306 = vpow2.f32 %v3903_v63  ;;  %v6283_v2 = vpop.eup %6282  ;;  %v5309_v36 = vpack.c.bf16 %v6281_v1, %v6281_v1  ;;  %v3905_v11 = vmul.f32 1.442695, %v3806_v8  ;;  %v3804_v13 = vsub.f32 0.0, %v3647_v29 }
 0x56b   : > { %6308 = vrcp.f32 %v3989_v10  ;;  %v6285_v25 = vpop.eup %6284  ;;  %v5312_v28 = vpack.c.bf16 %v6283_v2, %v6283_v2  ;;  %v5853_v47 = vpop.f32.mrf.mxu0 }
 0x56c   : > { %6310 = vrcp.f32 %v3987_v3  ;;  %v6287_v19 = vpop.eup %6286  ;;  %v3990_v20 = vadd.f32 1.0, %v6285_v25  ;;  %v3901_v58 = vmul.f32 1.442695, %v3804_v13  ;;  %v3809_v22 = vsub.f32 0.0, %v5853_v47 }
 0x56d   : > { %6312 = vpow2.f32 %v3899_v23  ;;  %v3988_v17 = vadd.f32 1.0, %v6287_v19  ;;  %4604 = vrot.lane.b32.xlu0 %v5309_v36, %s6460_s13  ;;  %4610 = vrot.lane.b32.xlu1 %v5312_v28, %s6460_s13  ;;  %v3660_v6 = vpop.f32.mrf.mxu0 }
 0x56e   : > { %v6289_v15 = vpop.eup %6288  ;;  %6314 = vpow2.f32 %v3905_v11  ;;  %v3911_v42 = vmul.f32 1.442695, %v3809_v22  ;;  %v3807_v27 = vsub.f32 0.0, %v3660_v6 }
 0x56f   : > { %v6291_v61 = vpop.eup %6290  ;;  %6316 = vrcp.f32 %v3990_v20  ;;  %v5310_v62 = vpack.c.bf16 %v6289_v15, %v6289_v15  ;;  %v5854_v44 = vpop.f32.mrf.mxu0 }
 0x570   : > { %v6293_v12 = vpop.eup %6292  ;;  %6318 = vrcp.f32 %v3988_v17  ;;  %v3993_v7 = vadd.f32 1.0, %v6291_v61  ;;  %v3907_v48 = vmul.f32 1.442695, %v3807_v27  ;;  %v3810_v21 = vsub.f32 0.0, %v5854_v44 }
 0x571   : > { %v6295_v43 = vpop.eup %6294  ;;  %6320 = vpow2.f32 %v3901_v58  ;;  %v5315_v55 = vpack.c.bf16 %v6293_v12, %v6293_v12  ;;  %4606 = vrot.lane.b32.xlu1 %v5310_v62, %s6460_s13  ;;  %v3663_v31 = vpop.f32.mrf.mxu0 }
 0x572   : > { %v6297_v33 = vpop.eup %6296  ;;  %6322 = vrcp.f32 %v3993_v7  ;;  %v3991_v16 = vadd.f32 1.0, %v6295_v43  ;;  %v3913_v0 = vmul.f32 1.442695, %v3810_v21  ;;  %v3808_v35 = vsub.f32 0.0, %v3663_v31 }
 0x573   : > { %v6299_v26 = vpop.eup %6298  ;;  %6324 = vpow2.f32 %v3911_v42  ;;  %4616 = vrot.lane.b32.xlu0 %v5315_v55, %s6460_s13  ;;  %v5857_v24 = vpop.f32.mrf.mxu0  ;;  %v5313_v34 = vpack.c.bf16 %v6297_v33, %v6297_v33 }
 0x574   : > { %v6301_v41 = vpop.eup %6300  ;;  %6326 = vrcp.f32 %v3991_v16  ;;  %v5316_v30 = vpack.c.bf16 %v6299_v26, %v6299_v26  ;;  %v3909_v57 = vmul.f32 1.442695, %v3808_v35  ;;  %v3813_v51 = vsub.f32 0.0, %v5857_v24 }
 0x575   : > { %v6303_v38 = vpop.eup %6302  ;;  %v3994_v52 = vadd.f32 1.0, %v6301_v41  ;;  %6328 = vpow2.f32 %v3907_v48  ;;  %v3676_v40 = vpop.f32.mrf.mxu0 }
 0x576   : > { %v6305_v39 = vpop.eup %6304  ;;  %6330 = vpow2.f32 %v3913_v0  ;;  %4618 = vrot.lane.b32.xlu1 %v5316_v30, %s6460_s13  ;;  %v5314_v56 = vpack.c.bf16 %v6303_v38, %v6303_v38  ;;  %v3919_v53 = vmul.f32 1.442695, %v3813_v51  ;;  %v3811_v59 = vsub.f32 0.0, %v3676_v40 }
 0x577   : > { %v6307_v49 = vpop.eup %6306  ;;  %6332 = vrcp.f32 %v3994_v52  ;;  %v3992_v32 = vadd.f32 1.0, %v6305_v39  ;;  %4612 = vrot.lane.b32.xlu0 %v5313_v34, %s6460_s13  ;;  %v5858_v45 = vpop.f32.mrf.mxu0 }
 0x578   : > { %v6309_v4 = vpop.eup %6308  ;;  %v3997_v54 = vadd.f32 1.0, %v6307_v49  ;;  %6334 = vpow2.f32 %v3909_v57  ;;  %v3915_v14 = vmul.f32 1.442695, %v3811_v59  ;;  %v3814_v63 = vsub.f32 0.0, %v5858_v45 }
 0x579   : > { %v6311_v46 = vpop.eup %6310  ;;  %6336 = vrcp.f32 %v3992_v32  ;;  %v5319_v37 = vpack.c.bf16 %v6309_v4, %v6309_v4  ;;  %v3679_v9 = vpop.f32.mrf.mxu0 }
 0x57a   : > { %v6313_v50 = vpop.eup %6312  ;;  %6338 = vrcp.f32 %v3997_v54  ;;  %4614 = vrot.lane.b32.xlu1 %v5314_v56, %s6460_s13  ;;  %v3921_v1 = vmul.f32 1.442695, %v3814_v63  ;;  %v3812_v3 = vsub.f32 0.0, %v3679_v9  ;;  %v5317_v2 = vpack.c.bf16 %v6311_v46, %v6311_v46 }
 0x57b   : > { %v6315_v60 = vpop.eup %6314  ;;  %v3995_v18 = vadd.f32 1.0, %v6313_v50  ;;  %6340 = vpow2.f32 %v3919_v53  ;;  %4624 = vrot.lane.b32.xlu0 %v5319_v37, %s6460_s13  ;;  %v5861_v8 = vpop.f32.mrf.mxu0 }
 0x57c   : > { %v6317_v10 = vpop.eup %6316  ;;  %v3998_v5 = vadd.f32 1.0, %v6315_v60  ;;  %6342 = vpow2.f32 %v3915_v14  ;;  %v3917_v25 = vmul.f32 1.442695, %v3812_v3  ;;  %v3817_v11 = vsub.f32 0.0, %v5861_v8 }
 0x57d   : > { %v6319_v23 = vpop.eup %6318  ;;  %6344 = vrcp.f32 %v3995_v18  ;;  %v5320_v29 = vpack.c.bf16 %v6317_v10, %v6317_v10  ;;  %v3692_v19 = vpop.f32.mrf.mxu0 }
 0x57e   : > { %v6321_v36 = vpop.eup %6320  ;;  %6346 = vrcp.f32 %v3998_v5  ;;  %v3927_v47 = vmul.f32 1.442695, %v3817_v11  ;;  %v3815_v15 = vsub.f32 0.0, %v3692_v19  ;;  %v5318_v6 = vpack.c.bf16 %v6319_v23, %v6319_v23 }
 0x57f   : > { %v6323_v13 = vpop.eup %6322  ;;  %v3996_v28 = vadd.f32 1.0, %v6321_v36  ;;  %6348 = vpow2.f32 %v3921_v1  ;;  %4620 = vrot.lane.b32.xlu0 %v5317_v2, %s6460_s13  ;;  %4626 = vrot.lane.b32.xlu1 %v5320_v29, %s6460_s13  ;;  %v5862_v61 = vpop.f32.mrf.mxu0 }
 0x580   : > { %v6325_v20 = vpop.eup %6324  ;;  %6350 = vpow2.f32 %v3917_v25  ;;  %v5323_v17 = vpack.c.bf16 %v6323_v13, %v6323_v13  ;;  %v3923_v12 = vmul.f32 1.442695, %v3815_v15  ;;  %v3818_v7 = vsub.f32 0.0, %v5862_v61 }
 0x581   : > { %v6327_v58 = vpop.eup %6326  ;;  %6352 = vrcp.f32 %v3996_v28  ;;  %v4001_v22 = vadd.f32 1.0, %v6325_v20  ;;  %v3695_v43 = vpop.f32.mrf.mxu0 }
 0x582   : > { %v6329_v62 = vpop.eup %6328  ;;  %6354 = vpow2.f32 %v3927_v47  ;;  %v3929_v33 = vmul.f32 1.442695, %v3818_v7  ;;  %v3816_v16 = vsub.f32 0.0, %v3695_v43  ;;  %v5321_v21 = vpack.c.bf16 %v6327_v58, %v6327_v58 }
 0x583   : > { %v6331_v42 = vpop.eup %6330  ;;  %6356 = vrcp.f32 %v4001_v22  ;;  %v3999_v27 = vadd.f32 1.0, %v6329_v62  ;;  %4622 = vrot.lane.b32.xlu1 %v5318_v6, %s6460_s13  ;;  %4632 = vrot.lane.b32.xlu0 %v5323_v17, %s6460_s13 }
 0x584   : > { %v6333_v44 = vpop.eup %6332  ;;  %v4002_v55 = vadd.f32 1.0, %v6331_v42  ;;  %6358 = vpow2.f32 %v3923_v12  ;;  %v3925_v0 = vmul.f32 1.442695, %v3816_v16 }
 0x585   : > { %v6335_v48 = vpop.eup %6334  ;;  %6360 = vrcp.f32 %v3999_v27  ;;  %v5324_v26 = vpack.c.bf16 %v6333_v44, %v6333_v44 }
 0x586   : > { %v6337_v31 = vpop.eup %6336  ;;  %6362 = vrcp.f32 %v4002_v55  ;;  %v4000_v41 = vadd.f32 1.0, %v6335_v48 }
 0x587   : > { %v6339_v35 = vpop.eup %6338  ;;  %6364 = vpow2.f32 %v3929_v33  ;;  %4628 = vrot.lane.b32.xlu0 %v5321_v21, %s6460_s13  ;;  %4634 = vrot.lane.b32.xlu1 %v5324_v26, %s6460_s13  ;;  %v5322_v34 = vpack.c.bf16 %v6337_v31, %v6337_v31 }
 0x588   : > { %v6341_v30 = vpop.eup %6340  ;;  %6366 = vrcp.f32 %v4000_v41  ;;  %v5327_v38 = vpack.c.bf16 %v6339_v35, %v6339_v35 }
 0x589   : > { %v6343_v52 = vpop.eup %6342  ;;  %v4005_v24 = vadd.f32 1.0, %v6341_v30  ;;  %6368 = vpow2.f32 %v3925_v0 }
 0x58a   : > { %v6345_v39 = vpop.eup %6344  ;;  %v4003_v57 = vadd.f32 1.0, %v6343_v52 }
 0x58b   : > { %v6347_v51 = vpop.eup %6346  ;;  %6370 = vrcp.f32 %v4005_v24  ;;  %4630 = vrot.lane.b32.xlu1 %v5322_v34, %s6460_s13  ;;  %4640 = vrot.lane.b32.xlu0 %v5327_v38, %s6460_s13  ;;  %v5325_v4 = vpack.c.bf16 %v6345_v39, %v6345_v39 }
 0x58c   : > { %v6349_v49 = vpop.eup %6348  ;;  %v5328_v32 = vpack.c.bf16 %v6347_v51, %v6347_v51  ;;  %6372 = vrcp.f32 %v4003_v57 }
 0x58d   : > { %v6351_v40 = vpop.eup %6350  ;;  %v4006_v56 = vadd.f32 1.0, %v6349_v49 }
 0x58e   : > { %v6353_v54 = vpop.eup %6352  ;;  %v4004_v53 = vadd.f32 1.0, %v6351_v40 }
 0x58f   : > { %v6355_v59 = vpop.eup %6354  ;;  %6374 = vrcp.f32 %v4006_v56  ;;  %4636 = vrot.lane.b32.xlu0 %v5325_v4, %s6460_s13  ;;  %4642 = vrot.lane.b32.xlu1 %v5328_v32, %s6460_s13  ;;  %v5326_v50 = vpack.c.bf16 %v6353_v54, %v6353_v54 }
 0x590   : > { %v6357_v46 = vpop.eup %6356  ;;  %v4009_v45 = vadd.f32 1.0, %v6355_v59  ;;  %6376 = vrcp.f32 %v4004_v53 }
 0x591   : > { %v6359_v37 = vpop.eup %6358  ;;  %v5331_v14 = vpack.c.bf16 %v6357_v46, %v6357_v46 }
 0x592   : > { %v6361_v63 = vpop.eup %6360  ;;  %6378 = vrcp.f32 %v4009_v45  ;;  %v4007_v60 = vadd.f32 1.0, %v6359_v37 }
 0x593   : > { %v6363_v18 = vpop.eup %6362  ;;  %4638 = vrot.lane.b32.xlu1 %v5326_v50, %s6460_s13  ;;  %4648 = vrot.lane.b32.xlu0 %v5331_v14, %s6460_s13  ;;  %v5329_v3 = vpack.c.bf16 %v6361_v63, %v6361_v63 }
 0x594   : > { %v6365_v9 = vpop.eup %6364  ;;  %v5332_v10 = vpack.c.bf16 %v6363_v18, %v6363_v18  ;;  %6380 = vrcp.f32 %v4007_v60 }
 0x595   : > { %v6367_v5 = vpop.eup %6366  ;;  %v4010_v1 = vadd.f32 1.0, %v6365_v9 }
 0x596   : > { %v6369_v23 = vpop.eup %6368  ;;  %v5330_v29 = vpack.c.bf16 %v6367_v5, %v6367_v5 }
 0x597   : > { %6382 = vrcp.f32 %v4010_v1  ;;  %v4008_v8 = vadd.f32 1.0, %v6369_v23  ;;  %4644 = vrot.lane.b32.xlu0 %v5329_v3, %s6460_s13  ;;  %4650 = vrot.lane.b32.xlu1 %v5332_v10, %s6460_s13 }
 0x598   : > { %v6371_v2 = vpop.eup %6370 }
 0x599   : > { %6384 = vrcp.f32 %v4008_v8  ;;  %v5335_v36 = vpack.c.bf16 %v6371_v2, %v6371_v2  ;;  %v6373_v25 = vpop.eup %6372 }
 0x59a   : > { %v5333_v13 = vpack.c.bf16 %v6373_v25, %v6373_v25 }
 0x59b   : > { %4646 = vrot.lane.b32.xlu1 %v5330_v29, %s6460_s13  ;;  %4656 = vrot.lane.b32.xlu0 %v5335_v36, %s6460_s13 }
 0x59c   : > { %v6375_v11 = vpop.eup %6374 }
 0x59d   : > { %v5336_v28 = vpack.c.bf16 %v6375_v11, %v6375_v11  ;;  %v6377_v19 = vpop.eup %6376 }
 0x59e   : > { %v5334_v15 = vpack.c.bf16 %v6377_v19, %v6377_v19 }
 0x59f   : > { %v6379_v20 = vpop.eup %6378  ;;  %4652 = vrot.lane.b32.xlu0 %v5333_v13, %s6460_s13  ;;  %4658 = vrot.lane.b32.xlu1 %v5336_v28, %s6460_s13 }
 0x5a0   : > { %v5339_v47 = vpack.c.bf16 %v6379_v20, %v6379_v20  ;;  %v5865_v17 = vpop.f32.mrf.mxu0 }
 0x5a1   : > { %v6381_v58 = vpop.eup %6380  ;;  %v3821_v22 = vsub.f32 0.0, %v5865_v17 }
 0x5a2   : > { %v3708_v61 = vpop.f32.mrf.mxu0  ;;  %v5337_v7 = vpack.c.bf16 %v6381_v58, %v6381_v58 }
 0x5a3   : > { %4654 = vrot.lane.b32.xlu1 %v5334_v15, %s6460_s13  ;;  %4664 = vrot.lane.b32.xlu0 %v5339_v47, %s6460_s13  ;;  %v3935_v62 = vmul.f32 1.442695, %v3821_v22  ;;  %v3819_v12 = vsub.f32 0.0, %v3708_v61 }
 0x5a4   : > { %v6383_v6 = vpop.eup %6382  ;;  %v5866_v27 = vpop.f32.mrf.mxu0 }
 0x5a5   : > { %v5340_v42 = vpack.c.bf16 %v6383_v6, %v6383_v6  ;;  %6386 = vpow2.f32 %v3935_v62  ;;  %v3931_v44 = vmul.f32 1.442695, %v3819_v12  ;;  %v3822_v55 = vsub.f32 0.0, %v5866_v27 }
 0x5a6   : > { %v6385_v43 = vpop.eup %6384  ;;  %v3711_v33 = vpop.f32.mrf.mxu0 }
 0x5a7   : > { %4660 = vrot.lane.b32.xlu0 %v5337_v7, %s6460_s13  ;;  %4666 = vrot.lane.b32.xlu1 %v5340_v42, %s6460_s13  ;;  %6388 = vpow2.f32 %v3931_v44  ;;  %v3937_v16 = vmul.f32 1.442695, %v3822_v55  ;;  %v3820_v48 = vsub.f32 0.0, %v3711_v33  ;;  %v5338_v21 = vpack.c.bf16 %v6385_v43, %v6385_v43 }
 0x5a9   : > { %6390 = vpow2.f32 %v3937_v16  ;;  %v3933_v26 = vmul.f32 1.442695, %v3820_v48 }
 0x5ab   : > { %4662 = vrot.lane.b32.xlu1 %v5338_v21, %s6460_s13  ;;  %6392 = vpow2.f32 %v3933_v26 }
 0x5ac   : > { %v4577_v31 = vpop.permute.xlu0 %4576 }
 0x5ad   : > { %4767 = vst.msk [vmem:[%s6871_s29 + $0x8] sm:$0xf] %vm4764_vm7, %v4577_v31 }
 0x5b0   : > { %v4573_v41 = vpop.permute.xlu0 %4572  ;;  %v4579_v0 = vpop.permute.xlu1 %4578 }
 0x5b1   : > { %4765 = vst.msk [vmem:[%s6871_s29] sm:$0xf] %vm4764_vm7, %v4573_v41  ;;  %4768 = vst.msk [vmem:[%s6871_s29 + $0xc] sm:$0xf] %vm4764_vm7, %v4579_v0 }
 0x5b2   : > { %v6387_v35 = vpop.eup %6386 }
 0x5b3   : > { %v4013_v30 = vadd.f32 1.0, %v6387_v35 }
 0x5b4   : > { %v6389_v38 = vpop.eup %6388  ;;  %v4575_v24 = vpop.permute.xlu1 %4574 }
 0x5b5   : > { %6394 = vrcp.f32 %v4013_v30  ;;  %v4011_v52 = vadd.f32 1.0, %v6389_v38  ;;  %4766 = vst.msk [vmem:[%s6871_s29 + $0x4] sm:$0xf] %vm4764_vm7, %v4575_v24 }
 0x5b6   : > { %v6391_v34 = vpop.eup %6390 }
 0x5b7   : > { %v5869_v39 = vpop.f32.mrf.mxu0  ;;  %6396 = vrcp.f32 %v4011_v52  ;;  %v4014_v57 = vadd.f32 1.0, %v6391_v34 }
 0x5b8   : > { %v3825_v51 = vsub.f32 0.0, %v5869_v39  ;;  %v6393_v49 = vpop.eup %6392 }
 0x5b9   : > { %v3724_v32 = vpop.f32.mrf.mxu0  ;;  %6398 = vrcp.f32 %v4014_v57  ;;  %v4012_v40 = vadd.f32 1.0, %v6393_v49 }
 0x5ba   : > { %v3943_v56 = vmul.f32 1.442695, %v3825_v51  ;;  %v3823_v4 = vsub.f32 0.0, %v3724_v32 }
 0x5bb   : > { %v5870_v54 = vpop.f32.mrf.mxu0  ;;  %6400 = vrcp.f32 %v4012_v40  ;;  %v4585_v46 = vpop.permute.xlu0 %4584 }
 0x5bc   : > { %v3939_v53 = vmul.f32 1.442695, %v3823_v4  ;;  %v3826_v59 = vsub.f32 0.0, %v5870_v54  ;;  %6402 = vpow2.f32 %v3943_v56  ;;  %4771 = vst.msk [vmem:[%s6871_s29 + $0x18] sm:$0xf] %vm4764_vm7, %v4585_v46 }
 0x5bd   : > { %v3727_v45 = vpop.f32.mrf.mxu0 }
 0x5be   : > { %6404 = vpow2.f32 %v3939_v53  ;;  %v3945_v37 = vmul.f32 1.442695, %v3826_v59  ;;  %v3824_v50 = vsub.f32 0.0, %v3727_v45 }
 0x5bf   : > { %v4581_v63 = vpop.permute.xlu0 %4580  ;;  %v4587_v60 = vpop.permute.xlu1 %4586 }
 0x5c0   : > { %6406 = vpow2.f32 %v3945_v37  ;;  %v3941_v14 = vmul.f32 1.442695, %v3824_v50  ;;  %4769 = vst.msk [vmem:[%s6871_s29 + $0x10] sm:$0xf] %vm4764_vm7, %v4581_v63  ;;  %4772 = vst.msk [vmem:[%s6871_s29 + $0x1c] sm:$0xf] %vm4764_vm7, %v4587_v60 }
 0x5c2   : > { %6408 = vpow2.f32 %v3941_v14  ;;  %v6395_v18 = vpop.eup %6394 }
 0x5c3   : > { %v5343_v9 = vpack.c.bf16 %v6395_v18, %v6395_v18  ;;  %v4583_v5 = vpop.permute.xlu1 %4582 }
 0x5c4   : > { %v6397_v10 = vpop.eup %6396  ;;  %4770 = vst.msk [vmem:[%s6871_s29 + $0x14] sm:$0xf] %vm4764_vm7, %v4583_v5 }
 0x5c5   : > { %4672 = vrot.lane.b32.xlu0 %v5343_v9, %s6460_s13  ;;  %v5341_v23 = vpack.c.bf16 %v6397_v10, %v6397_v10 }
 0x5c6   : > { %v6399_v1 = vpop.eup %6398 }
 0x5c7   : > { %v4593_v3 = vpop.permute.xlu0 %4592  ;;  %v5344_v8 = vpack.c.bf16 %v6399_v1, %v6399_v1  ;;  %v5873_v29 = vpop.f32.mrf.mxu0 }
 0x5c8   : > { %v6401_v2 = vpop.eup %6400  ;;  %4775 = vst.msk [vmem:[%s6871_s29 + $0x28] sm:$0xf] %vm4764_vm7, %v4593_v3  ;;  %v3829_v25 = vsub.f32 0.0, %v5873_v29 }
 0x5c9   : > { %v6403_v36 = vpop.eup %6402  ;;  %4668 = vrot.lane.b32.xlu0 %v5341_v23, %s6460_s13  ;;  %4674 = vrot.lane.b32.xlu1 %v5344_v8, %s6460_s13  ;;  %v3740_v28 = vpop.f32.mrf.mxu0  ;;  %v5342_v17 = vpack.c.bf16 %v6401_v2, %v6401_v2 }
 0x5ca   : > { %v4017_v13 = vadd.f32 1.0, %v6403_v36  ;;  %v3951_v20 = vmul.f32 1.442695, %v3829_v25  ;;  %v3827_v47 = vsub.f32 0.0, %v3740_v28 }
 0x5cb   : > { %v6405_v11 = vpop.eup %6404  ;;  %v4589_v15 = vpop.permute.xlu0 %4588 }
 0x5cc   : > { %v4015_v19 = vadd.f32 1.0, %v6405_v11  ;;  %6410 = vrcp.f32 %v4017_v13  ;;  %v5874_v22 = vpop.f32.mrf.mxu0  ;;  %4773 = vst.msk [vmem:[%s6871_s29 + $0x20] sm:$0xf] %vm4764_vm7, %v4589_v15  ;;  %v4595_v61 = vpop.permute.xlu1 %4594  ;;  %v3947_v62 = vmul.f32 1.442695, %v3827_v47 }
 0x5cd   : > { %v6407_v58 = vpop.eup %6406  ;;  %v3830_v12 = vsub.f32 0.0, %v5874_v22  ;;  %4776 = vst.msk [vmem:[%s6871_s29 + $0x2c] sm:$0xf] %vm4764_vm7, %v4595_v61  ;;  %4670 = vrot.lane.b32.xlu1 %v5342_v17, %s6460_s13 }
 0x5ce   : > { %6412 = vrcp.f32 %v4015_v19  ;;  %v4018_v6 = vadd.f32 1.0, %v6407_v58  ;;  %v3743_v42 = vpop.f32.mrf.mxu0 }
 0x5cf   : > { %v6409_v7 = vpop.eup %6408  ;;  %6414 = vpow2.f32 %v3951_v20  ;;  %v3953_v43 = vmul.f32 1.442695, %v3830_v12  ;;  %v3828_v44 = vsub.f32 0.0, %v3743_v42 }
 0x5d0   : > { %6416 = vrcp.f32 %v4018_v6  ;;  %v4016_v27 = vadd.f32 1.0, %v6409_v7  ;;  %v4591_v55 = vpop.permute.xlu1 %4590 }
 0x5d1   : > { %6418 = vpow2.f32 %v3947_v62  ;;  %v3949_v33 = vmul.f32 1.442695, %v3828_v44  ;;  %4774 = vst.msk [vmem:[%s6871_s29 + $0x24] sm:$0xf] %vm4764_vm7, %v4591_v55 }
 0x5d2   : > { %6420 = vrcp.f32 %v4016_v27  ;;  %v4601_v16 = vpop.permute.xlu0 %4600 }
 0x5d3   : > { %6422 = vpow2.f32 %v3953_v43  ;;  %4779 = vst.msk [vmem:[%s6871_s29 + $0x38] sm:$0xf] %vm4764_vm7, %v4601_v16 }
 0x5d4   : > { %6424 = vpow2.f32 %v3949_v33 }
 0x5d6   : > { %v4597_v48 = vpop.permute.xlu0 %4596  ;;  %v4603_v21 = vpop.permute.xlu1 %4602 }
 0x5d7   : > { %4777 = vst.msk [vmem:[%s6871_s29 + $0x30] sm:$0xf] %vm4764_vm7, %v4597_v48  ;;  %4780 = vst.msk [vmem:[%s6871_s29 + $0x3c] sm:$0xf] %vm4764_vm7, %v4603_v21  ;;  %v5877_v26 = vpop.f32.mrf.mxu0 }
 0x5d8   : > { %v3833_v41 = vsub.f32 0.0, %v5877_v26 }
 0x5d9   : > { %v6411_v31 = vpop.eup %6410  ;;  %v3756_v30 = vpop.f32.mrf.mxu0 }
 0x5da   : > { %v4599_v0 = vpop.permute.xlu1 %4598  ;;  %v5347_v38 = vpack.c.bf16 %v6411_v31, %v6411_v31  ;;  %v3959_v24 = vmul.f32 1.442695, %v3833_v41  ;;  %v3831_v34 = vsub.f32 0.0, %v3756_v30 }
 0x5db   : > { %v6413_v35 = vpop.eup %6412  ;;  %4778 = vst.msk [vmem:[%s6871_s29 + $0x34] sm:$0xf] %vm4764_vm7, %v4599_v0  ;;  %v4609_v39 = vpop.permute.xlu0 %4608 }
 0x5dc   : > { %v6415_v52 = vpop.eup %6414  ;;  %4783 = vst.msk [vmem:[%s6871_s29 + $0x48] sm:$0xf] %vm4764_vm7, %v4609_v39  ;;  %v5878_v49 = vpop.f32.mrf.mxu0  ;;  %4680 = vrot.lane.b32.xlu0 %v5347_v38, %s6460_s13  ;;  %6426 = vpow2.f32 %v3959_v24  ;;  %v3955_v40 = vmul.f32 1.442695, %v3831_v34  ;;  %v5345_v46 = vpack.c.bf16 %v6413_v35, %v6413_v35 }
 0x5dd   : > { %v6417_v57 = vpop.eup %6416  ;;  %v4021_v51 = vadd.f32 1.0, %v6415_v52  ;;  %v3834_v56 = vsub.f32 0.0, %v5878_v49 }
 0x5de   : > { %v6419_v32 = vpop.eup %6418  ;;  %v5348_v4 = vpack.c.bf16 %v6417_v57, %v6417_v57  ;;  %v3759_v59 = vpop.f32.mrf.mxu0 }
 0x5df   : > { %v6421_v54 = vpop.eup %6420  ;;  %6428 = vrcp.f32 %v4021_v51  ;;  %v4019_v53 = vadd.f32 1.0, %v6419_v32  ;;  %v3961_v37 = vmul.f32 1.442695, %v3834_v56  ;;  %v3832_v50 = vsub.f32 0.0, %v3759_v59  ;;  %v4605_v14 = vpop.permute.xlu0 %4604 }
 0x5e0   : > { %v6423_v45 = vpop.eup %6422  ;;  %6430 = vpow2.f32 %v3955_v40  ;;  %v4611_v63 = vpop.permute.xlu1 %4610  ;;  %4682 = vrot.lane.b32.xlu1 %v5348_v4, %s6460_s13  ;;  %4781 = vst.msk [vmem:[%s6871_s29 + $0x40] sm:$0xf] %vm4764_vm7, %v4605_v14  ;;  %4676 = vrot.lane.b32.xlu0 %v5345_v46, %s6460_s13  ;;  %v5346_v5 = vpack.c.bf16 %v6421_v54, %v6421_v54 }
 0x5e1   : > { %v6425_v60 = vpop.eup %6424  ;;  %6432 = vrcp.f32 %v4019_v53  ;;  %v4022_v18 = vadd.f32 1.0, %v6423_v45  ;;  %4784 = vst.msk [vmem:[%s6871_s29 + $0x4c] sm:$0xf] %vm4764_vm7, %v4611_v63  ;;  %v3957_v10 = vmul.f32 1.442695, %v3832_v50 }
 0x5e2   : > { %v4020_v9 = vadd.f32 1.0, %v6425_v60  ;;  %6434 = vpow2.f32 %v3961_v37 }
 0x5e3   : > { %6436 = vrcp.f32 %v4022_v18 }
 0x5e4   : > { %6438 = vrcp.f32 %v4020_v9  ;;  %v4607_v1 = vpop.permute.xlu1 %4606  ;;  %4678 = vrot.lane.b32.xlu1 %v5346_v5, %s6460_s13 }
 0x5e5   : > { %6440 = vpow2.f32 %v3957_v10  ;;  %v4617_v3 = vpop.permute.xlu0 %4616  ;;  %4782 = vst.msk [vmem:[%s6871_s29 + $0x44] sm:$0xf] %vm4764_vm7, %v4607_v1 }
 0x5e6   : > { %4787 = vst.msk [vmem:[%s6871_s29 + $0x58] sm:$0xf] %vm4764_vm7, %v4617_v3 }
 0x5e8   : > { %v4619_v23 = vpop.permute.xlu1 %4618 }
 0x5e9   : > { %v4613_v8 = vpop.permute.xlu0 %4612  ;;  %4788 = vst.msk [vmem:[%s6871_s29 + $0x5c] sm:$0xf] %vm4764_vm7, %v4619_v23  ;;  %v6427_v2 = vpop.eup %6426 }
 0x5ea   : > { %4785 = vst.msk [vmem:[%s6871_s29 + $0x50] sm:$0xf] %vm4764_vm7, %v4613_v8  ;;  %v4025_v19 = vadd.f32 1.0, %v6427_v2 }
 0x5ec   : > { %v6429_v29 = vpop.eup %6428  ;;  %v4615_v36 = vpop.permute.xlu1 %4614 }
 0x5ed   : > { %v6431_v25 = vpop.eup %6430  ;;  %v4625_v11 = vpop.permute.xlu0 %4624  ;;  %4786 = vst.msk [vmem:[%s6871_s29 + $0x54] sm:$0xf] %vm4764_vm7, %v4615_v36  ;;  %v5351_v13 = vpack.c.bf16 %v6429_v29, %v6429_v29 }
 0x5ee   : > { %v6433_v28 = vpop.eup %6432  ;;  %v4023_v20 = vadd.f32 1.0, %v6431_v25  ;;  %4791 = vst.msk [vmem:[%s6871_s29 + $0x68] sm:$0xf] %vm4764_vm7, %v4625_v11 }
 0x5ef   : > { %v6435_v47 = vpop.eup %6434  ;;  %4688 = vrot.lane.b32.xlu0 %v5351_v13, %s6460_s13  ;;  %v5349_v61 = vpack.c.bf16 %v6433_v28, %v6433_v28 }
 0x5f0   : > { %v6437_v15 = vpop.eup %6436  ;;  %6442 = vrcp.f32 %v4023_v20  ;;  %v4026_v12 = vadd.f32 1.0, %v6435_v47 }
 0x5f1   : > { %v6439_v17 = vpop.eup %6438  ;;  %v4621_v58 = vpop.permute.xlu0 %4620  ;;  %v5352_v6 = vpack.c.bf16 %v6437_v15, %v6437_v15  ;;  %6444 = vrcp.f32 %v4025_v19 }
 0x5f2   : > { %v4627_v22 = vpop.permute.xlu1 %4626  ;;  %v6441_v62 = vpop.eup %6440  ;;  %4789 = vst.msk [vmem:[%s6871_s29 + $0x60] sm:$0xf] %vm4764_vm7, %v4621_v58  ;;  %v5350_v43 = vpack.c.bf16 %v6439_v17, %v6439_v17 }
 0x5f3   : > { %4792 = vst.msk [vmem:[%s6871_s29 + $0x6c] sm:$0xf] %vm4764_vm7, %v4627_v22  ;;  %v4024_v7 = vadd.f32 1.0, %v6441_v62  ;;  %4684 = vrot.lane.b32.xlu0 %v5349_v61, %s6460_s13  ;;  %4690 = vrot.lane.b32.xlu1 %v5352_v6, %s6460_s13 }
 0x5f5   : > { %6446 = vrcp.f32 %v4024_v7  ;;  %v4633_v42 = vpop.permute.xlu0 %4632 }
 0x5f6   : > { %v4623_v27 = vpop.permute.xlu1 %4622  ;;  %4795 = vst.msk [vmem:[%s6871_s29 + $0x78] sm:$0xf] %vm4764_vm7, %v4633_v42  ;;  %6448 = vrcp.f32 %v4026_v12 }
 0x5f7   : > { %4790 = vst.msk [vmem:[%s6871_s29 + $0x64] sm:$0xf] %vm4764_vm7, %v4623_v27  ;;  %4686 = vrot.lane.b32.xlu1 %v5350_v43, %s6460_s13 }
 0x5f9   : > { %v4629_v44 = vpop.permute.xlu0 %4628 }
 0x5fa   : > { %v4635_v55 = vpop.permute.xlu1 %4634  ;;  %4793 = vst.msk [vmem:[%s6871_s29 + $0x70] sm:$0xf] %vm4764_vm7, %v4629_v44 }
 0x5fb   : > { %4796 = vst.msk [vmem:[%s6871_s29 + $0x7c] sm:$0xf] %vm4764_vm7, %v4635_v55 }
 0x5fd   : > { %v6443_v33 = vpop.eup %6442  ;;  %v4641_v16 = vpop.permute.xlu0 %4640 }
 0x5fe   : > { %v4631_v48 = vpop.permute.xlu1 %4630  ;;  %4799 = vst.msk [vmem:[%s6871_s29 + $0x88] sm:$0xf] %vm4764_vm7, %v4641_v16  ;;  %v5353_v21 = vpack.c.bf16 %v6443_v33, %v6443_v33  ;;  %v6445_v26 = vpop.eup %6444 }
 0x5ff   : > { %4794 = vst.msk [vmem:[%s6871_s29 + $0x74] sm:$0xf] %vm4764_vm7, %v4631_v48  ;;  %v5355_v35 = vpack.c.bf16 %v6445_v26, %v6445_v26 }
 0x600   : > { %4692 = vrot.lane.b32.xlu0 %v5353_v21, %s6460_s13 }
 0x601   : > { %v4637_v31 = vpop.permute.xlu0 %4636 }
 0x602   : > { %v4643_v41 = vpop.permute.xlu1 %4642  ;;  %v6447_v0 = vpop.eup %6446  ;;  %4797 = vst.msk [vmem:[%s6871_s29 + $0x80] sm:$0xf] %vm4764_vm7, %v4637_v31 }
 0x603   : > { %4800 = vst.msk [vmem:[%s6871_s29 + $0x8c] sm:$0xf] %vm4764_vm7, %v4643_v41  ;;  %v5354_v30 = vpack.c.bf16 %v6447_v0, %v6447_v0  ;;  %v6449_v38 = vpop.eup %6448 }
 0x604   : > { %4696 = vrot.lane.b32.xlu0 %v5355_v35, %s6460_s13  ;;  %v5356_v34 = vpack.c.bf16 %v6449_v38, %v6449_v38 }
 0x605   : > { %v4649_v52 = vpop.permute.xlu0 %4648  ;;  %4694 = vrot.lane.b32.xlu1 %v5354_v30, %s6460_s13 }
 0x606   : > { %v4639_v24 = vpop.permute.xlu1 %4638  ;;  %4803 = vst.msk [vmem:[%s6871_s29 + $0x98] sm:$0xf] %vm4764_vm7, %v4649_v52 }
 0x607   : > { %4798 = vst.msk [vmem:[%s6871_s29 + $0x84] sm:$0xf] %vm4764_vm7, %v4639_v24 }
 0x609   : > { %v4645_v39 = vpop.permute.xlu0 %4644  ;;  %4698 = vrot.lane.b32.xlu1 %v5356_v34, %s6460_s13 }
 0x60a   : > { %v4651_v57 = vpop.permute.xlu1 %4650  ;;  %4801 = vst.msk [vmem:[%s6871_s29 + $0x90] sm:$0xf] %vm4764_vm7, %v4645_v39 }
 0x60b   : > { %4804 = vst.msk [vmem:[%s6871_s29 + $0x9c] sm:$0xf] %vm4764_vm7, %v4651_v57 }
 0x60d   : > { %v4657_v51 = vpop.permute.xlu0 %4656 }
 0x60e   : > { %v4647_v49 = vpop.permute.xlu1 %4646  ;;  %4807 = vst.msk [vmem:[%s6871_s29 + $0xa8] sm:$0xf] %vm4764_vm7, %v4657_v51 }
 0x60f   : > { %4802 = vst.msk [vmem:[%s6871_s29 + $0x94] sm:$0xf] %vm4764_vm7, %v4647_v49 }
 0x611   : > { %v4653_v32 = vpop.permute.xlu0 %4652 }
 0x612   : > { %v4659_v40 = vpop.permute.xlu1 %4658  ;;  %4805 = vst.msk [vmem:[%s6871_s29 + $0xa0] sm:$0xf] %vm4764_vm7, %v4653_v32 }
 0x613   : > { %4808 = vst.msk [vmem:[%s6871_s29 + $0xac] sm:$0xf] %vm4764_vm7, %v4659_v40 }
 0x615   : > { %v4665_v56 = vpop.permute.xlu0 %4664 }
 0x616   : > { %v4655_v4 = vpop.permute.xlu1 %4654  ;;  %4811 = vst.msk [vmem:[%s6871_s29 + $0xb8] sm:$0xf] %vm4764_vm7, %v4665_v56 }
 0x617   : > { %4806 = vst.msk [vmem:[%s6871_s29 + $0xa4] sm:$0xf] %vm4764_vm7, %v4655_v4 }
 0x619   : > { %v4661_v54 = vpop.permute.xlu0 %4660 }
 0x61a   : > { %v4667_v53 = vpop.permute.xlu1 %4666  ;;  %4809 = vst.msk [vmem:[%s6871_s29 + $0xb0] sm:$0xf] %vm4764_vm7, %v4661_v54 }
 0x61b   : > { %4812 = vst.msk [vmem:[%s6871_s29 + $0xbc] sm:$0xf] %vm4764_vm7, %v4667_v53 }
 0x61e   : > { %v4663_v59 = vpop.permute.xlu1 %4662 }
 0x61f   : > { %4810 = vst.msk [vmem:[%s6871_s29 + $0xb4] sm:$0xf] %vm4764_vm7, %v4663_v59 }
 0x637   : > { %v4673_v46 = vpop.permute.xlu0 %4672 }
 0x638   : > { %4815 = vst.msk [vmem:[%s6871_s29 + $0xc8] sm:$0xf] %vm4764_vm7, %v4673_v46 }
 0x63b   : > { %v4669_v45 = vpop.permute.xlu0 %4668  ;;  %v4675_v37 = vpop.permute.xlu1 %4674 }
 0x63c   : > { %4813 = vst.msk [vmem:[%s6871_s29 + $0xc0] sm:$0xf] %vm4764_vm7, %v4669_v45  ;;  %4816 = vst.msk [vmem:[%s6871_s29 + $0xcc] sm:$0xf] %vm4764_vm7, %v4675_v37 }
 0x63f   : > { %v4671_v50 = vpop.permute.xlu1 %4670 }
 0x640   : > { %4814 = vst.msk [vmem:[%s6871_s29 + $0xc4] sm:$0xf] %vm4764_vm7, %v4671_v50 }
 0x64e   : > { %v4681_v14 = vpop.permute.xlu0 %4680 }
 0x64f   : > { %4819 = vst.msk [vmem:[%s6871_s29 + $0xd8] sm:$0xf] %vm4764_vm7, %v4681_v14 }
 0x652   : > { %v4683_v63 = vpop.permute.xlu1 %4682  ;;  %v4677_v60 = vpop.permute.xlu0 %4676 }
 0x653   : > { %4820 = vst.msk [vmem:[%s6871_s29 + $0xdc] sm:$0xf] %vm4764_vm7, %v4683_v63  ;;  %4817 = vst.msk [vmem:[%s6871_s29 + $0xd0] sm:$0xf] %vm4764_vm7, %v4677_v60 }
 0x656   : > { %v4679_v18 = vpop.permute.xlu1 %4678 }
 0x657   : > { %4818 = vst.msk [vmem:[%s6871_s29 + $0xd4] sm:$0xf] %vm4764_vm7, %v4679_v18 }
 0x661   : > { %v4689_v9 = vpop.permute.xlu0 %4688 }
 0x662   : > { %4823 = vst.msk [vmem:[%s6871_s29 + $0xe8] sm:$0xf] %vm4764_vm7, %v4689_v9 }
 0x665   : > { %v4685_v10 = vpop.permute.xlu0 %4684  ;;  %v4691_v5 = vpop.permute.xlu1 %4690 }
 0x666   : > { %4821 = vst.msk [vmem:[%s6871_s29 + $0xe0] sm:$0xf] %vm4764_vm7, %v4685_v10  ;;  %4824 = vst.msk [vmem:[%s6871_s29 + $0xec] sm:$0xf] %vm4764_vm7, %v4691_v5 }
 0x669   : > { %v4687_v1 = vpop.permute.xlu1 %4686 }
 0x66a   : > { %4822 = vst.msk [vmem:[%s6871_s29 + $0xe4] sm:$0xf] %vm4764_vm7, %v4687_v1 }
 0x672   : > { %v4693_v3 = vpop.permute.xlu0 %4692 }
 0x673   : > { %4825 = vst.msk [vmem:[%s6871_s29 + $0xf0] sm:$0xf] %vm4764_vm7, %v4693_v3 }
 0x676   : > { %v4697_v23 = vpop.permute.xlu0 %4696 }
 0x677   : > { %4827 = vst.msk [vmem:[%s6871_s29 + $0xf8] sm:$0xf] %vm4764_vm7, %v4697_v23  ;;  %v4695_v8 = vpop.permute.xlu1 %4694 }
 0x678   : > { %4826 = vst.msk [vmem:[%s6871_s29 + $0xf4] sm:$0xf] %vm4764_vm7, %v4695_v8 }
 0x67b   : > { %v4699_v2 = vpop.permute.xlu1 %4698 }
 0x67c   : > { %4828 = vst.msk [vmem:[%s6871_s29 + $0xfc] sm:$0xf] %vm4764_vm7, %v4699_v2 }
 0x67d PF: > { %s16_s21 = sadd.s32 1, %s6456_s21  }
 0x67e   : > { %p13_p4 = scmp.ge.s32.totalorder %s16_s21, 4  }
 0x680   :  { %15 = sbr.rel (!%p13_p4) target bundleno = 1 (0x1), region = 74 }

</bundles_post_ra>
